<compile_context>
chip_gen: v6e
topology: v6e:2x2x1
jax: 0.10.0
libtpu: 0.0.40
codegen_flags: <defaults>
</compile_context>

<pallas_src>
import jax
import jax.numpy as jnp
from jax.experimental import pallas as pl
from jax.experimental.pallas import tpu as pltpu


def sam_kernel(edge_q_ref, mask_q_ref, mask_k_ref,
               wq_ref, bq_ref, wk_ref, bk_ref, wv_ref, bv_ref, wo_ref, bo_ref,
               out_ref,
               q_sc, m_sc, l_sc, acc_sc):
    # Per-grid-step refs (batch dim squeezed away):
    #   edge_q_ref, mask_q_ref : (TQ, Cp)    mask_k_ref : (TK, Cp)
    #   wq/wk/wv : (Cp, Cip)   bq/bk/bv : (1, Cip)
    #   wo       : (Cip, Cp)   bo       : (1, Cp)
    #   out_ref  : (TQ, Cp)
    # scratch:
    #   q_sc (TQ, Cip) input-dtype, m_sc/l_sc (TQ, 1) f32, acc_sc (TQ, Cip) f32
    ki = pl.program_id(2)
    cd = q_sc.dtype  # compute dtype fed to the MXU (input dtype, e.g. bf16/f32)

    @pl.when(ki == 0)
    def _init():
        # Q projection for this query tile (1x1 conv + bias + ReLU), cached across k-steps.
        q = jnp.dot(edge_q_ref[...], wq_ref[...],
                    preferred_element_type=jnp.float32) + bq_ref[...]
        q_sc[...] = jnp.maximum(q, 0.0).astype(cd)
        m_sc[...] = jnp.full(m_sc.shape, -jnp.inf, dtype=m_sc.dtype)
        l_sc[...] = jnp.zeros(l_sc.shape, dtype=l_sc.dtype)
        acc_sc[...] = jnp.zeros(acc_sc.shape, dtype=acc_sc.dtype)

    # K / V projections for this key tile (1x1 conv + bias + ReLU).
    mk = mask_k_ref[...]
    k = jnp.maximum(jnp.dot(mk, wk_ref[...], preferred_element_type=jnp.float32)
                    + bk_ref[...], 0.0).astype(cd)
    v = jnp.maximum(jnp.dot(mk, wv_ref[...], preferred_element_type=jnp.float32)
                    + bv_ref[...], 0.0).astype(cd)

    # Attention logits (TQ, TK): contract over the inter-channel dim (f32 accumulate).
    s = jax.lax.dot_general(q_sc[...], k, (((1,), (1,)), ((), ())),
                            preferred_element_type=jnp.float32)

    # Online softmax: accumulate unnormalized; normalize once at the end.
    m_prev = m_sc[...]
    m_new = jnp.maximum(m_prev, jnp.max(s, axis=-1, keepdims=True))
    alpha = jnp.exp(m_prev - m_new)
    p = jnp.exp(s - m_new)
    l_sc[...] = alpha * l_sc[...] + jnp.sum(p, axis=-1, keepdims=True)
    acc_sc[...] = alpha * acc_sc[...] + jnp.dot(p.astype(cd), v,
                                                preferred_element_type=jnp.float32)
    m_sc[...] = m_new

    @pl.when(ki == pl.num_programs(2) - 1)
    def _finalize():
        # Deferred normalization on the (TQ, Cip) accumulator (EUP approx reciprocal),
        # conv_out (1x1 conv + bias + ReLU) and residual add with the mask features.
        y = acc_sc[...] * pl.reciprocal(l_sc[...], approx=True)
        o = jnp.dot(y.astype(cd), wo_ref[...],
                    preferred_element_type=jnp.float32) + bo_ref[...]
        out = mask_q_ref[...].astype(jnp.float32) + jnp.maximum(o, 0.0)
        out_ref[...] = out.astype(out_ref.dtype)


def _round_up(x, m):
    return (x + m - 1) // m * m


def _pick_tile(total, step, max_tile):
    """Largest divisor of `total` that is a multiple of `step` and <= max_tile."""
    if total <= max_tile:
        return total
    best = None
    t = step
    while t <= max_tile:
        if total % t == 0:
            best = t
        t += step
    return best if best is not None else total


def _pad2(x, rows, cols):
    return jnp.pad(x, ((0, rows - x.shape[0]), (0, cols - x.shape[1])))


def sam_pallas(mask_feats_nchw, edge_feats_nchw, params, *,
               max_q_tile=512, max_k_tile=512):
    """mask_feats/edge_feats: (N, C, H, W). Returns (N, C, H, W)."""
    n, c, h, w = mask_feats_nchw.shape
    hw = h * w
    ci = params["wq"].shape[1]
    cd = mask_feats_nchw.dtype

    # Pad channel dims to lane width (no-op for realistic C=256 / Ci=128,256).
    cp = _round_up(c, 128)
    cip = _round_up(ci, 128)

    # TODO(synk): keep activations channels-last (N, H, W, C) end-to-end in the surrounding
    # model so these HBM transpose round-trips disappear; they are layout glue, not compute.
    def to_nlc(x):
        x = jnp.transpose(x.reshape(n, c, hw), (0, 2, 1))  # (N, HW, C)
        if cp != c:
            x = jnp.pad(x, ((0, 0), (0, 0), (0, cp - c)))
        return x

    mask_nlc = to_nlc(mask_feats_nchw)
    edge_nlc = to_nlc(edge_feats_nchw)

    wq = _pad2(params["wq"], cp, cip).astype(cd)
    wk = _pad2(params["wk"], cp, cip).astype(cd)
    wv = _pad2(params["wv"], cp, cip).astype(cd)
    wo = _pad2(params["wo"], cip, cp).astype(cd)
    bq = _pad2(params["bq"], 1, cip).astype(jnp.float32)
    bk = _pad2(params["bk"], 1, cip).astype(jnp.float32)
    bv = _pad2(params["bv"], 1, cip).astype(jnp.float32)
    bo = _pad2(params["bo"], 1, cp).astype(jnp.float32)

    # Sublane packing: 8 rows for 4-byte dtypes, 16 for 2-byte dtypes.
    sub = 8 if mask_feats_nchw.dtype.itemsize >= 4 else 16
    tq = _pick_tile(hw, sub, max_q_tile)
    tk = _pick_tile(hw, sub, max_k_tile)
    grid = (n, hw // tq, hw // tk)

    q_spec = pl.BlockSpec((pl.Squeezed(), tq, cp), lambda b, qi, ki: (b, qi, 0))
    k_spec = pl.BlockSpec((pl.Squeezed(), tk, cp), lambda b, qi, ki: (b, ki, 0))
    w_in_spec = pl.BlockSpec((cp, cip), lambda b, qi, ki: (0, 0))
    b_in_spec = pl.BlockSpec((1, cip), lambda b, qi, ki: (0, 0))
    w_out_spec = pl.BlockSpec((cip, cp), lambda b, qi, ki: (0, 0))
    b_out_spec = pl.BlockSpec((1, cp), lambda b, qi, ki: (0, 0))
    out_spec = pl.BlockSpec((pl.Squeezed(), tq, cp), lambda b, qi, ki: (b, qi, 0))

    # Scoped VMEM: ~3/4 of physical capacity, capped at 100 MiB (v5e/v6e 128 MiB,
    # v7x 64 MiB -> 48 MiB), with a conservative fallback.
    try:
        vmem_cap = pltpu.get_tpu_info().vmem_capacity_bytes
        vmem_limit = int(min(100 * 1024 * 1024, vmem_cap * 3 // 4))
    except Exception:
        vmem_limit = 48 * 1024 * 1024

    out = pl.pallas_call(
        sam_kernel,
        out_shape=jax.ShapeDtypeStruct((n, hw, cp), cd),
        grid_spec=pltpu.PrefetchScalarGridSpec(
            num_scalar_prefetch=0,
            grid=grid,
            in_specs=[q_spec, q_spec, k_spec,
                      w_in_spec, b_in_spec,
                      w_in_spec, b_in_spec,
                      w_in_spec, b_in_spec,
                      w_out_spec, b_out_spec],
            out_specs=out_spec,
            scratch_shapes=[
                pltpu.VMEM((tq, cip), cd),           # cached Q tile
                pltpu.VMEM((tq, 1), jnp.float32),    # running row max
                pltpu.VMEM((tq, 1), jnp.float32),    # running row denom
                pltpu.VMEM((tq, cip), jnp.float32),  # unnormalized PV accumulator
            ]),
        compiler_params=pltpu.CompilerParams(
            dimension_semantics=("parallel", "parallel", "arbitrary"),
            vmem_limit_bytes=vmem_limit),
    )(edge_nlc, mask_nlc, mask_nlc,
      wq, bq, wk, bk, wv, bv, wo, bo)

    out = out[:, :, :c]                                  # drop channel padding
    return jnp.transpose(out, (0, 2, 1)).reshape(n, c, h, w)


def sam_reference(mask_feats_nchw, edge_feats_nchw, params):
    """Pure-JAX reference mirroring the PyTorch forward (for correctness check)."""
    n, c, h, w = mask_feats_nchw.shape
    hw = h * w
    mask = jnp.transpose(mask_feats_nchw.reshape(n, c, hw), (0, 2, 1))  # (n, hw, c)
    edge = jnp.transpose(edge_feats_nchw.reshape(n, c, hw), (0, 2, 1))

    def conv1x1_relu(x, wgt, bias):
        return jax.nn.relu(jnp.einsum("npc,cd->npd", x, wgt) + bias)

    q = conv1x1_relu(edge, params["wq"], params["bq"])   # (n, hw, ci)
    k = conv1x1_relu(mask, params["wk"], params["bk"])   # (n, hw, ci)
    v = conv1x1_relu(mask, params["wv"], params["bv"])   # (n, hw, ci)
    att = jnp.einsum("nqc,nkc->nqk", q, k)
    att = jax.nn.softmax(att, axis=-1)
    y = jnp.einsum("nqk,nkc->nqc", att, v)
    out = mask + jax.nn.relu(jnp.einsum("npc,cd->npd", y, params["wo"]) + params["bo"])
    return jnp.transpose(out, (0, 2, 1)).reshape(n, c, h, w)


def init_params(key, in_channels, reduction):
    inter = max(in_channels // reduction, 1)
    ks = jax.random.split(key, 8)
    scale_in = 1.0 / jnp.sqrt(in_channels)
    scale_mid = 1.0 / jnp.sqrt(inter)
    return {
        "wq": jax.random.normal(ks[0], (in_channels, inter), jnp.float32) * scale_in,
        "bq": jax.random.normal(ks[1], (1, inter), jnp.float32) * 0.1,
        "wk": jax.random.normal(ks[2], (in_channels, inter), jnp.float32) * scale_in,
        "bk": jax.random.normal(ks[3], (1, inter), jnp.float32) * 0.1,
        "wv": jax.random.normal(ks[4], (in_channels, inter), jnp.float32) * scale_in,
        "bv": jax.random.normal(ks[5], (1, inter), jnp.float32) * 0.1,
        "wo": jax.random.normal(ks[6], (inter, in_channels), jnp.float32) * scale_mid,
        "bo": jax.random.normal(ks[7], (1, in_channels), jnp.float32) * 0.1,
    }


if __name__ == "__main__":
    N, C, H, W = 2, 4, 16, 16
    reduction = 2

    key = jax.random.PRNGKey(0)
    k_mask, k_edge, k_param = jax.random.split(key, 3)
    mask_feats = jax.random.normal(k_mask, (N, C, H, W), jnp.float32)
    edge_feats = jax.random.normal(k_edge, (N, C, H, W), jnp.float32)
    params = init_params(k_param, C, reduction)

    ref = jax.block_until_ready(sam_reference(mask_feats, edge_feats, params))

    # Single-tile path (HW=256 fits one q/k tile).
    out = jax.block_until_ready(sam_pallas(mask_feats, edge_feats, params))
    assert out.shape == (N, C, H, W)
    assert jnp.allclose(out, ref, atol=2e-3, rtol=2e-3), "mismatch vs. reference"

    # Force multiple q/k tiles to exercise the online-softmax accumulation path.
    out_tiled = jax.block_until_ready(
        sam_pallas(mask_feats, edge_feats, params, max_q_tile=64, max_k_tile=64))
    assert jnp.allclose(out_tiled, ref, atol=2e-3, rtol=2e-3), "mismatch (tiled) vs. reference"

    print("KERNEL_OK")
</pallas_src>

<mosaic_0001>
module attributes {stable_mosaic.version = 11 : i64} {
  func.func @sam_kernel(%arg0: i32, %arg1: i32, %arg2: i32, %arg3: memref<1x256x128xf32, #tpu.memory_space<vmem>>, %arg4: memref<1x256x128xf32, #tpu.memory_space<vmem>>, %arg5: memref<1x256x128xf32, #tpu.memory_space<vmem>>, %arg6: memref<128x128xf32, #tpu.memory_space<vmem>>, %arg7: memref<1x128xf32, #tpu.memory_space<vmem>>, %arg8: memref<128x128xf32, #tpu.memory_space<vmem>>, %arg9: memref<1x128xf32, #tpu.memory_space<vmem>>, %arg10: memref<128x128xf32, #tpu.memory_space<vmem>>, %arg11: memref<1x128xf32, #tpu.memory_space<vmem>>, %arg12: memref<128x128xf32, #tpu.memory_space<vmem>>, %arg13: memref<1x128xf32, #tpu.memory_space<vmem>>, %arg14: memref<1x256x128xf32, #tpu.memory_space<vmem>>, %arg15: memref<256x128xf32, #tpu.memory_space<vmem>>, %arg16: memref<256x1xf32, #tpu.memory_space<vmem>>, %arg17: memref<256x1xf32, #tpu.memory_space<vmem>>, %arg18: memref<256x128xf32, #tpu.memory_space<vmem>>) attributes {dimension_semantics = [#tpu.dimension_semantics<parallel>, #tpu.dimension_semantics<parallel>, #tpu.dimension_semantics<arbitrary>], iteration_bounds = array<i64: 2, 1, 1>, scalar_prefetch = 0 : i64, scratch_operands = 4 : i64, tpu.core_type = #tpu.core_type<tc>, window_params = [{transform_indices = @transform_0, window_bounds = array<i64: 1, 256, 128>}, {transform_indices = @transform_1, window_bounds = array<i64: 1, 256, 128>}, {transform_indices = @transform_2, window_bounds = array<i64: 1, 256, 128>}, {pipeline_mode = #tpu.pipeline_mode<synchronous>, transform_indices = @transform_3, window_bounds = array<i64: 128, 128>}, {pipeline_mode = #tpu.pipeline_mode<synchronous>, transform_indices = @transform_4, window_bounds = array<i64: 1, 128>}, {pipeline_mode = #tpu.pipeline_mode<synchronous>, transform_indices = @transform_5, window_bounds = array<i64: 128, 128>}, {pipeline_mode = #tpu.pipeline_mode<synchronous>, transform_indices = @transform_6, window_bounds = array<i64: 1, 128>}, {pipeline_mode = #tpu.pipeline_mode<synchronous>, transform_indices = @transform_7, window_bounds = array<i64: 128, 128>}, {pipeline_mode = #tpu.pipeline_mode<synchronous>, transform_indices = @transform_8, window_bounds = array<i64: 1, 128>}, {pipeline_mode = #tpu.pipeline_mode<synchronous>, transform_indices = @transform_9, window_bounds = array<i64: 128, 128>}, {pipeline_mode = #tpu.pipeline_mode<synchronous>, transform_indices = @transform_10, window_bounds = array<i64: 1, 128>}, {transform_indices = @transform_11, window_bounds = array<i64: 1, 256, 128>}]} {
    %c0_i32 = arith.constant 0 : i32
    %0 = arith.cmpi eq, %arg2, %c0_i32 : i32
    %1 = arith.extui %0 : i1 to i32
    %c0_i32_0 = arith.constant 0 : i32
    %2 = arith.cmpi ne, %1, %c0_i32_0 : i32
    scf.if %2 {
      %c0_34 = arith.constant 0 : index
      %c0_35 = arith.constant 0 : index
      %c0_36 = arith.constant 0 : index
      %46 = vector.load %arg3[%c0_34, %c0_35, %c0_36] : memref<1x256x128xf32, #tpu.memory_space<vmem>>, vector<1x256x128xf32>
      %47 = vector.shape_cast %46 : vector<1x256x128xf32> to vector<256x128xf32>
      %c0_37 = arith.constant 0 : index
      %c0_38 = arith.constant 0 : index
      %48 = vector.load %arg6[%c0_37, %c0_38] : memref<128x128xf32, #tpu.memory_space<vmem>>, vector<128x128xf32>
      %cst_39 = arith.constant dense<0.000000e+00> : vector<256x128xf32>
      %49 = tpu.matmul %47, %48, %cst_39 {dimension_numbers = #tpu.dot_dimension_numbers<[1], [0], [0], [1], [0, 0, 1, 1], [], []>} : vector<256x128xf32>, vector<128x128xf32>, vector<256x128xf32> -> vector<256x128xf32>
      %c0_40 = arith.constant 0 : index
      %c0_41 = arith.constant 0 : index
      %50 = vector.load %arg7[%c0_40, %c0_41] : memref<1x128xf32, #tpu.memory_space<vmem>>, vector<1x128xf32>
      %51 = vector.broadcast %50 : vector<1x128xf32> to vector<256x128xf32>
      %52 = arith.addf %49, %51 : vector<256x128xf32>
      %cst_42 = arith.constant 0.000000e+00 : f32
      %53 = vector.broadcast %cst_42 : f32 to vector<256x128xf32>
      %54 = arith.maximumf %52, %53 : vector<256x128xf32>
      %c0_43 = arith.constant 0 : index
      %c0_44 = arith.constant 0 : index
      %55 = vector.load %arg15[%c0_43, %c0_44] : memref<256x128xf32, #tpu.memory_space<vmem>>, vector<256x128xf32>
      tpu.vector_store %arg15[%c0_43, %c0_44], %54 {strides = array<i32>} : memref<256x128xf32, #tpu.memory_space<vmem>>, vector<256x128xf32>,
      %cst_45 = arith.constant 0xFF800000 : f32
      %56 = vector.broadcast %cst_45 : f32 to vector<256x1xf32>
      %c0_46 = arith.constant 0 : index
      %c0_47 = arith.constant 0 : index
      %57 = vector.load %arg16[%c0_46, %c0_47] : memref<256x1xf32, #tpu.memory_space<vmem>>, vector<256x1xf32>
      tpu.vector_store %arg16[%c0_46, %c0_47], %56 {strides = array<i32>} : memref<256x1xf32, #tpu.memory_space<vmem>>, vector<256x1xf32>,
      %cst_48 = arith.constant 0.000000e+00 : f32
      %58 = vector.broadcast %cst_48 : f32 to vector<256x1xf32>
      %c0_49 = arith.constant 0 : index
      %c0_50 = arith.constant 0 : index
      %59 = vector.load %arg17[%c0_49, %c0_50] : memref<256x1xf32, #tpu.memory_space<vmem>>, vector<256x1xf32>
      tpu.vector_store %arg17[%c0_49, %c0_50], %58 {strides = array<i32>} : memref<256x1xf32, #tpu.memory_space<vmem>>, vector<256x1xf32>,
      %cst_51 = arith.constant 0.000000e+00 : f32
      %60 = vector.broadcast %cst_51 : f32 to vector<256x128xf32>
      %c0_52 = arith.constant 0 : index
      %c0_53 = arith.constant 0 : index
      %61 = vector.load %arg18[%c0_52, %c0_53] : memref<256x128xf32, #tpu.memory_space<vmem>>, vector<256x128xf32>
      tpu.vector_store %arg18[%c0_52, %c0_53], %60 {strides = array<i32>} : memref<256x128xf32, #tpu.memory_space<vmem>>, vector<256x128xf32>,
    } else {
    }
    %c0 = arith.constant 0 : index
    %c0_1 = arith.constant 0 : index
    %c0_2 = arith.constant 0 : index
    %3 = vector.load %arg5[%c0, %c0_1, %c0_2] : memref<1x256x128xf32, #tpu.memory_space<vmem>>, vector<1x256x128xf32>
    %4 = vector.shape_cast %3 : vector<1x256x128xf32> to vector<256x128xf32>
    %c0_3 = arith.constant 0 : index
    %c0_4 = arith.constant 0 : index
    %5 = vector.load %arg8[%c0_3, %c0_4] : memref<128x128xf32, #tpu.memory_space<vmem>>, vector<128x128xf32>
    %cst = arith.constant dense<0.000000e+00> : vector<256x128xf32>
    %6 = tpu.matmul %4, %5, %cst {dimension_numbers = #tpu.dot_dimension_numbers<[1], [0], [0], [1], [0, 0, 1, 1], [], []>} : vector<256x128xf32>, vector<128x128xf32>, vector<256x128xf32> -> vector<256x128xf32>
    %c0_5 = arith.constant 0 : index
    %c0_6 = arith.constant 0 : index
    %7 = vector.load %arg9[%c0_5, %c0_6] : memref<1x128xf32, #tpu.memory_space<vmem>>, vector<1x128xf32>
    %8 = vector.broadcast %7 : vector<1x128xf32> to vector<256x128xf32>
    %9 = arith.addf %6, %8 : vector<256x128xf32>
    %cst_7 = arith.constant 0.000000e+00 : f32
    %10 = vector.broadcast %cst_7 : f32 to vector<256x128xf32>
    %11 = arith.maximumf %9, %10 : vector<256x128xf32>
    %c0_8 = arith.constant 0 : index
    %c0_9 = arith.constant 0 : index
    %12 = vector.load %arg10[%c0_8, %c0_9] : memref<128x128xf32, #tpu.memory_space<vmem>>, vector<128x128xf32>
    %cst_10 = arith.constant dense<0.000000e+00> : vector<256x128xf32>
    %13 = tpu.matmul %4, %12, %cst_10 {dimension_numbers = #tpu.dot_dimension_numbers<[1], [0], [0], [1], [0, 0, 1, 1], [], []>} : vector<256x128xf32>, vector<128x128xf32>, vector<256x128xf32> -> vector<256x128xf32>
    %c0_11 = arith.constant 0 : index
    %c0_12 = arith.constant 0 : index
    %14 = vector.load %arg11[%c0_11, %c0_12] : memref<1x128xf32, #tpu.memory_space<vmem>>, vector<1x128xf32>
    %15 = vector.broadcast %14 : vector<1x128xf32> to vector<256x128xf32>
    %16 = arith.addf %13, %15 : vector<256x128xf32>
    %cst_13 = arith.constant 0.000000e+00 : f32
    %17 = vector.broadcast %cst_13 : f32 to vector<256x128xf32>
    %18 = arith.maximumf %16, %17 : vector<256x128xf32>
    %c0_14 = arith.constant 0 : index
    %c0_15 = arith.constant 0 : index
    %19 = vector.load %arg15[%c0_14, %c0_15] : memref<256x128xf32, #tpu.memory_space<vmem>>, vector<256x128xf32>
    %cst_16 = arith.constant dense<0.000000e+00> : vector<256x256xf32>
    %20 = tpu.matmul %19, %11, %cst_16 {dimension_numbers = #tpu.dot_dimension_numbers<[1], [1], [0], [0], [0, 0, 1, 0], [], []>} : vector<256x128xf32>, vector<256x128xf32>, vector<256x256xf32> -> vector<256x256xf32>
    %c0_17 = arith.constant 0 : index
    %c0_18 = arith.constant 0 : index
    %21 = vector.load %arg16[%c0_17, %c0_18] : memref<256x1xf32, #tpu.memory_space<vmem>>, vector<256x1xf32>
    %cst_19 = arith.constant dense<0xFF800000> : vector<256xf32>
    %22 = vector.multi_reduction <maximumf>, %20, %cst_19 [1] : vector<256x256xf32> to vector<256xf32>
    %23 = vector.shape_cast %22 : vector<256xf32> to vector<256x1xf32>
    %24 = arith.maximumf %21, %23 : vector<256x1xf32>
    %25 = arith.subf %21, %24 : vector<256x1xf32>
    %26 = math.exp %25 : vector<256x1xf32>
    %27 = vector.broadcast %24 : vector<256x1xf32> to vector<256x256xf32>
    %28 = arith.subf %20, %27 : vector<256x256xf32>
    %29 = math.exp %28 : vector<256x256xf32>
    %c0_20 = arith.constant 0 : index
    %c0_21 = arith.constant 0 : index
    %30 = vector.load %arg17[%c0_20, %c0_21] : memref<256x1xf32, #tpu.memory_space<vmem>>, vector<256x1xf32>
    %31 = arith.mulf %26, %30 : vector<256x1xf32>
    %cst_22 = arith.constant dense<0.000000e+00> : vector<256xf32>
    %32 = vector.multi_reduction <add>, %29, %cst_22 [1] : vector<256x256xf32> to vector<256xf32>
    %33 = vector.shape_cast %32 : vector<256xf32> to vector<256x1xf32>
    %34 = arith.addf %31, %33 : vector<256x1xf32>
    %c0_23 = arith.constant 0 : index
    %c0_24 = arith.constant 0 : index
    %35 = vector.load %arg17[%c0_23, %c0_24] : memref<256x1xf32, #tpu.memory_space<vmem>>, vector<256x1xf32>
    tpu.vector_store %arg17[%c0_23, %c0_24], %34 {strides = array<i32>} : memref<256x1xf32, #tpu.memory_space<vmem>>, vector<256x1xf32>,
    %c0_25 = arith.constant 0 : index
    %c0_26 = arith.constant 0 : index
    %36 = vector.load %arg18[%c0_25, %c0_26] : memref<256x128xf32, #tpu.memory_space<vmem>>, vector<256x128xf32>
    %37 = vector.broadcast %26 : vector<256x1xf32> to vector<256x128xf32>
    %38 = arith.mulf %37, %36 : vector<256x128xf32>
    %cst_27 = arith.constant dense<0.000000e+00> : vector<256x128xf32>
    %39 = tpu.matmul %29, %18, %cst_27 {dimension_numbers = #tpu.dot_dimension_numbers<[1], [0], [0], [1], [0, 0, 1, 1], [], []>} : vector<256x256xf32>, vector<256x128xf32>, vector<256x128xf32> -> vector<256x128xf32>
    %40 = arith.addf %38, %39 : vector<256x128xf32>
    %c0_28 = arith.constant 0 : index
    %c0_29 = arith.constant 0 : index
    %41 = vector.load %arg18[%c0_28, %c0_29] : memref<256x128xf32, #tpu.memory_space<vmem>>, vector<256x128xf32>
    tpu.vector_store %arg18[%c0_28, %c0_29], %40 {strides = array<i32>} : memref<256x128xf32, #tpu.memory_space<vmem>>, vector<256x128xf32>,
    %c0_30 = arith.constant 0 : index
    %c0_31 = arith.constant 0 : index
    %42 = vector.load %arg16[%c0_30, %c0_31] : memref<256x1xf32, #tpu.memory_space<vmem>>, vector<256x1xf32>
    tpu.vector_store %arg16[%c0_30, %c0_31], %24 {strides = array<i32>} : memref<256x1xf32, #tpu.memory_space<vmem>>, vector<256x1xf32>,
    %c0_i32_32 = arith.constant 0 : i32
    %43 = arith.cmpi eq, %arg2, %c0_i32_32 : i32
    %44 = arith.extui %43 : i1 to i32
    %c0_i32_33 = arith.constant 0 : i32
    %45 = arith.cmpi ne, %44, %c0_i32_33 : i32
    scf.if %45 {
      %c0_34 = arith.constant 0 : index
      %c0_35 = arith.constant 0 : index
      %46 = vector.load %arg18[%c0_34, %c0_35] : memref<256x128xf32, #tpu.memory_space<vmem>>, vector<256x128xf32>
      %c0_36 = arith.constant 0 : index
      %c0_37 = arith.constant 0 : index
      %47 = vector.load %arg17[%c0_36, %c0_37] : memref<256x1xf32, #tpu.memory_space<vmem>>, vector<256x1xf32>
      %48 = tpu.reciprocal %47 {approx = true} : vector<256x1xf32> -> vector<256x1xf32>
      %49 = vector.broadcast %48 : vector<256x1xf32> to vector<256x128xf32>
      %50 = arith.mulf %46, %49 : vector<256x128xf32>
      %c0_38 = arith.constant 0 : index
      %c0_39 = arith.constant 0 : index
      %51 = vector.load %arg12[%c0_38, %c0_39] : memref<128x128xf32, #tpu.memory_space<vmem>>, vector<128x128xf32>
      %cst_40 = arith.constant dense<0.000000e+00> : vector<256x128xf32>
      %52 = tpu.matmul %50, %51, %cst_40 {dimension_numbers = #tpu.dot_dimension_numbers<[1], [0], [0], [1], [0, 0, 1, 1], [], []>} : vector<256x128xf32>, vector<128x128xf32>, vector<256x128xf32> -> vector<256x128xf32>
      %c0_41 = arith.constant 0 : index
      %c0_42 = arith.constant 0 : index
      %53 = vector.load %arg13[%c0_41, %c0_42] : memref<1x128xf32, #tpu.memory_space<vmem>>, vector<1x128xf32>
      %54 = vector.broadcast %53 : vector<1x128xf32> to vector<256x128xf32>
      %55 = arith.addf %52, %54 : vector<256x128xf32>
      %c0_43 = arith.constant 0 : index
      %c0_44 = arith.constant 0 : index
      %c0_45 = arith.constant 0 : index
      %56 = vector.load %arg4[%c0_43, %c0_44, %c0_45] : memref<1x256x128xf32, #tpu.memory_space<vmem>>, vector<1x256x128xf32>
      %57 = vector.shape_cast %56 : vector<1x256x128xf32> to vector<256x128xf32>
      %cst_46 = arith.constant 0.000000e+00 : f32
      %58 = vector.broadcast %cst_46 : f32 to vector<256x128xf32>
      %59 = arith.maximumf %55, %58 : vector<256x128xf32>
      %60 = arith.addf %57, %59 : vector<256x128xf32>
      %c0_47 = arith.constant 0 : index
      %c0_48 = arith.constant 0 : index
      %c0_49 = arith.constant 0 : index
      %61 = vector.load %arg14[%c0_47, %c0_48, %c0_49] : memref<1x256x128xf32, #tpu.memory_space<vmem>>, vector<1x256x128xf32>
      %62 = vector.shape_cast %61 : vector<1x256x128xf32> to vector<256x128xf32>
      %63 = vector.shape_cast %60 : vector<256x128xf32> to vector<1x256x128xf32>
      tpu.vector_store %arg14[%c0_47, %c0_48, %c0_49], %63 {strides = array<i32>} : memref<1x256x128xf32, #tpu.memory_space<vmem>>, vector<1x256x128xf32>,
    } else {
    }
    return
  }
  func.func @transform_0(%arg0: i32, %arg1: i32, %arg2: i32) -> (i32, i32, i32) {
    %c0_i32 = arith.constant 0 : i32
    %c0_i32_0 = arith.constant 0 : i32
    return %arg0, %arg1, %c0_i32 : i32, i32, i32
  }
  func.func @transform_1(%arg0: i32, %arg1: i32, %arg2: i32) -> (i32, i32, i32) {
    %c0_i32 = arith.constant 0 : i32
    %c0_i32_0 = arith.constant 0 : i32
    return %arg0, %arg1, %c0_i32 : i32, i32, i32
  }
  func.func @transform_2(%arg0: i32, %arg1: i32, %arg2: i32) -> (i32, i32, i32) {
    %c0_i32 = arith.constant 0 : i32
    %c0_i32_0 = arith.constant 0 : i32
    return %arg0, %arg2, %c0_i32 : i32, i32, i32
  }
  func.func @transform_3(%arg0: i32, %arg1: i32, %arg2: i32) -> (i32, i32) {
    %c0_i32 = arith.constant 0 : i32
    %c0_i32_0 = arith.constant 0 : i32
    %c0_i32_1 = arith.constant 0 : i32
    return %c0_i32, %c0_i32_0 : i32, i32
  }
  func.func @transform_4(%arg0: i32, %arg1: i32, %arg2: i32) -> (i32, i32) {
    %c0_i32 = arith.constant 0 : i32
    %c0_i32_0 = arith.constant 0 : i32
    %c0_i32_1 = arith.constant 0 : i32
    return %c0_i32, %c0_i32_0 : i32, i32
  }
  func.func @transform_5(%arg0: i32, %arg1: i32, %arg2: i32) -> (i32, i32) {
    %c0_i32 = arith.constant 0 : i32
    %c0_i32_0 = arith.constant 0 : i32
    %c0_i32_1 = arith.constant 0 : i32
    return %c0_i32, %c0_i32_0 : i32, i32
  }
  func.func @transform_6(%arg0: i32, %arg1: i32, %arg2: i32) -> (i32, i32) {
    %c0_i32 = arith.constant 0 : i32
    %c0_i32_0 = arith.constant 0 : i32
    %c0_i32_1 = arith.constant 0 : i32
    return %c0_i32, %c0_i32_0 : i32, i32
  }
  func.func @transform_7(%arg0: i32, %arg1: i32, %arg2: i32) -> (i32, i32) {
    %c0_i32 = arith.constant 0 : i32
    %c0_i32_0 = arith.constant 0 : i32
    %c0_i32_1 = arith.constant 0 : i32
    return %c0_i32, %c0_i32_0 : i32, i32
  }
  func.func @transform_8(%arg0: i32, %arg1: i32, %arg2: i32) -> (i32, i32) {
    %c0_i32 = arith.constant 0 : i32
    %c0_i32_0 = arith.constant 0 : i32
    %c0_i32_1 = arith.constant 0 : i32
    return %c0_i32, %c0_i32_0 : i32, i32
  }
  func.func @transform_9(%arg0: i32, %arg1: i32, %arg2: i32) -> (i32, i32) {
    %c0_i32 = arith.constant 0 : i32
    %c0_i32_0 = arith.constant 0 : i32
    %c0_i32_1 = arith.constant 0 : i32
    return %c0_i32, %c0_i32_0 : i32, i32
  }
  func.func @transform_10(%arg0: i32, %arg1: i32, %arg2: i32) -> (i32, i32) {
    %c0_i32 = arith.constant 0 : i32
    %c0_i32_0 = arith.constant 0 : i32
    %c0_i32_1 = arith.constant 0 : i32
    return %c0_i32, %c0_i32_0 : i32, i32
  }
  func.func @transform_11(%arg0: i32, %arg1: i32, %arg2: i32) -> (i32, i32, i32) {
    %c0_i32 = arith.constant 0 : i32
    %c0_i32_0 = arith.constant 0 : i32
    return %arg0, %arg1, %c0_i32 : i32, i32, i32
  }
}

</mosaic_0001>

<bundles_post_ra>
// kernel: tpu_custom_call.1
= control target key start
LH: loop header
LB: loop body
LE: loop exit
PB: predicated region body
PF: predicated region fallthrough
CT: control target
= control target key end

     0   :  { %s7524_s0 = inlined_call_operand.hbm [shape: f32[2,256,128], index: 0, kind: input, shape index: {}]   ;;  %s7525_s1 = inlined_call_operand.hbm [shape: f32[2,256,128], index: 1, kind: input, shape index: {}]   ;;  %s7526_s2 = inlined_call_operand.hbm [shape: f32[2,256,128], index: 2, kind: input, shape index: {}]   ;;  %s7527_s3 = inlined_call_operand.hbm [shape: f32[128,128], index: 3, kind: input, shape index: {}]   ;;  %s7528_s4 = inlined_call_operand.vmem [shape: f32[1,128], index: 4, kind: input, shape index: {}]   ;;  %s7529_s5 = inlined_call_operand.hbm [shape: f32[128,128], index: 5, kind: input, shape index: {}]   ;;  %s7530_s6 = inlined_call_operand.vmem [shape: f32[1,128], index: 6, kind: input, shape index: {}]   ;;  %s7531_s7 = inlined_call_operand.hbm [shape: f32[128,128], index: 7, kind: input, shape index: {}]   ;;  %s7532_s8 = inlined_call_operand.vmem [shape: f32[1,128], index: 8, kind: input, shape index: {}]   ;;  %s7533_s9 = inlined_call_operand.hbm [shape: f32[128,128], index: 9, kind: input, shape index: {}]   ;;  %s7534_s10 = inlined_call_operand.vmem [shape: f32[1,128], index: 10, kind: input, shape index: {}]   ;;  %s7535_s11 = inlined_call_operand.hbm [shape: f32[2,256,128], index: 11, kind: output, shape index: {}]  }
   0x1   :  { %7640 = sst [smem:[#allocation98_spill]] %s7525_s1 }
   0x2   :  { %7641 = sst [smem:[#allocation99_spill]] %s7527_s3 }
   0x3   :  { %7642 = sst [smem:[#allocation100_spill]] %s7529_s5 }
   0x4   :  { %7643 = sst [smem:[#allocation101_spill]] %s7531_s7 }
   0x5   :  { %7644 = sst [smem:[#allocation102_spill]] %s7535_s11 }
   0x6   :  { %16 = vsyncpa [#allocation7], 0 }
   0x7   :  { %18 = vsyncpa [#allocation7 + $0x1], 0 }
   0x8   :  { %19 = vsyncpa [#allocation10], 0 }
   0x9   :  { %21 = vsyncpa [#allocation10 + $0x1], 0 }
   0xa   :  { %22 = vsyncpa [#allocation13], 0 }
   0xb   :  { %23 = vsyncpa [#allocation16], 0 }
   0xc   :  { %24 = vsyncpa [#allocation8], 0 }
   0xd   :  { %26 = vsyncpa [#allocation8 + $0x1], 0  ;;  %s5523_s17 = smov 0   ;;  %s5525_s18 = smov 0  }
   0xe   :  { %s5527_s19 = smov 0   ;;  %s5529_s20 = smov 0  }
   0xf   :  { %s5531_s21 = smov 0   ;;  %s5533_s22 = smov 0  }
  0x10 LB: > { %7645 = sst [smem:[#allocation24_spill]] %s5426_s17  ;;  %s5554_s23 = sadd.s32 4294967295, %s5446_s22   ;;  %s5446_s22 = sphi %s5533_s22, %s32_s22   ;;  %s5442_s21 = sphi %s5531_s21, %s7893_s21   ;;  %s5438_s20 = sphi %s5529_s20, %s7892_s20   ;;  %s5434_s19 = sphi %s5527_s19, %s7896_s19   ;;  %s5430_s18 = sphi %s5525_s18, %s7895_s18   ;;  %s5426_s17 = sphi %s5523_s17, %s7894_s17  }
  0x11   : > { %7646 = sst [smem:[#allocation25_spill]] %s5438_s20  ;;  %s4142_s24 = sadd.s32 4294967294, %s5446_s22  }
  0x12   : > { %7647 = sst [smem:[#allocation26_spill]] %s5442_s21  ;;  %p73_p0 = scmp.ne.s32.totalorder %s5430_s18, %s5426_s17 }
  0x13   : > { %7648 = sst [smem:[#allocation27_spill]] %s5446_s22  ;;  %p7537_p1 = scmp.eq.s32.totalorder %s5554_s23, 0 }
  0x14   : > { %p323_p2 = scmp.eq.s32.totalorder %s5554_s23, 1  ;;  %p329_p3 = scmp.eq.s32.totalorder %s4142_s24, 1 }
  0x15   : > { %p5563_p4 = por %p7537_p1, %p73_p0  ;;  %p4143_p5 = scmp.ge.s32.totalorder %s5446_s22, 1 }
  0x16   : > { %p5568_p6 = por %p329_p3, %p73_p0  ;;  %p336_p7 = scmp.lt.s32.totalorder %s5446_s22, 3 }
  0x17   : > { %s5448_s28 = smov [#allocation12]   ;;  %s5449_s12 = smov [#allocation15]  }
  0x18   : > { %s7650_s26 = scalar_select %p5568_p6, 1, 0 }
  0x19   : > { %p5573_p8 = pnand %p4143_p5, %p336_p7  ;;  %s348_s29 = sshll.u32 %s5448_s28, 4  ;;  %s349_s29 = int_to_ptr.vmem [resolvable:$true] %s348_s29 }
  0x1a   : > { %7651 = sst [smem:[#allocation28_spill]] %s7650_s26  ;;  %s380_s13 = sshll.u32 %s5449_s12, 4  ;;  %s381_s13 = int_to_ptr.vmem [resolvable:$true] %s380_s13 }
  0x1b   : > { %p4812_p9 = pneg %p5573_p8  ;;  %s5177_s14 = scalar_lea.vmem %s349_s29, 2048 }
  0x1c   : > { %p5178_p13 = scmp.ne.s32.totalorder %s349_s29, %s5177_s14  ;;  %p5185_p5 = scmp.lt.s32.totalorder %s349_s29, %s349_s29 }
  0x1d   : > { %p5582_p11 = pnand %p4812_p9, %p7537_p1  ;;  %p5186_p7 = scmp.lt.s32.totalorder %s5177_s14, %s5177_s14 }
  0x1f   : > { %p7549_p12 = pneg %p5582_p11  ;;  %p5187_p10 = por %p5186_p7, %p5185_p5 }
  0x21   : > { %p5180_p0 = pnand %p5178_p13, %p7549_p12 }
  0x23   : > { %p5181_p3 = pneg %p5180_p0 }
  0x25   : > { %p5188_p9 = pnand %p5187_p10, %p5181_p3 }
  0x27   : > { %5191 = shalt.err (!%p5188_p9)
}
  0x28   : > { %s7538_s15 = smov 128   ;;  %s7540_s16 = smov 8  }
  0x29   : > { %s7654_s3 = sld [smem:[#allocation99_spill]]  ;;  %s5203_s12 = scalar_lea.vmem %s381_s13, 2048 }
  0x2a   : > { %p5204_p13 = scmp.ne.s32.totalorder %s381_s13, %s5203_s12  ;;  %p5211_p10 = scmp.lt.s32.totalorder %s381_s13, %s381_s13 }
  0x2b   : > { %p5212_p3 = scmp.lt.s32.totalorder %s5203_s12, %s5203_s12 }
  0x2c   : > { %p5206_p0 = pnand %p5204_p13, %p7549_p12 }
  0x2d   : > { %p5213_p7 = por %p5212_p3, %p5211_p10 }
  0x2e   : > { %p5207_p5 = pneg %p5206_p0 }
  0x2f   : > { %4815 = dma.hbm_to_vmem [thread:$0]  (!%p5582_p11), %s7654_s3, 2048, %s349_s29, [#allocation13], %s7538_s15, %s7538_s15, %s7540_s16  }
  0x30   : > { %p5214_p9 = pnand %p5213_p7, %p5207_p5 }
  0x32   : > { %5217 = shalt.err (!%p5214_p9)
}
  0x33   : > { %s7655_s7 = sld [smem:[#allocation101_spill]]  ;;  %s51_s29 = sadd.s32 1, %s5442_s21 }
  0x34   : > { %s60_s24 = sadd.s32 1, %s5434_s19  ;;  %p53_p13 = scmp.ge.s32.totalorder %s51_s29, 2 }
  0x35   : > { %p67_p0 = scmp.ne.s32.totalorder %s5434_s19, %s5430_s18  ;;  %p68_p5 = scmp.eq.s32.totalorder %s5446_s22, 0 }
  0x36   : > { %p4843_p10 = scmp.lt.s32.totalorder %s5446_s22, 2  ;;  %s7898_s29 = smov (%p53_p13, %s51_s29), 0 }
  0x37   : > { %7656 = sst [smem:[#allocation29_spill]] %s7898_s29  ;;  %p69_p3 = por %p68_p5, %p67_p0 }
  0x38   : > { %p5620_p7 = por %p323_p2, %p67_p0  ;;  %s55_s28 = ssub.s32 %s5442_s21, %s7898_s29 }
  0x39   : > { %4821 = dma.hbm_to_vmem [thread:$0]  (!%p5582_p11), %s7655_s7, 2048, %s381_s13, [#allocation16], %s7538_s15, %s7538_s15, %s7540_s16  }
  0x3a   : > { %s7657_s26 = scalar_select %p5620_p7, 1, 0 }
  0x3b   : > { %s7544_s12 = sand.u32 1, %s5434_s19   ;;  %p58_p9 = scmp.eq.s32.totalorder %s55_s28, 0 }
  0x3c   : > { %7658 = sst [smem:[#allocation30_spill]] %s7657_s26  ;;  %s5629_s13 = sshll.u32 %s7544_s12, 8 }
  0x3d   : > { %s5632_s14 = sshll.u32 %s5442_s21, 12  ;;  %p5634_p1 = pnand %p4843_p10, %p69_p3 }
  0x3e   : > { %s5639_s16 = scalar_select %p58_p9, %s5434_s19, %s60_s24  }
  0x3f   : > { %s436_s3 = sand.u32 1, %s5446_s22   ;;  %s7661_s1 = sld [smem:[#allocation98_spill]] }
  0x40   : > { %7660 = sst [smem:[#allocation31_spill]] %s5639_s16  ;;  %s440_s17 = scalar_lea.vmem [#allocation9], %s5629_s13 }
  0x41   : > { %s449_s12 = sshll.u32 %s440_s17, 4  ;;  %s5647_s11 = scalar_lea.sflag [#allocation10], %s436_s3  ;;  %s450_s12 = int_to_ptr.vmem [resolvable:$true] %s449_s12 }
  0x42   : > { %p7552_p2 = pneg %p5634_p1  ;;  %s5231_s21 = scalar_lea.vmem %s450_s12, 4096 }
  0x43   : > { %p5232_p13 = scmp.ne.s32.totalorder %s450_s12, %s5231_s21  ;;  %s5452_s24 = smov [#allocation9]  }
  0x44   : > { %s5236_s16 = sshll.u32 %s5452_s24, 4  ;;  %s5237_s16 = int_to_ptr.vmem [resolvable:$false] %s5236_s16 }
  0x45   : > { %s448_s28 = scalar_lea.hbm %s7661_s1, %s5632_s14  ;;  %p5234_p0 = pnand %p5232_p13, %p7552_p2 }
  0x46   : > { %s5238_s22 = scalar_lea.vmem %s5237_s16, 8192  ;;  %p5239_p10 = scmp.lt.s32.totalorder %s450_s12, %s5237_s16 }
  0x47   : > { %p5235_p5 = pneg %p5234_p0  ;;  %p5240_p3 = scmp.lt.s32.totalorder %s5238_s22, %s5231_s21 }
  0x49   : > { %p5241_p9 = por %p5240_p3, %p5239_p10 }
  0x4b   : > { %p5242_p12 = pnand %p5241_p9, %p5235_p5 }
  0x4d   : > { %5245 = shalt.err (!%p5242_p12)
}
  0x4e   : > { %s7662_s3 = smov 8   ;;  %s7663_s7 = smov 128  }
  0x4f   : > { %4831 = dma.hbm_to_vmem [thread:$0]  (!%p5634_p1), %s448_s28, 4096, %s450_s12, %s5647_s11, %s7663_s7, %s7663_s7, %s7662_s3  }
  0x50   : > { %s5453_s17 = smov [#allocation14]   ;;  %s5454_s1 = smov [#allocation17]  }
  0x51   : > { %s364_s29 = sshll.u32 %s5453_s17, 4  ;;  %s396_s24 = sshll.u32 %s5454_s1, 4  ;;  %s365_s29 = int_to_ptr.vmem [resolvable:$true] %s364_s29  ;;  %s397_s24 = int_to_ptr.vmem [resolvable:$true] %s396_s24 }
  0x52   : > { %s5257_s26 = scalar_lea.vmem %s365_s29, 2048  ;;  %p7664_p0 = pneg %p5582_p11 }
  0x53   : > { %p5258_p13 = scmp.ne.s32.totalorder %s365_s29, %s5257_s26  ;;  %p5265_p12 = scmp.lt.s32.totalorder %s365_s29, %s365_s29 }
  0x54   : > { %p5266_p3 = scmp.lt.s32.totalorder %s5257_s26, %s5257_s26 }
  0x55   : > { %p5260_p10 = pnand %p5258_p13, %p7664_p0 }
  0x56   : > { %p5267_p9 = por %p5266_p3, %p5265_p12 }
  0x57   : > { %p5261_p5 = pneg %p5260_p10 }
  0x59   : > { %p5268_p2 = pnand %p5267_p9, %p5261_p5 }
  0x5b   : > { %5271 = shalt.err (!%p5268_p2)
}
  0x5c   : > { %s7665_s5 = sld [smem:[#allocation100_spill]]  ;;  %s5283_s1 = scalar_lea.vmem %s397_s24, 2048 }
  0x5d   : > { %p5284_p6 = scmp.ne.s32.totalorder %s397_s24, %s5283_s1  ;;  %p7666_p13 = pmov %p7664_p0 }
  0x5e   : > { %p5291_p12 = scmp.lt.s32.totalorder %s397_s24, %s397_s24  ;;  %p5292_p5 = scmp.lt.s32.totalorder %s5283_s1, %s5283_s1 }
  0x5f   : > { %p5286_p0 = pnand %p5284_p6, %p7666_p13 }
  0x60   : > { %p5293_p2 = por %p5292_p5, %p5291_p12 }
  0x61   : > { %p5287_p10 = pneg %p5286_p0 }
  0x62   : > { %4818 = dma.hbm_to_vmem [thread:$0]  (!%p5582_p11), %s7665_s5, 2048, %s365_s29, [#allocation13], %s7663_s7, %s7663_s7, %s7662_s3  }
  0x63   : > { %p5294_p3 = pnand %p5293_p2, %p5287_p10 }
  0x65   : > { %5297 = shalt.err (!%p5294_p3)
}
  0x66   : > { %4824 = dma.hbm_to_vmem [thread:$0]  (!%p5582_p11), %s7533_s9, 2048, %s397_s24, [#allocation16], %s7663_s7, %s7663_s7, %s7662_s3  }
  0x67   : > { %s425_s17 = scalar_lea.hbm %s7524_s0, %s5632_s14  ;;  %s417_s29 = scalar_lea.vmem [#allocation6], %s5629_s13 }
  0x68   : > { %s426_s21 = sshll.u32 %s417_s29, 4  ;;  %s471_s1 = scalar_lea.hbm %s7526_s2, %s5632_s14  ;;  %s427_s21 = int_to_ptr.vmem [resolvable:$true] %s426_s21 }
  0x69   : > { %s7667_s5 = sand.u32 1, %s5434_s19   ;;  %s5311_s16 = scalar_lea.vmem %s427_s21, 4096 }
  0x6a   : > { %s414_s20 = scalar_lea.sflag [#allocation7], %s7667_s5  ;;  %p5312_p6 = scmp.ne.s32.totalorder %s427_s21, %s5311_s16 }
  0x6b   : > { %p7668_p9 = pneg %p5634_p1  ;;  %s5455_s24 = smov [#allocation6]  }
  0x6c   : > { %s5316_s26 = sshll.u32 %s5455_s24, 4  ;;  %s5317_s26 = int_to_ptr.vmem [resolvable:$false] %s5316_s26 }
  0x6d   : > { %p5314_p13 = pnand %p5312_p6, %p7668_p9  ;;  %s5318_s12 = scalar_lea.vmem %s5317_s26, 8192 }
  0x6e   : > { %p5319_p11 = scmp.lt.s32.totalorder %s427_s21, %s5317_s26  ;;  %p5320_p10 = scmp.lt.s32.totalorder %s5318_s12, %s5311_s16 }
  0x6f   : > { %p5315_p0 = pneg %p5314_p13 }
  0x70   : > { %p5321_p12 = por %p5320_p10, %p5319_p11 }
  0x72   : > { %p5322_p5 = pnand %p5321_p12, %p5315_p0 }
  0x74   : > { %5325 = shalt.err (!%p5322_p5)
}
  0x75   : > { %4828 = dma.hbm_to_vmem [thread:$0]  (!%p5634_p1), %s425_s17, 4096, %s427_s21, %s414_s20, %s7663_s7, %s7663_s7, %s7662_s3  }
  0x76   : > { %s463_s5 = scalar_lea.vmem [#allocation11], %s5629_s13  ;;  %p7669_p3 = pmov %p7668_p9 }
  0x77   : > { %s472_s28 = sshll.u32 %s463_s5, 4  ;;  %s5456_s30 = smov [#allocation11]   ;;  %s473_s28 = int_to_ptr.vmem [resolvable:$true] %s472_s28 }
  0x78   : > { %s5339_s29 = scalar_lea.vmem %s473_s28, 4096  ;;  %s5344_s22 = sshll.u32 %s5456_s30, 4  ;;  %s5345_s22 = int_to_ptr.vmem [resolvable:$false] %s5344_s22 }
  0x79   : > { %p5340_p2 = scmp.ne.s32.totalorder %s473_s28, %s5339_s29  ;;  %s5346_s16 = scalar_lea.vmem %s5345_s22, 8192 }
  0x7a   : > { %p5347_p13 = scmp.lt.s32.totalorder %s473_s28, %s5345_s22  ;;  %p5348_p0 = scmp.lt.s32.totalorder %s5346_s16, %s5339_s29 }
  0x7b   : > { %p5342_p6 = pnand %p5340_p2, %p7669_p3 }
  0x7c   : > { %p5349_p11 = por %p5348_p0, %p5347_p13 }
  0x7d   : > { %p5343_p9 = pneg %p5342_p6 }
  0x7f   : > { %p5350_p10 = pnand %p5349_p11, %p5343_p9 }
  0x81   : > { %5353 = shalt.err (!%p5350_p10)
}
  0x82   : > { %4834 = dma.hbm_to_vmem [thread:$0]  (!%p5634_p1), %s471_s1, 4096, %s473_s28, %s5647_s11, %s7663_s7, %s7663_s7, %s7662_s3  }
  0x83   : > { %484 = sbr.rel (%p5573_p8) target bundleno = 1706 (0x6aa), region = 64 }
  0x88   : > { %s5719_s17 = sand.u32 1, %s5430_s18  }
  0x89   : > { %s5722_s15 = sshll.u32 %s5719_s17, 8  ;;  %s487_s21 = scalar_lea.sflag [#allocation7], %s5719_s17 }
  0x8a   : > { %s5726_s24 = scalar_lea.vmem [#allocation6], %s5722_s15 }
  0x8b   : > { %5405 = dma.done.wait (%p5563_p4), %s487_s21, 4096  }
  0x8c   : > { %5407 = vsyncadd (%p5563_p4), %s487_s21, 4294963200  ;;  %s495_s11 = sand.u32 1, %s5554_s23   ;;  %s5734_s14 = scalar_lea.vmem [#allocation9], %s5722_s15 }
  0x8d   : > { %s496_s27 = scalar_lea.sflag [#allocation10], %s495_s11 }
  0x8e   : > { %5409 = dma.done.wait (%p5563_p4), %s496_s27, 8192  }
  0x8f   : > { %5411 = vsyncadd (%p5563_p4), %s496_s27, 4294959104  ;;  %s5741_s3 = scalar_lea.vmem [#allocation11], %s5722_s15  ;;  %p7670_p1 = scmp.eq.s32.totalorder %s5554_s23, 0 }
  0x91   : > { %5413 = dma.done.wait (%p7670_p1), [#allocation13], 4096   ;;  %p7671_p8 = pmov %p7670_p1 }
  0x92   : > { %p7672_p12 = pmov %p7670_p1 }
  0x93   : > { %5415 = vsyncadd (%p7671_p8), [#allocation13], 4294963200 }
  0x94   : > { %5417 = dma.done.wait (%p7672_p12), [#allocation16], 4096   ;;  %p7673_p5 = pmov %p7670_p1 }
  0x95   : > { %v1069_v0 = vld [vmem:[#allocation14 + $0x78] sm:$0xff]  ;;  %v1068_v1 = vld [vmem:[#allocation14 + $0x70] sm:$0xff]  ;;  %v1067_v2 = vld [vmem:[#allocation14 + $0x68] sm:$0xff]  ;;  %vm925_vm0 = vcmask 7168   ;;  %s7375_s29 = scalar_lea.vmem [#allocation18], %s5722_s15  ;;  %s7882_s30 = sld [smem:[#allocation25_spill]] }
  0x96   : > { %5419 = vsyncadd (%p7673_p5), [#allocation16], 4294963200  ;;  %4548 = vmatprep.subr.mxu1 %v1069_v0  ;;  %v1066_v3 = vld [vmem:[#allocation14 + $0x60] sm:$0xff]  ;;  %v1065_v5 = vld [vmem:[#allocation14 + $0x58] sm:$0xff]  ;;  %s3964_s20 = sshll.u32 %s7375_s29, 4  ;;  %s7884_s21 = sld [smem:[#allocation102_spill]]  ;;  %s7474_s20 = int_to_ptr.vmem [resolvable:$true] %s3964_s20 }
  0x97   : > { %4549 = vmatpush3.msra.mxu1 %v1069_v0  ;;  %v5752_v4 = vld [vmem:[%s5741_s3] sm:$0xff]  ;;  %v1064_v6 = vld [vmem:[#allocation14 + $0x50] sm:$0xff]  ;;  %v1063_v7 = vld [vmem:[#allocation14 + $0x48] sm:$0xff]  ;;  %s3949_s27 = scalar_lea.sflag [#allocation8], %s5719_s17 }
  0x98   : > { %4550 = vmatprep.subr.mxu1 %v1068_v1  ;;  %4580 = vmatprep.mubr.f32.mxu1 %v5752_v4  ;;  %v1062_v8 = vld [vmem:[#allocation14 + $0x40] sm:$0xff]  ;;  %v1061_v9 = vld [vmem:[#allocation14 + $0x38] sm:$0xff]  ;;  %v1060_v10 = vld [vmem:[#allocation14 + $0x30] sm:$0xff] }
  0x99   : > { %4551 = vmatpush3.msra.mxu1 %v1068_v1  ;;  %v628_v11 = vld [vmem:[#allocation12 + $0x78] sm:$0xff]  ;;  %v627_v12 = vld [vmem:[#allocation12 + $0x70] sm:$0xff]  ;;  %v1059_v13 = vld [vmem:[#allocation14 + $0x28] sm:$0xff] }
  0x9a   : > { %4552 = vmatprep.subr.mxu1 %v1067_v2  ;;  %4468 = vmatprep.subr.mxu0 %v628_v11  ;;  %v626_v14 = vld [vmem:[#allocation12 + $0x68] sm:$0xff]  ;;  %v1058_v15 = vld [vmem:[#allocation14 + $0x20] sm:$0xff]  ;;  %v1057_v17 = vld [vmem:[#allocation14 + $0x18] sm:$0xff] }
  0x9b   : > { %4553 = vmatpush3.msra.mxu1 %v1067_v2  ;;  %4469 = vmatpush3.msra.mxu0 %v628_v11  ;;  %v625_v16 = vld [vmem:[#allocation12 + $0x60] sm:$0xff]  ;;  %v624_v18 = vld [vmem:[#allocation12 + $0x58] sm:$0xff]  ;;  %v1056_v19 = vld [vmem:[#allocation14 + $0x10] sm:$0xff]  ;;  %s4179_s16 = sshll.u32 %s7882_s30, 12 }
  0x9c   : > { %4554 = vmatprep.subr.mxu1 %v1066_v3  ;;  %4470 = vmatprep.subr.mxu0 %v627_v12  ;;  %v623_v20 = vld [vmem:[#allocation12 + $0x50] sm:$0xff]  ;;  %v1055_v21 = vld [vmem:[#allocation14 + $0x8] sm:$0xff]  ;;  %v1054_v23 = vld [vmem:[#allocation14] sm:$0xff]  ;;  %s7472_s11 = scalar_lea.hbm %s7884_s21, %s4179_s16 }
  0x9d   : > { %4555 = vmatpush3.msra.mxu1 %v1066_v3  ;;  %4471 = vmatpush3.msra.mxu0 %v627_v12  ;;  %v622_v22 = vld [vmem:[#allocation12 + $0x48] sm:$0xff]  ;;  %v621_v24 = vld [vmem:[#allocation12 + $0x40] sm:$0xff]  ;;  %v620_v26 = vld [vmem:[#allocation12 + $0x38] sm:$0xff] }
  0x9e   : > { %4556 = vmatprep.subr.mxu1 %v1065_v5  ;;  %4472 = vmatprep.subr.mxu0 %v626_v14  ;;  %v5756_v25 = vld [vmem:[%s5741_s3 + $0x8] sm:$0xff]  ;;  %v5759_v27 = vld [vmem:[%s5741_s3 + $0x10] sm:$0xff]  ;;  %v581_v29 = vld [vmem:[%s5726_s24] sm:$0xff] }
  0x9f   : > { %4557 = vmatpush3.msra.mxu1 %v1065_v5  ;;  %4473 = vmatpush3.msra.mxu0 %v626_v14  ;;  %v619_v28 = vld [vmem:[#allocation12 + $0x30] sm:$0xff]  ;;  %v5765_v30 = vld [vmem:[%s5741_s3 + $0x18] sm:$0xff]  ;;  %v618_v31 = vld [vmem:[#allocation12 + $0x28] sm:$0xff] }
  0xa0   : > { %4558 = vmatprep.subr.mxu1 %v1064_v6  ;;  %4474 = vmatprep.subr.mxu0 %v625_v16  ;;  %v5768_v32 = vld [vmem:[%s5741_s3 + $0x20] sm:$0xff]  ;;  %v5773_v34 = vld [vmem:[%s5741_s3 + $0x28] sm:$0xff]  ;;  %v616_v35 = vld [vmem:[#allocation12 + $0x18] sm:$0xff] }
  0xa1   : > { %4559 = vmatpush3.msra.mxu1 %v1064_v6  ;;  %4475 = vmatpush3.msra.mxu0 %v625_v16  ;;  %v617_v33 = vld [vmem:[#allocation12 + $0x20] sm:$0xff]  ;;  %v5776_v36 = vld [vmem:[%s5741_s3 + $0x30] sm:$0xff]  ;;  %v5781_v38 = vld [vmem:[%s5741_s3 + $0x38] sm:$0xff] }
  0xa2   : > { %4560 = vmatprep.subr.mxu1 %v1063_v7  ;;  %4476 = vmatprep.subr.mxu0 %v624_v18  ;;  %v615_v37 = vld [vmem:[#allocation12 + $0x10] sm:$0xff]  ;;  %v614_v39 = vld [vmem:[#allocation12 + $0x8] sm:$0xff]  ;;  %v5784_v40 = vld [vmem:[%s5741_s3 + $0x40] sm:$0xff] }
  0xa3   : > { %4561 = vmatpush3.msra.mxu1 %v1063_v7  ;;  %4477 = vmatpush3.msra.mxu0 %v624_v18  ;;  %v613_v41 = vld [vmem:[#allocation12] sm:$0xff]  ;;  %v5789_v42 = vld [vmem:[%s5741_s3 + $0x48] sm:$0xff]  ;;  %v5793_v44 = vld [vmem:[%s5741_s3 + $0x50] sm:$0xff] }
  0xa4   : > { %4562 = vmatprep.subr.mxu1 %v1062_v8  ;;  %4478 = vmatprep.subr.mxu0 %v623_v20  ;;  %v582_v43 = vld [vmem:[%s5726_s24 + $0x8] sm:$0xff]  ;;  %v583_v45 = vld [vmem:[%s5726_s24 + $0x10] sm:$0xff]  ;;  %v5799_v46 = vld [vmem:[%s5741_s3 + $0x58] sm:$0xff] }
  0xa5   : > { %4563 = vmatpush3.msra.mxu1 %v1062_v8  ;;  %4479 = vmatpush3.msra.mxu0 %v623_v20  ;;  %v584_v47 = vld [vmem:[%s5726_s24 + $0x18] sm:$0xff]  ;;  %v5803_v48 = vld [vmem:[%s5741_s3 + $0x60] sm:$0xff]  ;;  %v5809_v50 = vld [vmem:[%s5741_s3 + $0x68] sm:$0xff] }
  0xa6   : > { %4564 = vmatprep.subr.mxu1 %v1061_v9  ;;  %4480 = vmatprep.subr.mxu0 %v622_v22  ;;  %v585_v49 = vld [vmem:[%s5726_s24 + $0x20] sm:$0xff]  ;;  %v586_v51 = vld [vmem:[%s5726_s24 + $0x28] sm:$0xff]  ;;  %v5813_v52 = vld [vmem:[%s5741_s3 + $0x70] sm:$0xff] }
  0xa7   : > { %4565 = vmatpush3.msra.mxu1 %v1061_v9  ;;  %4481 = vmatpush3.msra.mxu0 %v622_v22  ;;  %v587_v53 = vld [vmem:[%s5726_s24 + $0x30] sm:$0xff]  ;;  %v5819_v54 = vld [vmem:[%s5741_s3 + $0x78] sm:$0xff]  ;;  %v5823_v56 = vld [vmem:[%s5741_s3 + $0x80] sm:$0xff] }
  0xa8   : > { %4566 = vmatprep.subr.mxu1 %v1060_v10  ;;  %4482 = vmatprep.subr.mxu0 %v621_v24  ;;  %v588_v55 = vld [vmem:[%s5726_s24 + $0x38] sm:$0xff]  ;;  %v589_v57 = vld [vmem:[%s5726_s24 + $0x40] sm:$0xff]  ;;  %v5829_v58 = vld [vmem:[%s5741_s3 + $0x88] sm:$0xff] }
  0xa9   : > { %4567 = vmatpush3.msra.mxu1 %v1060_v10  ;;  %4483 = vmatpush3.msra.mxu0 %v621_v24  ;;  %v590_v59 = vld [vmem:[%s5726_s24 + $0x48] sm:$0xff]  ;;  %v5833_v60 = vld [vmem:[%s5741_s3 + $0x90] sm:$0xff]  ;;  %v5839_v62 = vld [vmem:[%s5741_s3 + $0x98] sm:$0xff] }
  0xaa   : > { %4568 = vmatprep.subr.mxu1 %v1059_v13  ;;  %4484 = vmatprep.subr.mxu0 %v620_v26  ;;  %7674 = vst [vmem:[#allocation32_spill] sm:$0xff] %v5833_v60  ;;  %v591_v61 = vld [vmem:[%s5726_s24 + $0x50] sm:$0xff]  ;;  %7675 = vst [vmem:[#allocation33_spill] sm:$0xff] %v5839_v62  ;;  %v592_v63 = vld [vmem:[%s5726_s24 + $0x58] sm:$0xff] }
  0xab   : > { %4569 = vmatpush3.msra.mxu1 %v1059_v13  ;;  %4485 = vmatpush3.msra.mxu0 %v620_v26  ;;  %v5843_v0 = vld [vmem:[%s5741_s3 + $0xa0] sm:$0xff]  ;;  %v5849_v2 = vld [vmem:[%s5741_s3 + $0xa8] sm:$0xff]  ;;  %v5853_v5 = vld [vmem:[%s5741_s3 + $0xb0] sm:$0xff] }
  0xac   : > { %4570 = vmatprep.subr.mxu1 %v1058_v15  ;;  %4486 = vmatprep.subr.mxu0 %v619_v28  ;;  %7676 = vst [vmem:[#allocation34_spill] sm:$0xff] %v5843_v0  ;;  %v593_v1 = vld [vmem:[%s5726_s24 + $0x60] sm:$0xff]  ;;  %7677 = vst [vmem:[#allocation35_spill] sm:$0xff] %v5849_v2  ;;  %v594_v3 = vld [vmem:[%s5726_s24 + $0x68] sm:$0xff] }
  0xad   : > { %4571 = vmatpush3.msra.mxu1 %v1058_v15  ;;  %4500 = vmatprep.mubr.f32.mxu0 %v581_v29  ;;  %7678 = vst [vmem:[#allocation36_spill] sm:$0xff] %v5853_v5  ;;  %v595_v6 = vld [vmem:[%s5726_s24 + $0x70] sm:$0xff]  ;;  %v5859_v7 = vld [vmem:[%s5741_s3 + $0xb8] sm:$0xff]  ;;  %v5863_v9 = vld [vmem:[%s5741_s3 + $0xc0] sm:$0xff] }
  0xae   : > { %4572 = vmatprep.subr.mxu1 %v1057_v17  ;;  %4487 = vmatpush3.msra.mxu0 %v619_v28  ;;  %7679 = vst [vmem:[#allocation37_spill] sm:$0xff] %v5859_v7  ;;  %v596_v8 = vld [vmem:[%s5726_s24 + $0x78] sm:$0xff]  ;;  %7680 = vst [vmem:[#allocation38_spill] sm:$0xff] %v5863_v9  ;;  %v597_v10 = vld [vmem:[%s5726_s24 + $0x80] sm:$0xff] }
  0xaf   : > { %4573 = vmatpush3.msra.mxu1 %v1057_v17  ;;  %4488 = vmatprep.subr.mxu0 %v618_v31  ;;  %v5869_v11 = vld [vmem:[%s5741_s3 + $0xc8] sm:$0xff]  ;;  %v5873_v13 = vld [vmem:[%s5741_s3 + $0xd0] sm:$0xff]  ;;  %v5879_v15 = vld [vmem:[%s5741_s3 + $0xd8] sm:$0xff] }
  0xb0   : > { %4574 = vmatprep.subr.mxu1 %v1056_v19  ;;  %4489 = vmatpush3.msra.mxu0 %v618_v31  ;;  %7681 = vst [vmem:[#allocation39_spill] sm:$0xff] %v5869_v11  ;;  %v598_v12 = vld [vmem:[%s5726_s24 + $0x88] sm:$0xff]  ;;  %7682 = vst [vmem:[#allocation40_spill] sm:$0xff] %v5873_v13  ;;  %v599_v14 = vld [vmem:[%s5726_s24 + $0x90] sm:$0xff] }
  0xb1   : > { %4575 = vmatpush3.msra.mxu1 %v1056_v19  ;;  %4490 = vmatprep.subr.mxu0 %v617_v33  ;;  %7683 = vst [vmem:[#allocation41_spill] sm:$0xff] %v5879_v15  ;;  %v5882_v16 = vld [vmem:[%s5741_s3 + $0xe0] sm:$0xff]  ;;  %v5887_v17 = vld [vmem:[%s5741_s3 + $0xe8] sm:$0xff]  ;;  %v5890_v18 = vld [vmem:[%s5741_s3 + $0xf0] sm:$0xff] }
  0xb2   : > { %4576 = vmatprep.subr.mxu1 %v1055_v21  ;;  %4491 = vmatpush3.msra.mxu0 %v617_v33  ;;  %7684 = vst [vmem:[#allocation42_spill] sm:$0xff] %v5882_v16  ;;  %7685 = vst [vmem:[#allocation43_spill] sm:$0xff] %v5887_v17  ;;  %v5895_v19 = vld [vmem:[%s5741_s3 + $0xf8] sm:$0xff]  ;;  %v602_v22 = vld [vmem:[%s5726_s24 + $0xa8] sm:$0xff]  ;;  %s5354_s3 = scalar_lea.vmem %s7474_s20, 4096 }
  0xb3   : > { %4577 = vmatpush3.msra.mxu1 %v1055_v21  ;;  %4492 = vmatprep.subr.mxu0 %v616_v35  ;;  %7686 = vst [vmem:[#allocation44_spill] sm:$0xff] %v5890_v18  ;;  %7687 = vst [vmem:[#allocation45_spill] sm:$0xff] %v5895_v19  ;;  %v600_v20 = vld [vmem:[%s5726_s24 + $0x98] sm:$0xff]  ;;  %v601_v21 = vld [vmem:[%s5726_s24 + $0xa0] sm:$0xff]  ;;  %p5355_p4 = scmp.ne.s32.totalorder %s7474_s20, %s5354_s3 }
  0xb4   : > { %4578 = vmatprep.subr.mxu1 %v1054_v23  ;;  %4493 = vmatpush3.msra.mxu0 %v616_v35  ;;  %v604_v24 = vld [vmem:[%s5726_s24 + $0xb8] sm:$0xff]  ;;  %v605_v26 = vld [vmem:[%s5726_s24 + $0xc0] sm:$0xff]  ;;  %v606_v28 = vld [vmem:[%s5726_s24 + $0xc8] sm:$0xff] }
  0xb5   : > { %4579 = vmatpush3.msra.mxu1 %v1054_v23  ;;  %4494 = vmatprep.subr.mxu0 %v615_v37  ;;  %v603_v23 = vld [vmem:[%s5726_s24 + $0xb0] sm:$0xff]  ;;  %v608_v31 = vld [vmem:[%s5726_s24 + $0xd8] sm:$0xff]  ;;  %v609_v33 = vld [vmem:[%s5726_s24 + $0xe0] sm:$0xff]  ;;  %p5356_p2 = pnand %p5355_p4, %p5620_p7 }
  0xb6   : > { %4581 = vmatmul.mubr.f32.vlgmr.msra.gmra.mxu1 %v5756_v25  ;;  %4495 = vmatpush3.msra.mxu0 %v615_v37  ;;  %v607_v29 = vld [vmem:[%s5726_s24 + $0xd0] sm:$0xff]  ;;  %v610_v35 = vld [vmem:[%s5726_s24 + $0xe8] sm:$0xff] }
  0xb7   : > { %4583 = vmatprep.mubr.f32.mxu1 %v5759_v27  ;;  %4496 = vmatprep.subr.mxu0 %v614_v39  ;;  %v611_v37 = vld [vmem:[%s5726_s24 + $0xf0] sm:$0xff]  ;;  %p5357_p3 = pneg %p5356_p2 }
  0xb8   : > { %4497 = vmatpush3.msra.mxu0 %v614_v39  ;;  %v612_v39 = vld [vmem:[%s5726_s24 + $0xf8] sm:$0xff]  ;;  %s7885_s24 = smov %s7884_s21 }
  0xb9   : > { %4498 = vmatprep.subr.mxu0 %v613_v41 }
  0xba   : > { %4584 = vmatmul.mubr.f32.gmra.mxu1 %v5765_v30  ;;  %4499 = vmatpush3.msra.mxu0 %v613_v41 }
  0xbb   : > { %4586 = vmatprep.mubr.f32.mxu1 %v5768_v32  ;;  %4501 = vmatmul.mubr.f32.vlgmr.msra.gmra.mxu0 %v582_v43 }
  0xbc   : > { %4503 = vmatprep.mubr.f32.mxu0 %v583_v45 }
  0xbe   : > { %4587 = vmatmul.mubr.f32.gmra.mxu1 %v5773_v34 }
  0xbf   : > { %4589 = vmatprep.mubr.f32.mxu1 %v5776_v36  ;;  %4504 = vmatmul.mubr.f32.gmra.mxu0 %v584_v47 }
  0xc0   : > { %4506 = vmatprep.mubr.f32.mxu0 %v585_v49 }
  0xc2   : > { %4590 = vmatmul.mubr.f32.gmra.mxu1 %v5781_v38 }
  0xc3   : > { %4592 = vmatprep.mubr.f32.mxu1 %v5784_v40  ;;  %4507 = vmatmul.mubr.f32.gmra.mxu0 %v586_v51 }
  0xc4   : > { %4509 = vmatprep.mubr.f32.mxu0 %v587_v53 }
  0xc6   : > { %4593 = vmatmul.mubr.f32.gmra.mxu1 %v5789_v42 }
  0xc7   : > { %4595 = vmatprep.mubr.f32.mxu1 %v5793_v44  ;;  %4510 = vmatmul.mubr.f32.gmra.mxu0 %v588_v55 }
  0xc8   : > { %4512 = vmatprep.mubr.f32.mxu0 %v589_v57 }
  0xca   : > { %4596 = vmatmul.mubr.f32.gmra.mxu1 %v5799_v46 }
  0xcb   : > { %4598 = vmatprep.mubr.f32.mxu1 %v5803_v48  ;;  %4513 = vmatmul.mubr.f32.gmra.mxu0 %v590_v59 }
  0xcc   : > { %4515 = vmatprep.mubr.f32.mxu0 %v591_v61 }
  0xce   : > { %4599 = vmatmul.mubr.f32.gmra.mxu1 %v5809_v50 }
  0xcf   : > { %4601 = vmatprep.mubr.f32.mxu1 %v5813_v52  ;;  %4516 = vmatmul.mubr.f32.gmra.mxu0 %v592_v63 }
  0xd0   : > { %4518 = vmatprep.mubr.f32.mxu0 %v593_v1 }
  0xd2   : > { %4602 = vmatmul.mubr.f32.gmra.mxu1 %v5819_v54 }
  0xd3   : > { %4604 = vmatprep.mubr.f32.mxu1 %v5823_v56  ;;  %4519 = vmatmul.mubr.f32.gmra.mxu0 %v594_v3 }
  0xd4   : > { %4521 = vmatprep.mubr.f32.mxu0 %v595_v6 }
  0xd6   : > { %4605 = vmatmul.mubr.f32.gmra.mxu1 %v5829_v58 }
  0xd7   : > { %4607 = vmatprep.mubr.f32.mxu1 %v5833_v60  ;;  %4522 = vmatmul.mubr.f32.gmra.mxu0 %v596_v8 }
  0xd8   : > { %4524 = vmatprep.mubr.f32.mxu0 %v597_v10 }
  0xda   : > { %4608 = vmatmul.mubr.f32.gmra.mxu1 %v5839_v62 }
  0xdb   : > { %4610 = vmatprep.mubr.f32.mxu1 %v5843_v0  ;;  %4525 = vmatmul.mubr.f32.gmra.mxu0 %v598_v12 }
  0xdc   : > { %4527 = vmatprep.mubr.f32.mxu0 %v599_v14 }
  0xde   : > { %4611 = vmatmul.mubr.f32.gmra.mxu1 %v5849_v2 }
  0xdf   : > { %4613 = vmatprep.mubr.f32.mxu1 %v5853_v5  ;;  %4528 = vmatmul.mubr.f32.gmra.mxu0 %v600_v20 }
  0xe0   : > { %4530 = vmatprep.mubr.f32.mxu0 %v601_v21 }
  0xe2   : > { %4614 = vmatmul.mubr.f32.gmra.mxu1 %v5859_v7 }
  0xe3   : > { %4616 = vmatprep.mubr.f32.mxu1 %v5863_v9  ;;  %4531 = vmatmul.mubr.f32.gmra.mxu0 %v602_v22 }
  0xe4   : > { %4533 = vmatprep.mubr.f32.mxu0 %v603_v23 }
  0xe6   : > { %4617 = vmatmul.mubr.f32.gmra.mxu1 %v5869_v11 }
  0xe7   : > { %4619 = vmatprep.mubr.f32.mxu1 %v5873_v13  ;;  %4534 = vmatmul.mubr.f32.gmra.mxu0 %v604_v24 }
  0xe8   : > { %4536 = vmatprep.mubr.f32.mxu0 %v605_v26 }
  0xea   : > { %4620 = vmatmul.mubr.f32.gmra.mxu1 %v5879_v15 }
  0xeb   : > { %4622 = vmatprep.mubr.f32.mxu1 %v5882_v16  ;;  %4537 = vmatmul.mubr.f32.gmra.mxu0 %v606_v28 }
  0xec   : > { %4539 = vmatprep.mubr.f32.mxu0 %v607_v29 }
  0xee   : > { %4623 = vmatmul.mubr.f32.gmra.mxu1 %v5887_v17 }
  0xef   : > { %4625 = vmatprep.mubr.f32.mxu1 %v5890_v18  ;;  %4540 = vmatmul.mubr.f32.gmra.mxu0 %v608_v31 }
  0xf0   : > { %4542 = vmatprep.mubr.f32.mxu0 %v609_v33 }
  0xf2   : > { %4626 = vmatmul.mubr.f32.gmra.mxu1 %v5895_v19  ;;  %v5960_v19 = vld [vmem:[%s7530_s6] ss:$0 sm:$0xff] }
  0xf3   : > { %4543 = vmatmul.mubr.f32.gmra.mxu0 %v610_v35 }
  0xf4   : > { %4545 = vmatprep.mubr.f32.mxu0 %v611_v37 }
  0xf7   : > { %4546 = vmatmul.mubr.f32.gmra.mxu0 %v612_v39 }
  0xf8   : > { %4660 = vmatprep.mubr.f32.mxu0 %v5752_v4  ;;  %v5935_v4 = vld [vmem:[%s7528_s4] ss:$0 sm:$0xff] }
 0x176   : > { %v5912_v41 = vpop.f32.mrf.mxu1 }
 0x178   : > { %v5914_v43 = vpop.f32.mrf.mxu1 }
 0x17a   : > { %v5916_v45 = vpop.f32.mrf.mxu1 }
 0x17b   : > { %v5930_v59 = vpop.f32.mrf.mxu0 }
 0x17c   : > { %v5918_v47 = vpop.f32.mrf.mxu1 }
 0x17d   : > { %v702_v63 = vpop.f32.mrf.mxu0 }
 0x17e   : > { %v5920_v49 = vpop.f32.mrf.mxu1  ;;  %v5940_v1 = vadd.f32 %v5935_v4, %v702_v63 }
 0x180   : > { %v5922_v51 = vpop.f32.mrf.mxu1  ;;  %v7553_v6 = vmax.f32 %v5940_v1, 0.0 }
 0x182   : > { %v5924_v53 = vpop.f32.mrf.mxu1  ;;  %4356 = vmatprep.mubr.f32.mxu1 %v7553_v6 }
 0x184   : > { %v5926_v55 = vpop.f32.mrf.mxu1 }
 0x186   : > { %v5928_v57 = vpop.f32.mrf.mxu1 }
 0x188   : > { %v5937_v61 = vpop.f32.mrf.mxu1 }
 0x18a   : > { %v4597_v3 = vpop.f32.mrf.mxu1 }
 0x18c   : > { %v1193_v8 = vpop.f32.mrf.mxu1 }
 0x18e   : > { %v4600_v10 = vpop.f32.mrf.mxu1 }
 0x18f   : > { %v1209_v0 = vadd.f32 %v4600_v10, %v5960_v19 }
 0x190   : > { %v1203_v12 = vpop.f32.mrf.mxu1 }
 0x192   : > { %v4603_v14 = vpop.f32.mrf.mxu1 }
 0x193   : > { %v1219_v18 = vadd.f32 %v4603_v14, %v5960_v19 }
 0x194   : > { %v1213_v20 = vpop.f32.mrf.mxu1 }
 0x195   : > { %v1317_v9 = vmax.f32 %v1219_v18, 0.0  ;;  %v1214_v7 = vadd.f32 %v5960_v19, %v1213_v20  ;;  %v1184_v20 = vadd.f32 %v5960_v19, %v5937_v61 }
 0x196   : > { %v5945_v21 = vpop.f32.mrf.mxu1 }
 0x197   : > { %v1316_v62 = vmax.f32 %v1214_v7, 0.0 }
 0x198   : > { %v5947_v22 = vpop.f32.mrf.mxu1 }
 0x19a   : > { %v5949_v23 = vpop.f32.mrf.mxu1 }
 0x19c   : > { %v5951_v24 = vpop.f32.mrf.mxu1 }
 0x19e   : > { %v5953_v26 = vpop.f32.mrf.mxu1 }
 0x19f   : > { %v1249_v61 = vadd.f32 %v5953_v26, %v5960_v19  ;;  %v1239_v26 = vadd.f32 %v5949_v23, %v5960_v19  ;;  %v1229_v23 = vadd.f32 %v5945_v21, %v5960_v19 }
 0x1a0   : > { %v5955_v28 = vpop.f32.mrf.mxu1 }
 0x1a2   : > { %v4615_v29 = vpop.f32.mrf.mxu1 }
 0x1a4   : > { %v1253_v31 = vpop.f32.mrf.mxu1 }
 0x1a6   : > { %v4618_v33 = vpop.f32.mrf.mxu1 }
 0x1a8   : > { %v1263_v35 = vpop.f32.mrf.mxu1 }
 0x1aa   : > { %v4621_v37 = vpop.f32.mrf.mxu1 }
 0x1ac   : > { %v1273_v39 = vpop.f32.mrf.mxu1 }
 0x1ae   : > { %v4624_v63 = vpop.f32.mrf.mxu1 }
 0x1af   : > { %v1289_v5 = vadd.f32 %v4624_v63, %v5960_v19  ;;  %v1254_v63 = vadd.f32 %v5960_v19, %v1253_v31  ;;  %v1244_v31 = vadd.f32 %v5960_v19, %v5955_v28  ;;  %v1234_v28 = vadd.f32 %v5960_v19, %v5951_v24 }
 0x1b0   : > { %v1283_v6 = vpop.f32.mrf.mxu1  ;;  %v1224_v24 = vadd.f32 %v5960_v19, %v5947_v22 }
 0x1b1   : > { %v1331_v14 = vmax.f32 %v1289_v5, 0.0  ;;  %v1284_v60 = vadd.f32 %v5960_v19, %v1283_v6 }
 0x1b2   : > { %v4627_v17 = vpop.f32.mrf.mxu1 }
 0x1b3   : > { %v1299_v16 = vadd.f32 %v4627_v17, %v5960_v19  ;;  %v1279_v17 = vadd.f32 %v4621_v37, %v5960_v19  ;;  %v1330_v18 = vmax.f32 %v1284_v60, 0.0  ;;  %v1189_v60 = vadd.f32 %v5928_v57, %v5960_v19 }
 0x1b4   : > { %v1293_v15 = vpop.f32.mrf.mxu1 }
 0x1b5   : > { %v1333_v13 = vmax.f32 %v1299_v16, 0.0  ;;  %v1294_v11 = vadd.f32 %v5960_v19, %v1293_v15  ;;  %v1315_v16 = vmax.f32 %v1209_v0, 0.0  ;;  %v1204_v15 = vadd.f32 %v5960_v19, %v1203_v12 }
 0x1b6   : > { %v1269_v0 = vadd.f32 %v4618_v33, %v5960_v19  ;;  %v1311_v12 = vmax.f32 %v1189_v60, 0.0  ;;  %v1179_v33 = vadd.f32 %v5924_v53, %v5960_v19  ;;  %v1347_v60 = vld [vmem:[#allocation15 + $0x68] sm:$0xff] }
 0x1b7   : > { %v1332_v2 = vmax.f32 %v1294_v11, 0.0  ;;  %4324 = vmatprep.subr.mxu1 %v1333_v13  ;;  %v1199_v11 = vadd.f32 %v4597_v3, %v5960_v19  ;;  %v1274_v13 = vadd.f32 %v5960_v19, %v1273_v39  ;;  %v1264_v3 = vadd.f32 %v5960_v19, %v1263_v35 }
 0x1b8   : > { %4325 = vmatpush3.xpose.msra.mxu1 %v1317_v9  ;;  %v1314_v9 = vmax.f32 %v1204_v15, 0.0  ;;  %v1327_v10 = vmax.f32 %v1269_v0, 0.0  ;;  %v1310_v39 = vmax.f32 %v1184_v20, 0.0  ;;  %v1309_v35 = vmax.f32 %v1179_v33, 0.0  ;;  %v1349_v0 = vld [vmem:[#allocation15 + $0x78] sm:$0xff] }
 0x1b9   : > { %4326 = vmatprep.subr.mxu1 %v1332_v2  ;;  %v1329_v2 = vmax.f32 %v1279_v17, 0.0  ;;  %v1313_v5 = vmax.f32 %v1199_v11, 0.0  ;;  %v1328_v7 = vmax.f32 %v1274_v13, 0.0  ;;  %v1326_v37 = vmax.f32 %v1264_v3, 0.0  ;;  %4628 = vmatprep.subr.mxu0 %v1349_v0  ;;  %v1345_v3 = vld [vmem:[#allocation15 + $0x58] sm:$0xff] }
 0x1ba   : > { %v1323_v15 = vmax.f32 %v1249_v61, 0.0  ;;  %v1320_v13 = vmax.f32 %v1234_v28, 0.0  ;;  %4629 = vmatpush3.msra.mxu0 %v1349_v0  ;;  %v708_v20 = vadd.f32 %v5930_v59, %v5935_v4  ;;  %v1340_v61 = vld [vmem:[#allocation15 + $0x30] sm:$0xff]  ;;  %v1335_v28 = vld [vmem:[#allocation15 + $0x8] sm:$0xff] }
 0x1bc   : > { %4327 = vmatpush3.xpose.msra.mxu1 %v1316_v62  ;;  %v1194_v62 = vadd.f32 %v5960_v19, %v1193_v8  ;;  %v1259_v8 = vadd.f32 %v4615_v29, %v5960_v19  ;;  %v1324_v29 = vmax.f32 %v1254_v63, 0.0  ;;  %v862_v33 = vmax.f32 %v708_v20, 0.0 }
 0x1bd   : > { %4328 = vmatprep.subr.mxu1 %v1331_v14  ;;  %v1174_v14 = vadd.f32 %v5960_v19, %v5926_v55  ;;  %v1164_v55 = vadd.f32 %v5960_v19, %v5922_v51  ;;  %v1154_v51 = vadd.f32 %v5960_v19, %v5918_v47  ;;  %v4505_v47 = vpop.f32.mrf.mxu0 }
 0x1be   : > { %v1312_v6 = vmax.f32 %v1194_v62, 0.0  ;;  %v1325_v57 = vmax.f32 %v1259_v8, 0.0  ;;  %v1319_v62 = vmax.f32 %v1229_v23, 0.0  ;;  %v1344_v8 = vld [vmem:[#allocation15 + $0x50] sm:$0xff]  ;;  %v718_v63 = vadd.f32 %v4505_v47, %v5935_v4 }
 0x1bf   : > { %v1308_v53 = vmax.f32 %v1174_v14, 0.0  ;;  %v1306_v11 = vmax.f32 %v1164_v55, 0.0  ;;  %v712_v22 = vpop.f32.mrf.mxu0  ;;  %v1341_v14 = vld [vmem:[#allocation15 + $0x38] sm:$0xff] }
 0x1c0   : > { %4329 = vmatpush3.xpose.msra.mxu1 %v1315_v16  ;;  %v1169_v16 = vadd.f32 %v5920_v49, %v5960_v19  ;;  %v1159_v49 = vadd.f32 %v5916_v45, %v5960_v19  ;;  %v1149_v45 = vadd.f32 %v5912_v41, %v5960_v19  ;;  %v1346_v41 = vld [vmem:[#allocation15 + $0x60] sm:$0xff] }
 0x1c1   : > { %4330 = vmatprep.subr.mxu1 %v1330_v18  ;;  %v1322_v18 = vmax.f32 %v1244_v31, 0.0 }
 0x1c2   : > { %v1307_v17 = vmax.f32 %v1169_v16, 0.0  ;;  %v1303_v21 = vmax.f32 %v1149_v45, 0.0 }
 0x1c4   : > { %4331 = vmatpush3.xpose.msra.mxu1 %v1314_v9  ;;  %v1321_v9 = vmax.f32 %v1239_v26, 0.0  ;;  %v1337_v26 = vld [vmem:[#allocation15 + $0x18] sm:$0xff] }
 0x1c5   : > { %4332 = vmatprep.subr.mxu1 %v1329_v2  ;;  %v1305_v2 = vmax.f32 %v1159_v49, 0.0 }
 0x1c8   : > { %4333 = vmatpush3.xpose.msra.mxu1 %v1313_v5  ;;  %v1304_v5 = vmax.f32 %v1154_v51, 0.0 }
 0x1c9   : > { %4334 = vmatprep.subr.mxu1 %v1328_v7  ;;  %v1348_v7 = vld [vmem:[#allocation15 + $0x70] sm:$0xff] }
 0x1ca   : > { %4630 = vmatprep.subr.mxu0 %v1348_v7 }
 0x1cb   : > { %4631 = vmatpush3.msra.mxu0 %v1348_v7 }
 0x1cc   : > { %4335 = vmatpush3.xpose.msra.mxu1 %v1312_v6  ;;  %v1144_v6 = vadd.f32 %v5960_v19, %v5914_v43  ;;  %4632 = vmatprep.subr.mxu0 %v1347_v60  ;;  %v713_v19 = vadd.f32 %v5935_v4, %v712_v22  ;;  %v4508_v43 = vpop.f32.mrf.mxu0 }
 0x1cd   : > { %4336 = vmatprep.subr.mxu1 %v1327_v10  ;;  %v1318_v10 = vmax.f32 %v1224_v24, 0.0  ;;  %4633 = vmatpush3.msra.mxu0 %v1347_v60  ;;  %v728_v31 = vadd.f32 %v4508_v43, %v5935_v4 }
 0x1ce   : > { %4634 = vmatprep.subr.mxu0 %v1346_v41  ;;  %v863_v59 = vmax.f32 %v713_v19, 0.0  ;;  %v7691_v19 = vld [vmem:[#allocation34_spill] sm:$0xff] }
 0x1cf   : > { %4635 = vmatpush3.msra.mxu0 %v1346_v41  ;;  %v866_v49 = vmax.f32 %v728_v31, 0.0  ;;  %v7698_v31 = vld [vmem:[#allocation41_spill] sm:$0xff] }
 0x1d0   : > { %4337 = vmatpush3.xpose.msra.mxu1 %v1311_v12  ;;  %v1302_v12 = vmax.f32 %v1144_v6, 0.0  ;;  %4636 = vmatprep.subr.mxu0 %v1345_v3 }
 0x1d1   : > { %4338 = vmatprep.subr.mxu1 %v1326_v37  ;;  %4637 = vmatpush3.msra.mxu0 %v1345_v3  ;;  %v1343_v37 = vld [vmem:[#allocation15 + $0x48] sm:$0xff] }
 0x1d2   : > { %4638 = vmatprep.subr.mxu0 %v1344_v8 }
 0x1d3   : > { %4639 = vmatpush3.msra.mxu0 %v1344_v8  ;;  %v7690_v8 = vld [vmem:[#allocation33_spill] sm:$0xff] }
 0x1d4   : > { %4339 = vmatpush3.xpose.msra.mxu1 %v1310_v39  ;;  %v7688_v39 = vmax.f32 %v5940_v1, 0.0  ;;  %4640 = vmatprep.subr.mxu0 %v1343_v37 }
 0x1d5   : > { %4340 = vmatprep.subr.mxu1 %v1325_v57  ;;  %v1342_v57 = vld [vmem:[#allocation15 + $0x40] sm:$0xff]  ;;  %4641 = vmatpush3.msra.mxu0 %v1343_v37  ;;  %v7692_v37 = vld [vmem:[#allocation35_spill] sm:$0xff] }
 0x1d6   : > { %4642 = vmatprep.subr.mxu0 %v1342_v57 }
 0x1d7   : > { %4643 = vmatpush3.msra.mxu0 %v1342_v57 }
 0x1d8   : > { %4341 = vmatpush3.xpose.msra.mxu1 %v1309_v35  ;;  %v722_v35 = vpop.f32.mrf.mxu0  ;;  %4644 = vmatprep.subr.mxu0 %v1341_v14 }
 0x1d9   : > { %4342 = vmatprep.subr.mxu1 %v1324_v29  ;;  %v864_v29 = vmax.f32 %v718_v63, 0.0  ;;  %v723_v16 = vadd.f32 %v5935_v4, %v722_v35  ;;  %4645 = vmatpush3.msra.mxu0 %v1341_v14  ;;  %v7694_v63 = vld [vmem:[#allocation37_spill] sm:$0xff]  ;;  %v7695_v35 = vld [vmem:[#allocation38_spill] sm:$0xff] }
 0x1da   : > { %v4511_v1 = vpop.f32.mrf.mxu0  ;;  %4646 = vmatprep.subr.mxu0 %v1340_v61 }
 0x1db   : > { %4647 = vmatpush3.msra.mxu0 %v1340_v61  ;;  %v738_v51 = vadd.f32 %v4511_v1, %v5935_v4  ;;  %v7697_v1 = vld [vmem:[#allocation40_spill] sm:$0xff] }
 0x1dc   : > { %4343 = vmatpush3.xpose.msra.mxu1 %v1308_v53  ;;  %v1339_v53 = vld [vmem:[#allocation15 + $0x28] sm:$0xff]  ;;  %v732_v55 = vpop.f32.mrf.mxu0 }
 0x1dd   : > { %4344 = vmatprep.subr.mxu1 %v1323_v15  ;;  %v1338_v15 = vld [vmem:[#allocation15 + $0x20] sm:$0xff]  ;;  %4648 = vmatprep.subr.mxu0 %v1339_v53  ;;  %v868_v45 = vmax.f32 %v738_v51, 0.0  ;;  %v7702_v51 = vld [vmem:[#allocation45_spill] sm:$0xff] }
 0x1de   : > { %4649 = vmatpush3.msra.mxu0 %v1339_v53 }
 0x1df   : > { %4650 = vmatprep.subr.mxu0 %v1338_v15 }
 0x1e0   : > { %4345 = vmatpush3.xpose.msra.mxu1 %v1307_v17  ;;  %v865_v17 = vmax.f32 %v723_v16, 0.0  ;;  %4651 = vmatpush3.msra.mxu0 %v1338_v15 }
 0x1e1   : > { %4346 = vmatprep.subr.mxu1 %v1322_v18  ;;  %v1336_v18 = vld [vmem:[#allocation15 + $0x10] sm:$0xff]  ;;  %4652 = vmatprep.subr.mxu0 %v1337_v26 }
 0x1e2   : > { %4653 = vmatpush3.msra.mxu0 %v1337_v26 }
 0x1e3   : > { %4654 = vmatprep.subr.mxu0 %v1336_v18 }
 0x1e4   : > { %4347 = vmatpush3.xpose.msra.mxu1 %v1306_v11  ;;  %v733_v11 = vadd.f32 %v5935_v4, %v732_v55  ;;  %4655 = vmatpush3.msra.mxu0 %v1336_v18  ;;  %v7699_v55 = vld [vmem:[#allocation42_spill] sm:$0xff] }
 0x1e5   : > { %4348 = vmatprep.subr.mxu1 %v1321_v9  ;;  %v4514_v9 = vpop.f32.mrf.mxu0  ;;  %4656 = vmatprep.subr.mxu0 %v1335_v28 }
 0x1e6   : > { %v867_v23 = vmax.f32 %v733_v11, 0.0  ;;  %4657 = vmatpush3.msra.mxu0 %v1335_v28  ;;  %v748_v24 = vadd.f32 %v4514_v9, %v5935_v4  ;;  %v7701_v9 = vld [vmem:[#allocation44_spill] sm:$0xff] }
 0x1e8   : > { %4349 = vmatpush3.xpose.msra.mxu1 %v1305_v2  ;;  %v1334_v2 = vld [vmem:[#allocation15] sm:$0xff]  ;;  %v870_v47 = vmax.f32 %v748_v24, 0.0 }
 0x1e9   : > { %4350 = vmatprep.subr.mxu1 %v1320_v13  ;;  %v742_v13 = vpop.f32.mrf.mxu0  ;;  %4658 = vmatprep.subr.mxu0 %v1334_v2 }
 0x1ea   : > { %4659 = vmatpush3.msra.mxu0 %v1334_v2 }
 0x1eb   : > { %4661 = vmatmul.mubr.f32.vlgmr.msra.gmra.mxu0 %v5756_v25 }
 0x1ec   : > { %4351 = vmatpush3.xpose.msra.mxu1 %v1304_v5  ;;  %v743_v5 = vadd.f32 %v5935_v4, %v742_v13  ;;  %4663 = vmatprep.mubr.f32.mxu0 %v5759_v27 }
 0x1ed   : > { %4352 = vmatprep.subr.mxu1 %v1319_v62  ;;  %v4517_v62 = vpop.f32.mrf.mxu0 }
 0x1ee   : > { %v869_v0 = vmax.f32 %v743_v5, 0.0  ;;  %v758_v27 = vadd.f32 %v4517_v62, %v5935_v4 }
 0x1ef   : > { %4664 = vmatmul.mubr.f32.gmra.mxu0 %v5765_v30  ;;  %v752_v7 = vpop.f32.mrf.mxu0 }
 0x1f0   : > { %4353 = vmatpush3.xpose.msra.mxu1 %v1303_v21  ;;  %4666 = vmatprep.mubr.f32.mxu0 %v5768_v32  ;;  %v753_v60 = vadd.f32 %v5935_v4, %v752_v7  ;;  %v872_v32 = vmax.f32 %v758_v27, 0.0 }
 0x1f1   : > { %4354 = vmatprep.subr.mxu1 %v1318_v10  ;;  %v4520_v25 = vpop.f32.mrf.mxu0 }
 0x1f2   : > { %v871_v21 = vmax.f32 %v753_v60, 0.0 }
 0x1f3   : > { %4667 = vmatmul.mubr.f32.gmra.mxu0 %v5773_v34  ;;  %v762_v30 = vpop.f32.mrf.mxu0 }
 0x1f4   : > { %4355 = vmatpush3.xpose.msra.mxu1 %v1302_v12  ;;  %4669 = vmatprep.mubr.f32.mxu0 %v5776_v36  ;;  %v763_v6 = vadd.f32 %v5935_v4, %v762_v30  ;;  %v768_v36 = vadd.f32 %v4520_v25, %v5935_v4  ;;  %v7689_v12 = vld [vmem:[#allocation32_spill] sm:$0xff] }
 0x1f5   : > { %v4523_v34 = vpop.f32.mrf.mxu0 }
 0x1f6   : > { %v873_v10 = vmax.f32 %v763_v6, 0.0 }
 0x1f7   : > { %4357 = vmatmul.mubr.f32.vlgmr.msra.gmra.mxu1 %v7688_v39  ;;  %4670 = vmatmul.mubr.f32.gmra.mxu0 %v5781_v38  ;;  %v772_v38 = vpop.f32.mrf.mxu0 }
 0x1f8   : > { %4358 = vmatprep.mubr.f32.mxu1 %v862_v33  ;;  %4672 = vmatprep.mubr.f32.mxu0 %v5784_v40  ;;  %v874_v40 = vmax.f32 %v768_v36, 0.0  ;;  %v773_v41 = vadd.f32 %v5935_v4, %v772_v38 }
 0x1fa   : > { %v875_v22 = vmax.f32 %v773_v41, 0.0 }
 0x1fb   : > { %4359 = vmatmul.mubr.f32.gmra.mxu1 %v862_v33  ;;  %4673 = vmatmul.mubr.f32.gmra.mxu0 %v5789_v42  ;;  %v4526_v42 = vpop.f32.mrf.mxu0  ;;  %v7693_v33 = vld [vmem:[#allocation36_spill] sm:$0xff] }
 0x1fc   : > { %4360 = vmatprep.mubr.f32.mxu1 %v863_v59  ;;  %4675 = vmatprep.mubr.f32.mxu0 %v5793_v44  ;;  %v778_v44 = vadd.f32 %v4523_v34, %v5935_v4 }
 0x1ff   : > { %4361 = vmatmul.mubr.f32.gmra.mxu1 %v863_v59  ;;  %4676 = vmatmul.mubr.f32.gmra.mxu0 %v5799_v46  ;;  %v782_v46 = vpop.f32.mrf.mxu0 }
 0x200   : > { %4362 = vmatprep.mubr.f32.mxu1 %v864_v29  ;;  %4678 = vmatprep.mubr.f32.mxu0 %v5803_v48  ;;  %v876_v48 = vmax.f32 %v778_v44, 0.0  ;;  %v783_v3 = vadd.f32 %v5935_v4, %v782_v46 }
 0x202   : > { %v877_v20 = vmax.f32 %v783_v3, 0.0 }
 0x203   : > { %4363 = vmatmul.mubr.f32.gmra.mxu1 %v864_v29  ;;  %4679 = vmatmul.mubr.f32.gmra.mxu0 %v5809_v50  ;;  %v4529_v50 = vpop.f32.mrf.mxu0  ;;  %v7696_v29 = vld [vmem:[#allocation39_spill] sm:$0xff] }
 0x204   : > { %4364 = vmatprep.mubr.f32.mxu1 %v865_v17  ;;  %4681 = vmatprep.mubr.f32.mxu0 %v5813_v52  ;;  %v788_v52 = vadd.f32 %v4526_v42, %v5935_v4  ;;  %v798_v39 = vadd.f32 %v4529_v50, %v5935_v4 }
 0x206   : > { %v880_v14 = vmax.f32 %v798_v39, 0.0 }
 0x207   : > { %4365 = vmatmul.mubr.f32.gmra.mxu1 %v865_v17  ;;  %4682 = vmatmul.mubr.f32.gmra.mxu0 %v5819_v54  ;;  %v792_v54 = vpop.f32.mrf.mxu0 }
 0x208   : > { %4366 = vmatprep.mubr.f32.mxu1 %v866_v49  ;;  %4684 = vmatprep.mubr.f32.mxu0 %v5823_v56  ;;  %v878_v56 = vmax.f32 %v788_v52, 0.0  ;;  %v793_v43 = vadd.f32 %v5935_v4, %v792_v54 }
 0x20a   : > { %v879_v57 = vmax.f32 %v793_v43, 0.0 }
 0x20b   : > { %4367 = vmatmul.mubr.f32.gmra.mxu1 %v866_v49  ;;  %4685 = vmatmul.mubr.f32.gmra.mxu0 %v5829_v58  ;;  %v4532_v58 = vpop.f32.mrf.mxu0  ;;  %v7700_v49 = vld [vmem:[#allocation43_spill] sm:$0xff] }
 0x20c   : > { %4368 = vmatprep.mubr.f32.mxu1 %v867_v23  ;;  %4687 = vmatprep.mubr.f32.mxu0 %v7689_v12  ;;  %v808_v53 = vadd.f32 %v4532_v58, %v5935_v4 }
 0x20d   : > { %v802_v59 = vpop.f32.mrf.mxu0 }
 0x20e   : > { %v803_v61 = vadd.f32 %v5935_v4, %v802_v59  ;;  %v882_v26 = vmax.f32 %v808_v53, 0.0 }
 0x20f   : > { %4369 = vmatmul.mubr.f32.gmra.mxu1 %v867_v23  ;;  %4688 = vmatmul.mubr.f32.gmra.mxu0 %v7690_v8  ;;  %v4535_v16 = vpop.f32.mrf.mxu0 }
 0x210   : > { %4370 = vmatprep.mubr.f32.mxu1 %v868_v45  ;;  %4690 = vmatprep.mubr.f32.mxu0 %v7691_v19  ;;  %v881_v15 = vmax.f32 %v803_v61, 0.0  ;;  %v818_v28 = vadd.f32 %v4535_v16, %v5935_v4  ;;  %v7568_v61 = vmov 0.0  }
 0x211   : > { %v812_v17 = vpop.f32.mrf.mxu0  ;;  %2960 = vmatprep.subr.mxu0 %v7568_v61  ;;  %958 = vst.msk [vmem:[#allocation4] sm:$0xff] %vm925_vm0, %v7568_v61  ;;  %959 = vst.msk [vmem:[#allocation4 + $0x8] sm:$0xff] %vm925_vm0, %v7568_v61 }
 0x212   : > { %v813_v18 = vadd.f32 %v5935_v4, %v812_v17  ;;  %v884_v13 = vmax.f32 %v818_v28, 0.0  ;;  %960 = vst.msk [vmem:[#allocation4 + $0x10] sm:$0xff] %vm925_vm0, %v7568_v61  ;;  %961 = vst.msk [vmem:[#allocation4 + $0x18] sm:$0xff] %vm925_vm0, %v7568_v61 }
 0x213   : > { %4371 = vmatmul.mubr.f32.gmra.mxu1 %v868_v45  ;;  %4691 = vmatmul.mubr.f32.gmra.mxu0 %v7692_v37  ;;  %v4538_v11 = vpop.f32.mrf.mxu0  ;;  %v5458_v37 = vmov 0   ;;  %962 = vst.msk [vmem:[#allocation4 + $0x20] sm:$0xff] %vm925_vm0, %v7568_v61  ;;  %963 = vst.msk [vmem:[#allocation4 + $0x28] sm:$0xff] %vm925_vm0, %v7568_v61 }
 0x214   : > { %4372 = vmatprep.mubr.f32.mxu1 %v869_v0  ;;  %4693 = vmatprep.mubr.f32.mxu0 %v7693_v33  ;;  %v883_v2 = vmax.f32 %v813_v18, 0.0  ;;  %v828_v62 = vadd.f32 %v4538_v11, %v5935_v4  ;;  %964 = vst.msk [vmem:[#allocation4 + $0x30] sm:$0xff] %vm925_vm0, %v7568_v61  ;;  %965 = vst.msk [vmem:[#allocation4 + $0x38] sm:$0xff] %vm925_vm0, %v7568_v61 }
 0x215   : > { %v822_v23 = vpop.f32.mrf.mxu0  ;;  %4908 = vset.pattern.permute.xlu1 %v5458_v37  ;;  %4909 = vset.pattern.permute.xlu0 %v5458_v37  ;;  %966 = vst.msk [vmem:[#allocation4 + $0x40] sm:$0xff] %vm925_vm0, %v7568_v61  ;;  %967 = vst.msk [vmem:[#allocation4 + $0x48] sm:$0xff] %vm925_vm0, %v7568_v61 }
 0x216   : > { %v823_v45 = vadd.f32 %v5935_v4, %v822_v23  ;;  %v886_v7 = vmax.f32 %v828_v62, 0.0  ;;  %968 = vst.msk [vmem:[#allocation4 + $0x50] sm:$0xff] %vm925_vm0, %v7568_v61  ;;  %969 = vst.msk [vmem:[#allocation4 + $0x58] sm:$0xff] %vm925_vm0, %v7568_v61 }
 0x217   : > { %4373 = vmatmul.mubr.f32.gmra.mxu1 %v869_v0  ;;  %4694 = vmatmul.mubr.f32.gmra.mxu0 %v7694_v63  ;;  %v4541_v5 = vpop.f32.mrf.mxu0  ;;  %970 = vst.msk [vmem:[#allocation4 + $0x60] sm:$0xff] %vm925_vm0, %v7568_v61  ;;  %971 = vst.msk [vmem:[#allocation4 + $0x68] sm:$0xff] %vm925_vm0, %v7568_v61 }
 0x218   : > { %4374 = vmatprep.mubr.f32.mxu1 %v870_v47  ;;  %4696 = vmatprep.mubr.f32.mxu0 %v7695_v35  ;;  %v885_v24 = vmax.f32 %v823_v45, 0.0  ;;  %v838_v25 = vadd.f32 %v4541_v5, %v5935_v4  ;;  %972 = vst.msk [vmem:[#allocation4 + $0x70] sm:$0xff] %vm925_vm0, %v7568_v61  ;;  %973 = vst.msk [vmem:[#allocation4 + $0x78] sm:$0xff] %vm925_vm0, %v7568_v61 }
 0x219   : > { %v832_v0 = vpop.f32.mrf.mxu0  ;;  %974 = vst.msk [vmem:[#allocation4 + $0x80] sm:$0xff] %vm925_vm0, %v7568_v61  ;;  %975 = vst.msk [vmem:[#allocation4 + $0x88] sm:$0xff] %vm925_vm0, %v7568_v61 }
 0x21a   : > { %v888_v30 = vmax.f32 %v838_v25, 0.0  ;;  %976 = vst.msk [vmem:[#allocation4 + $0x90] sm:$0xff] %vm925_vm0, %v7568_v61  ;;  %977 = vst.msk [vmem:[#allocation4 + $0x98] sm:$0xff] %vm925_vm0, %v7568_v61 }
 0x21b   : > { %4375 = vmatmul.mubr.f32.gmra.mxu1 %v870_v47  ;;  %4697 = vmatmul.mubr.f32.gmra.mxu0 %v7696_v29  ;;  %v833_v47 = vadd.f32 %v5935_v4, %v832_v0  ;;  %v4544_v60 = vpop.f32.mrf.mxu0  ;;  %978 = vst.msk [vmem:[#allocation4 + $0xa0] sm:$0xff] %vm925_vm0, %v7568_v61  ;;  %979 = vst.msk [vmem:[#allocation4 + $0xa8] sm:$0xff] %vm925_vm0, %v7568_v61 }
 0x21c   : > { %4376 = vmatprep.mubr.f32.mxu1 %v871_v21  ;;  %4699 = vmatprep.mubr.f32.mxu0 %v7697_v1  ;;  %v848_v34 = vadd.f32 %v4544_v60, %v5935_v4  ;;  %980 = vst.msk [vmem:[#allocation4 + $0xb0] sm:$0xff] %vm925_vm0, %v7568_v61  ;;  %981 = vst.msk [vmem:[#allocation4 + $0xb8] sm:$0xff] %vm925_vm0, %v7568_v61 }
 0x21d   : > { %v887_v27 = vmax.f32 %v833_v47, 0.0  ;;  %982 = vst.msk [vmem:[#allocation4 + $0xc0] sm:$0xff] %vm925_vm0, %v7568_v61  ;;  %983 = vst.msk [vmem:[#allocation4 + $0xc8] sm:$0xff] %vm925_vm0, %v7568_v61 }
 0x21e   : > { %v890_v38 = vmax.f32 %v848_v34, 0.0  ;;  %984 = vst.msk [vmem:[#allocation4 + $0xd0] sm:$0xff] %vm925_vm0, %v7568_v61  ;;  %985 = vst.msk [vmem:[#allocation4 + $0xd8] sm:$0xff] %vm925_vm0, %v7568_v61 }
 0x21f   : > { %4377 = vmatmul.mubr.f32.gmra.mxu1 %v871_v21  ;;  %4700 = vmatmul.mubr.f32.gmra.mxu0 %v7698_v31  ;;  %v842_v21 = vpop.f32.mrf.mxu0  ;;  %986 = vst.msk [vmem:[#allocation4 + $0xe0] sm:$0xff] %vm925_vm0, %v7568_v61  ;;  %987 = vst.msk [vmem:[#allocation4 + $0xe8] sm:$0xff] %vm925_vm0, %v7568_v61 }
 0x220   : > { %4378 = vmatprep.mubr.f32.mxu1 %v872_v32  ;;  %4702 = vmatprep.mubr.f32.mxu0 %v7699_v55  ;;  %988 = vst.msk [vmem:[#allocation4 + $0xf0] sm:$0xff] %vm925_vm0, %v7568_v61  ;;  %989 = vst.msk [vmem:[#allocation4 + $0xf8] sm:$0xff] %vm925_vm0, %v7568_v61 }
 0x221   : > { %v4547_v6 = vpop.f32.mrf.mxu0 }
 0x222   : > { %v858_v41 = vadd.f32 %v4547_v6, %v5935_v4 }
 0x223   : > { %4379 = vmatmul.mubr.f32.gmra.mxu1 %v872_v32  ;;  %4703 = vmatmul.mubr.f32.gmra.mxu0 %v7700_v49  ;;  %v843_v32 = vadd.f32 %v5935_v4, %v842_v21 }
 0x224   : > { %4380 = vmatprep.mubr.f32.mxu1 %v873_v10  ;;  %4705 = vmatprep.mubr.f32.mxu0 %v7701_v9  ;;  %v892_v44 = vmax.f32 %v858_v41, 0.0 }
 0x225   : > { %v889_v36 = vmax.f32 %v843_v32, 0.0 }
 0x227   : > { %4381 = vmatmul.mubr.f32.gmra.mxu1 %v873_v10  ;;  %4706 = vmatmul.mubr.f32.gmra.mxu0 %v7702_v51  ;;  %v852_v10 = vpop.f32.mrf.mxu0 }
 0x228   : > { %4382 = vmatprep.mubr.f32.mxu1 %v874_v40 }
 0x22b   : > { %4383 = vmatmul.mubr.f32.gmra.mxu1 %v874_v40  ;;  %v853_v40 = vadd.f32 %v5935_v4, %v852_v10 }
 0x22c   : > { %4384 = vmatprep.mubr.f32.mxu1 %v875_v22 }
 0x22d   : > { %v891_v42 = vmax.f32 %v853_v40, 0.0 }
 0x22f   : > { %4385 = vmatmul.mubr.f32.gmra.mxu1 %v875_v22  ;;  %v5457_v22 = vmov -inf  }
 0x230   : > { %4386 = vmatprep.mubr.f32.mxu1 %v876_v48  ;;  %926 = vst.msk [vmem:[#allocation3] sm:$0xff] %vm925_vm0, %v5457_v22  ;;  %927 = vst.msk [vmem:[#allocation3 + $0x8] sm:$0xff] %vm925_vm0, %v5457_v22 }
 0x231   : > { %928 = vst.msk [vmem:[#allocation3 + $0x10] sm:$0xff] %vm925_vm0, %v5457_v22  ;;  %929 = vst.msk [vmem:[#allocation3 + $0x18] sm:$0xff] %vm925_vm0, %v5457_v22 }
 0x232   : > { %930 = vst.msk [vmem:[#allocation3 + $0x20] sm:$0xff] %vm925_vm0, %v5457_v22  ;;  %931 = vst.msk [vmem:[#allocation3 + $0x28] sm:$0xff] %vm925_vm0, %v5457_v22 }
 0x233   : > { %4387 = vmatmul.mubr.f32.gmra.mxu1 %v876_v48  ;;  %932 = vst.msk [vmem:[#allocation3 + $0x30] sm:$0xff] %vm925_vm0, %v5457_v22  ;;  %933 = vst.msk [vmem:[#allocation3 + $0x38] sm:$0xff] %vm925_vm0, %v5457_v22 }
 0x234   : > { %4388 = vmatprep.mubr.f32.mxu1 %v877_v20  ;;  %934 = vst.msk [vmem:[#allocation3 + $0x40] sm:$0xff] %vm925_vm0, %v5457_v22  ;;  %935 = vst.msk [vmem:[#allocation3 + $0x48] sm:$0xff] %vm925_vm0, %v5457_v22 }
 0x235   : > { %936 = vst.msk [vmem:[#allocation3 + $0x50] sm:$0xff] %vm925_vm0, %v5457_v22  ;;  %937 = vst.msk [vmem:[#allocation3 + $0x58] sm:$0xff] %vm925_vm0, %v5457_v22 }
 0x236   : > { %938 = vst.msk [vmem:[#allocation3 + $0x60] sm:$0xff] %vm925_vm0, %v5457_v22  ;;  %939 = vst.msk [vmem:[#allocation3 + $0x68] sm:$0xff] %vm925_vm0, %v5457_v22 }
 0x237   : > { %4389 = vmatmul.mubr.f32.gmra.mxu1 %v877_v20  ;;  %940 = vst.msk [vmem:[#allocation3 + $0x70] sm:$0xff] %vm925_vm0, %v5457_v22  ;;  %941 = vst.msk [vmem:[#allocation3 + $0x78] sm:$0xff] %vm925_vm0, %v5457_v22 }
 0x238   : > { %4390 = vmatprep.mubr.f32.mxu1 %v878_v56  ;;  %942 = vst.msk [vmem:[#allocation3 + $0x80] sm:$0xff] %vm925_vm0, %v5457_v22  ;;  %943 = vst.msk [vmem:[#allocation3 + $0x88] sm:$0xff] %vm925_vm0, %v5457_v22 }
 0x239   : > { %944 = vst.msk [vmem:[#allocation3 + $0x90] sm:$0xff] %vm925_vm0, %v5457_v22  ;;  %945 = vst.msk [vmem:[#allocation3 + $0x98] sm:$0xff] %vm925_vm0, %v5457_v22 }
 0x23a   : > { %946 = vst.msk [vmem:[#allocation3 + $0xa0] sm:$0xff] %vm925_vm0, %v5457_v22  ;;  %947 = vst.msk [vmem:[#allocation3 + $0xa8] sm:$0xff] %vm925_vm0, %v5457_v22 }
 0x23b   : > { %4391 = vmatmul.mubr.f32.gmra.mxu1 %v878_v56  ;;  %948 = vst.msk [vmem:[#allocation3 + $0xb0] sm:$0xff] %vm925_vm0, %v5457_v22  ;;  %949 = vst.msk [vmem:[#allocation3 + $0xb8] sm:$0xff] %vm925_vm0, %v5457_v22 }
 0x23c   : > { %4392 = vmatprep.mubr.f32.mxu1 %v879_v57  ;;  %950 = vst.msk [vmem:[#allocation3 + $0xc0] sm:$0xff] %vm925_vm0, %v5457_v22  ;;  %951 = vst.msk [vmem:[#allocation3 + $0xc8] sm:$0xff] %vm925_vm0, %v5457_v22 }
 0x23d   : > { %952 = vst.msk [vmem:[#allocation3 + $0xd0] sm:$0xff] %vm925_vm0, %v5457_v22  ;;  %953 = vst.msk [vmem:[#allocation3 + $0xd8] sm:$0xff] %vm925_vm0, %v5457_v22 }
 0x23e   : > { %954 = vst.msk [vmem:[#allocation3 + $0xe0] sm:$0xff] %vm925_vm0, %v5457_v22  ;;  %955 = vst.msk [vmem:[#allocation3 + $0xe8] sm:$0xff] %vm925_vm0, %v5457_v22 }
 0x23f   : > { %4393 = vmatmul.mubr.f32.gmra.mxu1 %v879_v57  ;;  %956 = vst.msk [vmem:[#allocation3 + $0xf0] sm:$0xff] %vm925_vm0, %v5457_v22  ;;  %957 = vst.msk [vmem:[#allocation3 + $0xf8] sm:$0xff] %vm925_vm0, %v5457_v22 }
 0x240   : > { %4394 = vmatprep.mubr.f32.mxu1 %v880_v14 }
 0x243   : > { %4395 = vmatmul.mubr.f32.gmra.mxu1 %v880_v14 }
 0x244   : > { %4396 = vmatprep.mubr.f32.mxu1 %v881_v15 }
 0x247   : > { %4397 = vmatmul.mubr.f32.gmra.mxu1 %v881_v15 }
 0x248   : > { %4398 = vmatprep.mubr.f32.mxu1 %v882_v26 }
 0x24b   : > { %4399 = vmatmul.mubr.f32.gmra.mxu1 %v882_v26 }
 0x24c   : > { %4400 = vmatprep.mubr.f32.mxu1 %v883_v2 }
 0x24f   : > { %4401 = vmatmul.mubr.f32.gmra.mxu1 %v883_v2 }
 0x250   : > { %4402 = vmatprep.mubr.f32.mxu1 %v884_v13 }
 0x253   : > { %4403 = vmatmul.mubr.f32.gmra.mxu1 %v884_v13 }
 0x254   : > { %4404 = vmatprep.mubr.f32.mxu1 %v885_v24 }
 0x257   : > { %4405 = vmatmul.mubr.f32.gmra.mxu1 %v885_v24 }
 0x258   : > { %4406 = vmatprep.mubr.f32.mxu1 %v886_v7 }
 0x25b   : > { %4407 = vmatmul.mubr.f32.gmra.mxu1 %v886_v7 }
 0x25c   : > { %4408 = vmatprep.mubr.f32.mxu1 %v887_v27 }
 0x25f   : > { %4409 = vmatmul.mubr.f32.gmra.mxu1 %v887_v27 }
 0x260   : > { %4410 = vmatprep.mubr.f32.mxu1 %v888_v30 }
 0x263   : > { %4411 = vmatmul.mubr.f32.gmra.mxu1 %v888_v30 }
 0x264   : > { %4412 = vmatprep.mubr.f32.mxu1 %v889_v36 }
 0x267   : > { %4413 = vmatmul.mubr.f32.gmra.mxu1 %v889_v36 }
 0x268   : > { %4414 = vmatprep.mubr.f32.mxu1 %v890_v38 }
 0x26b   : > { %4415 = vmatmul.mubr.f32.gmra.mxu1 %v890_v38 }
 0x26c   : > { %4416 = vmatprep.mubr.f32.mxu1 %v891_v42 }
 0x26f   : > { %4417 = vmatmul.mubr.f32.gmra.mxu1 %v891_v42 }
 0x270   : > { %4418 = vmatprep.mubr.f32.mxu1 %v892_v44 }
 0x273   : > { %4419 = vmatmul.mubr.f32.gmra.mxu1 %v892_v44 }
 0x2ab   : > { %v6270_v21 = vpop.f32.mrf.mxu0 }
 0x2ad   : > { %v6274_v32 = vpop.f32.mrf.mxu0 }
 0x2af   : > { %v6280_v36 = vpop.f32.mrf.mxu0 }
 0x2b1   : > { %v6284_v38 = vpop.f32.mrf.mxu0 }
 0x2b3   : > { %v6290_v42 = vpop.f32.mrf.mxu0 }
 0x2b5   : > { %v6294_v22 = vpop.f32.mrf.mxu0 }
 0x2b7   : > { %v6107_v4 = vpop.f32.mrf.mxu1 }
 0x2b9   : > { %v6109_v46 = vpop.f32.mrf.mxu1 }
 0x2ba   : > { %v1935_v48 = vmax.f32 %v6107_v4, %v6109_v46 }
 0x2bb   : > { %v6113_v3 = vpop.f32.mrf.mxu1 }
 0x2bc   : > { %1936 = vmax.xlane.f32.xlu0 %v1935_v48 }
 0x2bd   : > { %v6115_v50 = vpop.f32.mrf.mxu1 }
 0x2be   : > { %v1938_v12 = vmax.f32 %v6113_v3, %v6115_v50 }
 0x2bf   : > { %v6119_v52 = vpop.f32.mrf.mxu1 }
 0x2c0   : > { %1939 = vmax.xlane.f32.xlu0 %v1938_v12 }
 0x2c1   : > { %v6121_v20 = vpop.f32.mrf.mxu1 }
 0x2c2   : > { %v1941_v8 = vmax.f32 %v6119_v52, %v6121_v20 }
 0x2c3   : > { %v6125_v54 = vpop.f32.mrf.mxu1 }
 0x2c4   : > { %1942 = vmax.xlane.f32.xlu1 %v1941_v8  ;;  %v6300_v8 = vpop.f32.mrf.mxu0 }
 0x2c5   : > { %v6127_v19 = vpop.f32.mrf.mxu1 }
 0x2c6   : > { %v1944_v56 = vmax.f32 %v6125_v54, %v6127_v19  ;;  %v6304_v37 = vpop.f32.mrf.mxu0 }
 0x2c7   : > { %v6131_v43 = vpop.f32.mrf.mxu1 }
 0x2c8   : > { %1945 = vmax.xlane.f32.xlu1 %v1944_v56 }
 0x2c9   : > { %v6133_v58 = vpop.f32.mrf.mxu1 }
 0x2ca   : > { %v1947_v33 = vmax.f32 %v6131_v43, %v6133_v58 }
 0x2cb   : > { %v6137_v39 = vpop.f32.mrf.mxu1 }
 0x2cc   : > { %1948 = vmax.xlane.f32.xlu0 %v1947_v33 }
 0x2cd   : > { %v6139_v57 = vpop.f32.mrf.mxu1 }
 0x2ce   : > { %v1950_v63 = vmax.f32 %v6137_v39, %v6139_v57 }
 0x2cf   : > { %v6143_v59 = vpop.f32.mrf.mxu1 }
 0x2d0   : > { %1951 = vmax.xlane.f32.xlu1 %v1950_v63 }
 0x2d1   : > { %v6145_v35 = vpop.f32.mrf.mxu1 }
 0x2d2   : > { %v1953_v14 = vmax.f32 %v6143_v59, %v6145_v35 }
 0x2d3   : > { %v6214_v29 = vpop.f32.mrf.mxu1 }
 0x2d4   : > { %1954 = vmax.xlane.f32.xlu0 %v1953_v14  ;;  %v4674_v14 = vpop.f32.mrf.mxu0 }
 0x2d5   : > { %v6216_v16 = vpop.f32.mrf.mxu1 }
 0x2d6   : > { %v1956_v1 = vmax.f32 %v6214_v29, %v6216_v16 }
 0x2d7   : > { %v6220_v53 = vpop.f32.mrf.mxu1 }
 0x2d8   : > { %1957 = vmax.xlane.f32.xlu1 %v1956_v1 }
 0x2d9   : > { %v6222_v15 = vpop.f32.mrf.mxu1 }
 0x2da   : > { %v1959_v31 = vmax.f32 %v6220_v53, %v6222_v15 }
 0x2db   : > { %v6226_v17 = vpop.f32.mrf.mxu1 }
 0x2dc   : > { %1960 = vmax.xlane.f32.xlu0 %v1959_v31  ;;  %v1463_v31 = vpop.f32.mrf.mxu0 }
 0x2dd   : > { %v6228_v55 = vpop.f32.mrf.mxu1 }
 0x2de   : > { %v1962_v26 = vmax.f32 %v6226_v17, %v6228_v55 }
 0x2df   : > { %v6232_v18 = vpop.f32.mrf.mxu1 }
 0x2e0   : > { %1963 = vmax.xlane.f32.xlu1 %v1962_v26 }
 0x2e1   : > { %v6234_v49 = vpop.f32.mrf.mxu1 }
 0x2e2   : > { %v1965_v11 = vmax.f32 %v6232_v18, %v6234_v49 }
 0x2e3   : > { %v6238_v9 = vpop.f32.mrf.mxu1 }
 0x2e4   : > { %1966 = vmax.xlane.f32.xlu0 %v1965_v11 }
 0x2e5   : > { %v6240_v28 = vpop.f32.mrf.mxu1 }
 0x2e6   : > { %v1968_v2 = vmax.f32 %v6238_v9, %v6240_v28 }
 0x2e7   : > { %v6244_v51 = vpop.f32.mrf.mxu1 }
 0x2e8   : > { %1969 = vmax.xlane.f32.xlu1 %v1968_v2  ;;  %v4677_v2 = vpop.f32.mrf.mxu0 }
 0x2e9   : > { %v6246_v23 = vpop.f32.mrf.mxu1 }
 0x2ea   : > { %v1971_v13 = vmax.f32 %v6244_v51, %v6246_v23 }
 0x2eb   : > { %v6250_v45 = vpop.f32.mrf.mxu1 }
 0x2ec   : > { %1972 = vmax.xlane.f32.xlu0 %v1971_v13 }
 0x2ed   : > { %v6252_v5 = vpop.f32.mrf.mxu1 }
 0x2ee   : > { %v1974_v62 = vmax.f32 %v6250_v45, %v6252_v5 }
 0x2ef   : > { %v6256_v24 = vpop.f32.mrf.mxu1 }
 0x2f0   : > { %7703 = vst [vmem:[#allocation32_spill] sm:$0xff] %v6256_v24  ;;  %1975 = vmax.xlane.f32.xlu1 %v1974_v62  ;;  %v1473_v62 = vpop.f32.mrf.mxu0 }
 0x2f1   : > { %v6258_v0 = vpop.f32.mrf.mxu1 }
 0x2f2   : > { %7704 = vst [vmem:[#allocation33_spill] sm:$0xff] %v6258_v0  ;;  %v1977_v7 = vmax.f32 %v6256_v24, %v6258_v0  ;;  %v6653_v24 = vld [vmem:[#allocation3 + $0x90] sm:$0xff] }
 0x2f3   : > { %v6262_v47 = vpop.f32.mrf.mxu1 }
 0x2f4   : > { %7705 = vst [vmem:[#allocation34_spill] sm:$0xff] %v6262_v47  ;;  %1978 = vmax.xlane.f32.xlu0 %v1977_v7 }
 0x2f5   : > { %v6264_v60 = vpop.f32.mrf.mxu1 }
 0x2f6   : > { %7706 = vst [vmem:[#allocation35_spill] sm:$0xff] %v6264_v60  ;;  %v1980_v25 = vmax.f32 %v6262_v47, %v6264_v60  ;;  %v6621_v47 = vld [vmem:[#allocation3 + $0x78] sm:$0xff] }
 0x2f7   : > { %v6268_v27 = vpop.f32.mrf.mxu1  ;;  %7744 = vst [vmem:[#allocation72_spill] sm:$0xff] %v6621_v47 }
 0x2f8   : > { %7707 = vst [vmem:[#allocation36_spill] sm:$0xff] %v6268_v27  ;;  %1981 = vmax.xlane.f32.xlu1 %v1980_v25 }
 0x2f9   : > { %v6272_v30 = vpop.f32.mrf.mxu1 }
 0x2fa   : > { %7708 = vst [vmem:[#allocation37_spill] sm:$0xff] %v6272_v30  ;;  %v1983_v6 = vmax.f32 %v6268_v27, %v6272_v30  ;;  %v6601_v30 = vld [vmem:[#allocation3 + $0x68] sm:$0xff]  ;;  %v6611_v27 = vld [vmem:[#allocation3 + $0x70] sm:$0xff] }
 0x2fb   : > { %v6278_v34 = vpop.f32.mrf.mxu1  ;;  %7740 = vst [vmem:[#allocation68_spill] sm:$0xff] %v6601_v30  ;;  %7742 = vst [vmem:[#allocation70_spill] sm:$0xff] %v6611_v27 }
 0x2fc   : > { %7709 = vst [vmem:[#allocation38_spill] sm:$0xff] %v6278_v34  ;;  %1984 = vmax.xlane.f32.xlu0 %v1983_v6  ;;  %v4680_v6 = vpop.f32.mrf.mxu0 }
 0x2fd   : > { %v6282_v10 = vpop.f32.mrf.mxu1 }
 0x2fe   : > { %7710 = vst [vmem:[#allocation39_spill] sm:$0xff] %v6282_v10  ;;  %v1986_v40 = vmax.f32 %v6278_v34, %v6282_v10 }
 0x2ff   : > { %v6288_v41 = vpop.f32.mrf.mxu1 }
 0x300   : > { %7711 = vst [vmem:[#allocation40_spill] sm:$0xff] %v6288_v41  ;;  %1987 = vmax.xlane.f32.xlu1 %v1986_v40 }
 0x301   : > { %v6292_v44 = vpop.f32.mrf.mxu1 }
 0x302   : > { %7712 = vst [vmem:[#allocation41_spill] sm:$0xff] %v6292_v44  ;;  %v1989_v48 = vmax.f32 %v6288_v41, %v6292_v44 }
 0x303   : > { %v6298_v12 = vpop.f32.mrf.mxu1 }
 0x304   : > { %7713 = vst [vmem:[#allocation42_spill] sm:$0xff] %v6298_v12  ;;  %1990 = vmax.xlane.f32.xlu0 %v1989_v48  ;;  %v6327_v48 = vld [vmem:[%s7532_s8] ss:$0 sm:$0xff] }
 0x305   : > { %v6302_v56 = vpop.f32.mrf.mxu1 }
 0x306   : > { %7714 = vst [vmem:[#allocation43_spill] sm:$0xff] %v6302_v56  ;;  %v1992_v33 = vmax.f32 %v6298_v12, %v6302_v56 }
 0x307   : > { %v6308_v63 = vpop.f32.mrf.mxu1 }
 0x308   : > { %7715 = vst [vmem:[#allocation44_spill] sm:$0xff] %v6308_v63  ;;  %1993 = vmax.xlane.f32.xlu0 %v1992_v33  ;;  %v1483_v33 = vpop.f32.mrf.mxu0 }
 0x309   : > { %v6310_v1 = vpop.f32.mrf.mxu1  ;;  %v1484_v41 = vadd.f32 %v6327_v48, %v1483_v33 }
 0x30a   : > { %7716 = vst [vmem:[#allocation45_spill] sm:$0xff] %v6310_v1  ;;  %v1995_v26 = vmax.f32 %v6308_v63, %v6310_v1  ;;  %v4683_v1 = vpop.f32.mrf.mxu0 }
 0x30b   : > { %v6314_v11 = vpop.f32.mrf.mxu1 }
 0x30c   : > { %7717 = vst [vmem:[#allocation46_spill] sm:$0xff] %v6314_v11  ;;  %1996 = vmax.xlane.f32.xlu1 %v1995_v26  ;;  %v1493_v63 = vpop.f32.mrf.mxu0 }
 0x30d   : > { %v6316_v13 = vpop.f32.mrf.mxu1 }
 0x30e   : > { %7718 = vst [vmem:[#allocation47_spill] sm:$0xff] %v6316_v13  ;;  %v1998_v7 = vmax.f32 %v6314_v11, %v6316_v13  ;;  %v1499_v13 = vadd.f32 %v4683_v1, %v6327_v48 }
 0x30f   : > { %v6320_v25 = vpop.f32.mrf.mxu1 }
 0x310   : > { %7719 = vst [vmem:[#allocation48_spill] sm:$0xff] %v6320_v25  ;;  %1999 = vmax.xlane.f32.xlu1 %v1998_v7  ;;  %v1489_v7 = vadd.f32 %v4680_v6, %v6327_v48  ;;  %v1597_v12 = vmax.f32 %v1499_v13, 0.0 }
 0x311   : > { %v6322_v40 = vpop.f32.mrf.mxu1 }
 0x312   : > { %7720 = vst [vmem:[#allocation49_spill] sm:$0xff] %v6322_v40  ;;  %v2001_v26 = vmax.f32 %v6320_v25, %v6322_v40  ;;  %v1494_v40 = vadd.f32 %v6327_v48, %v1493_v63  ;;  %v6343_v25 = vpop.f32.mrf.mxu0  ;;  %2961 = vmatpush1.msra.mxu0 %v1597_v12  ;;  %v1595_v6 = vmax.f32 %v1489_v7, 0.0  ;;  %v1474_v63 = vadd.f32 %v6327_v48, %v1473_v62 }
 0x313   : > { %v6331_v61 = vpop.f32.mrf.mxu1 }
 0x314   : > { %7721 = vst [vmem:[#allocation50_spill] sm:$0xff] %v6331_v61  ;;  %2002 = vmax.xlane.f32.xlu1 %v2001_v26  ;;  %v1479_v26 = vadd.f32 %v4677_v2, %v6327_v48  ;;  %v1596_v10 = vmax.f32 %v1494_v40, 0.0  ;;  %v6348_v34 = vpop.f32.mrf.mxu0  ;;  %v1469_v2 = vadd.f32 %v4674_v14, %v6327_v48  ;;  %v1592_v62 = vmax.f32 %v1474_v63, 0.0 }
 0x315   : > { %v6334_v11 = vpop.f32.mrf.mxu1 }
 0x316   : > { %7722 = vst [vmem:[#allocation51_spill] sm:$0xff] %v6334_v11  ;;  %v2004_v56 = vmax.f32 %v6331_v61, %v6334_v11  ;;  %v7725_v11 = vmov 0.0   ;;  %v1594_v61 = vmax.f32 %v1484_v41, 0.0  ;;  %v6356_v12 = vpop.f32.mrf.mxu0  ;;  %v1593_v40 = vmax.f32 %v1479_v26, 0.0 }
 0x317   : > { %v6339_v44 = vpop.f32.mrf.mxu1  ;;  %2962 = vmatprep.subr.mxu0 %v7725_v11  ;;  %v1459_v26 = vadd.f32 %v6300_v8, %v6327_v48 }
 0x318   : > { %7723 = vst [vmem:[#allocation52_spill] sm:$0xff] %v6339_v44  ;;  %2005 = vmax.xlane.f32.xlu1 %v2004_v56  ;;  %2963 = vmatpush1.msra.mxu0 %v1596_v10  ;;  %v6362_v7 = vpop.f32.mrf.mxu0  ;;  %v1464_v10 = vadd.f32 %v6327_v48, %v1463_v31  ;;  %v1454_v31 = vadd.f32 %v6327_v48, %v6304_v37 }
 0x319   : > { %v6345_v1 = vpop.f32.mrf.mxu1  ;;  %2964 = vmatprep.subr.mxu0 %v7725_v11 }
 0x31a   : > { %7724 = vst [vmem:[#allocation53_spill] sm:$0xff] %v6345_v1  ;;  %v2007_v13 = vmax.f32 %v6339_v44, %v6345_v1  ;;  %2965 = vmatpush1.msra.mxu0 %v1595_v6  ;;  %v1591_v6 = vmax.f32 %v1469_v2, 0.0  ;;  %v1449_v2 = vadd.f32 %v6290_v42, %v6327_v48 }
 0x31b   : > { %v6353_v33 = vpop.f32.mrf.mxu1  ;;  %2966 = vmatprep.subr.mxu0 %v7725_v11 }
 0x31c   : > { %7726 = vst [vmem:[#allocation54_spill] sm:$0xff] %v6353_v33  ;;  %2008 = vmax.xlane.f32.xlu1 %v2007_v13  ;;  %2967 = vmatpush1.msra.mxu0 %v1594_v61  ;;  %v6370_v13 = vpop.f32.mrf.mxu0 }
 0x31d   : > { %v6359_v56 = vpop.f32.mrf.mxu1  ;;  %2968 = vmatprep.subr.mxu0 %v7725_v11 }
 0x31e   : > { %7727 = vst [vmem:[#allocation55_spill] sm:$0xff] %v6359_v56  ;;  %v2010_v1 = vmax.f32 %v6353_v33, %v6359_v56  ;;  %2969 = vmatpush1.msra.mxu0 %v1593_v40  ;;  %v6377_v56 = vpop.f32.mrf.mxu0  ;;  %v1589_v40 = vmax.f32 %v1459_v26, 0.0  ;;  %v1439_v26 = vadd.f32 %v6280_v36, %v6327_v48 }
 0x31f   : > { %v6367_v41 = vpop.f32.mrf.mxu1  ;;  %2970 = vmatprep.subr.mxu0 %v7725_v11 }
 0x320   : > { %7728 = vst [vmem:[#allocation56_spill] sm:$0xff] %v6367_v41  ;;  %2011 = vmax.xlane.f32.xlu1 %v2010_v1  ;;  %v1590_v1 = vmax.f32 %v1464_v10, 0.0  ;;  %2971 = vmatpush1.msra.mxu0 %v1592_v62  ;;  %v6386_v63 = vpop.f32.mrf.mxu0  ;;  %v1588_v10 = vmax.f32 %v1454_v31, 0.0 }
 0x321   : > { %v6373_v14 = vpop.f32.mrf.mxu1  ;;  %2972 = vmatprep.subr.mxu0 %v7725_v11 }
 0x322   : > { %7729 = vst [vmem:[#allocation57_spill] sm:$0xff] %v6373_v14  ;;  %v2013_v33 = vmax.f32 %v6367_v41, %v6373_v14  ;;  %2973 = vmatpush1.msra.mxu0 %v1591_v6  ;;  %v6393_v14 = vpop.f32.mrf.mxu0  ;;  %v1587_v6 = vmax.f32 %v1449_v2, 0.0  ;;  %v1429_v2 = vadd.f32 %v6270_v21, %v6327_v48 }
 0x323   : > { %v6382_v61 = vpop.f32.mrf.mxu1  ;;  %2974 = vmatprep.subr.mxu0 %v7725_v11 }
 0x324   : > { %7730 = vst [vmem:[#allocation58_spill] sm:$0xff] %v6382_v61  ;;  %2014 = vmax.xlane.f32.xlu1 %v2013_v33  ;;  %v1444_v33 = vadd.f32 %v6327_v48, %v6294_v22  ;;  %2975 = vmatpush1.msra.mxu0 %v1590_v1  ;;  %v4698_v62 = vpop.f32.mrf.mxu0 }
 0x325   : > { %v6389_v8 = vpop.f32.mrf.mxu1  ;;  %2976 = vmatprep.subr.mxu0 %v7725_v11 }
 0x326   : > { %7731 = vst [vmem:[#allocation59_spill] sm:$0xff] %v6389_v8  ;;  %v2016_v41 = vmax.f32 %v6382_v61, %v6389_v8  ;;  %2977 = vmatpush1.msra.mxu0 %v1589_v40  ;;  %v1543_v8 = vpop.f32.mrf.mxu0  ;;  %v1586_v31 = vmax.f32 %v1444_v33, 0.0  ;;  %v1585_v40 = vmax.f32 %v1439_v26, 0.0 }
 0x327   : > { %v6398_v37 = vpop.f32.mrf.mxu1  ;;  %2978 = vmatprep.subr.mxu0 %v7725_v11 }
 0x328   : > { %7732 = vst [vmem:[#allocation60_spill] sm:$0xff] %v6398_v37  ;;  %2017 = vmax.xlane.f32.xlu1 %v2016_v41  ;;  %v1434_v41 = vadd.f32 %v6327_v48, %v6284_v38  ;;  %2979 = vmatpush1.msra.mxu0 %v1588_v10  ;;  %v4701_v1 = vpop.f32.mrf.mxu0  ;;  %v1424_v38 = vadd.f32 %v6327_v48, %v6274_v32  ;;  %v1583_v10 = vmax.f32 %v1429_v2, 0.0 }
 0x329   : > { %v6403_v42 = vpop.f32.mrf.mxu1  ;;  %2980 = vmatprep.subr.mxu0 %v7725_v11 }
 0x32a   : > { %7733 = vst [vmem:[#allocation61_spill] sm:$0xff] %v6403_v42  ;;  %v2019_v61 = vmax.f32 %v6398_v37, %v6403_v42  ;;  %2981 = vmatpush1.msra.mxu0 %v1587_v6  ;;  %v1553_v42 = vpop.f32.mrf.mxu0  ;;  %v1584_v33 = vmax.f32 %v1434_v41, 0.0  ;;  %v1582_v26 = vmax.f32 %v1424_v38, 0.0 }
 0x32b   : > { %v6410_v22 = vpop.f32.mrf.mxu1  ;;  %2982 = vmatprep.subr.mxu0 %v7725_v11 }
 0x32c   : > { %7734 = vst [vmem:[#allocation62_spill] sm:$0xff] %v6410_v22  ;;  %2020 = vmax.xlane.f32.xlu1 %v2019_v61  ;;  %2983 = vmatpush1.msra.mxu0 %v1586_v31  ;;  %v4704_v61 = vpop.f32.mrf.mxu0 }
 0x32d   : > { %v6415_v36 = vpop.f32.mrf.mxu1  ;;  %2984 = vmatprep.subr.mxu0 %v7725_v11  ;;  %v1569_v32 = vadd.f32 %v4704_v61, %v6327_v48  ;;  %v1554_v61 = vadd.f32 %v6327_v48, %v1553_v42 }
 0x32e   : > { %7735 = vst [vmem:[#allocation63_spill] sm:$0xff] %v6415_v36  ;;  %v2022_v37 = vmax.f32 %v6410_v22, %v6415_v36  ;;  %2985 = vmatpush1.msra.mxu0 %v1585_v40  ;;  %v1563_v21 = vpop.f32.mrf.mxu0  ;;  %v1559_v40 = vadd.f32 %v4701_v1, %v6327_v48 }
 0x32f   : > { %2986 = vmatprep.subr.mxu0 %v7725_v11  ;;  %v1611_v38 = vmax.f32 %v1569_v32, 0.0  ;;  %v1608_v1 = vmax.f32 %v1554_v61, 0.0  ;;  %v6444_v32 = vld [vmem:[#allocation3] sm:$0xff] }
 0x330   : > { %2023 = vmax.xlane.f32.xlu1 %v2022_v37  ;;  %2987 = vmatpush1.msra.mxu0 %v1584_v33  ;;  %v4707_v6 = vpop.f32.mrf.mxu0  ;;  %v1564_v37 = vadd.f32 %v6327_v48, %v1563_v21  ;;  %v1609_v21 = vmax.f32 %v1559_v40, 0.0 }
 0x331   : > { %v1579_v36 = vadd.f32 %v4707_v6, %v6327_v48  ;;  %2988 = vmatprep.subr.mxu0 %v7725_v11  ;;  %v1539_v6 = vadd.f32 %v6386_v63, %v6327_v48 }
 0x332   : > { %2989 = vmatpush1.msra.mxu0 %v1583_v10  ;;  %v1573_v41 = vpop.f32.mrf.mxu0  ;;  %v1610_v10 = vmax.f32 %v1564_v37, 0.0 }
 0x333   : > { %v1613_v31 = vmax.f32 %v1579_v36, 0.0  ;;  %2990 = vmatprep.subr.mxu0 %v7725_v11  ;;  %v1574_v2 = vadd.f32 %v6327_v48, %v1573_v41  ;;  %v1549_v36 = vadd.f32 %v4698_v62, %v6327_v48  ;;  %v1534_v62 = vadd.f32 %v6327_v48, %v6393_v14 }
 0x334   : > { %2991 = vmatpush1.msra.mxu0 %v1582_v26  ;;  %v1544_v26 = vadd.f32 %v6327_v48, %v1543_v8  ;;  %v1605_v37 = vmax.f32 %v1539_v6, 0.0  ;;  %v1524_v14 = vadd.f32 %v6327_v48, %v6377_v56 }
 0x335   : > { %2992 = vmatprep.subr.mxu0 %v7725_v11  ;;  %v1612_v33 = vmax.f32 %v1574_v2, 0.0  ;;  %v1607_v42 = vmax.f32 %v1549_v36, 0.0  ;;  %v6455_v2 = vld [vmem:[#allocation3 + $0x8] sm:$0xff]  ;;  %v1604_v40 = vmax.f32 %v1534_v62, 0.0  ;;  %v1514_v36 = vadd.f32 %v6327_v48, %v6362_v7  ;;  %v6485_v7 = vld [vmem:[#allocation3 + $0x18] sm:$0xff] }
 0x336   : > { %2993 = vmatpush2.msra.mxu0 %v1613_v31  ;;  %v1606_v41 = vmax.f32 %v1544_v26, 0.0  ;;  %v1529_v31 = vadd.f32 %v6370_v13, %v6327_v48  ;;  %v1509_v26 = vadd.f32 %v6343_v25, %v6327_v48 }
 0x337   : > { %2994 = vmatprep.subr.mxu0 %v7725_v11  ;;  %v1600_v62 = vmax.f32 %v1514_v36, 0.0  ;;  %v6519_v36 = vld [vmem:[#allocation3 + $0x30] sm:$0xff] }
 0x338   : > { %2995 = vmatpush2.msra.mxu0 %v1612_v33  ;;  %v1519_v33 = vadd.f32 %v6356_v12, %v6327_v48  ;;  %v1603_v61 = vmax.f32 %v1529_v31, 0.0 }
 0x339   : > { %2996 = vmatprep.subr.mxu0 %v7725_v11 }
 0x33a   : > { %2997 = vmatpush2.msra.mxu0 %v1611_v38  ;;  %v6569_v38 = vld [vmem:[#allocation3 + $0x50] sm:$0xff] }
 0x33b   : > { %2998 = vmatprep.subr.mxu0 %v7725_v11 }
 0x33c   : > { %2999 = vmatpush2.msra.mxu0 %v1610_v10  ;;  %v6471_v10 = vld [vmem:[#allocation3 + $0x10] sm:$0xff] }
 0x33d   : > { %3000 = vmatprep.subr.mxu0 %v7725_v11 }
 0x33e   : > { %3001 = vmatpush2.msra.mxu0 %v1609_v21  ;;  %v1602_v21 = vmax.f32 %v1524_v14, 0.0 }
 0x33f   : > { %3002 = vmatprep.subr.mxu0 %v7725_v11 }
 0x340   : > { %3003 = vmatpush2.msra.mxu0 %v1608_v1  ;;  %v1601_v1 = vmax.f32 %v1519_v33, 0.0 }
 0x341   : > { %3004 = vmatprep.subr.mxu0 %v7725_v11 }
 0x342   : > { %3005 = vmatpush2.msra.mxu0 %v1607_v42  ;;  %v1504_v42 = vadd.f32 %v6327_v48, %v6348_v34  ;;  %v6499_v34 = vld [vmem:[#allocation3 + $0x20] sm:$0xff] }
 0x343   : > { %3006 = vmatprep.subr.mxu0 %v7725_v11 }
 0x344   : > { %3007 = vmatpush2.msra.mxu0 %v1606_v41  ;;  %v1598_v48 = vmax.f32 %v1504_v42, 0.0 }
 0x345   : > { %v1937_v8 = vpop.xlane.xlu0 %1936  ;;  %3008 = vmatprep.subr.mxu0 %v7725_v11 }
 0x346   : > { %v6452_v63 = vmax.f32 %v6444_v32, %v1937_v8  ;;  %3009 = vmatpush2.msra.mxu0 %v1605_v37  ;;  %v1599_v8 = vmax.f32 %v1509_v26, 0.0  ;;  %v6529_v26 = vpop.f32.mrf.mxu1 }
 0x347   : > { %3010 = vmatprep.subr.mxu0 %v7725_v11  ;;  %7736 = vst [vmem:[#allocation64_spill] sm:$0xff] %v6529_v26 }
 0x348   : > { %3249 = vst.msk [vmem:[#allocation3] sm:$0xff] %vm925_vm0, %v6452_v63  ;;  %2161 = vperm.xlu1 %4908, %v6452_v63   ;;  %3011 = vmatpush2.msra.mxu0 %v1604_v40  ;;  %v6509_v40 = vld [vmem:[#allocation3 + $0x28] sm:$0xff] }
 0x349   : > { %v1940_v13 = vpop.xlane.xlu0 %1939  ;;  %3012 = vmatprep.subr.mxu0 %v7725_v11 }
 0x34a   : > { %v6468_v56 = vmax.f32 %v6455_v2, %v1940_v13  ;;  %3013 = vmatpush2.msra.mxu0 %v1603_v61 }
 0x34b   : > { %3014 = vmatprep.subr.mxu0 %v7725_v11 }
 0x34c   : > { %3250 = vst.msk [vmem:[#allocation3 + $0x8] sm:$0xff] %vm925_vm0, %v6468_v56  ;;  %2166 = vperm.xlu0 %4909, %v6468_v56   ;;  %3015 = vmatpush2.msra.mxu0 %v1602_v21 }
 0x34d   : > { %v1943_v12 = vpop.xlane.xlu1 %1942  ;;  %3016 = vmatprep.subr.mxu0 %v7725_v11 }
 0x34e   : > { %v6482_v6 = vmax.f32 %v6471_v10, %v1943_v12  ;;  %3017 = vmatpush2.msra.mxu0 %v1601_v1  ;;  %v6531_v1 = vld [vmem:[#allocation3 + $0x38] sm:$0xff] }
 0x34f   : > { %3018 = vmatprep.subr.mxu0 %v7725_v11 }
 0x350   : > { %3251 = vst.msk [vmem:[#allocation3 + $0x10] sm:$0xff] %vm925_vm0, %v6482_v6  ;;  %2171 = vperm.xlu0 %4909, %v6482_v6   ;;  %3019 = vmatpush2.msra.mxu0 %v1600_v62 }
 0x351   : > { %v1946_v25 = vpop.xlane.xlu1 %1945  ;;  %3020 = vmatprep.subr.mxu0 %v7725_v11 }
 0x352   : > { %v6496_v31 = vmax.f32 %v6485_v7, %v1946_v25  ;;  %3021 = vmatpush2.msra.mxu0 %v1599_v8  ;;  %v6541_v8 = vpop.f32.mrf.mxu1 }
 0x353   : > { %3022 = vmatprep.subr.mxu0 %v7725_v11  ;;  %7737 = vst [vmem:[#allocation65_spill] sm:$0xff] %v6541_v8 }
 0x354   : > { %3252 = vst.msk [vmem:[#allocation3 + $0x18] sm:$0xff] %vm925_vm0, %v6496_v31  ;;  %2176 = vperm.xlu0 %4909, %v6496_v31   ;;  %3023 = vmatpush2.msra.mxu0 %v1598_v48  ;;  %v6543_v48 = vld [vmem:[#allocation3 + $0x40] sm:$0xff]  ;;  %v6553_v42 = vpop.f32.mrf.mxu1 }
 0x355   : > { %v1949_v37 = vpop.xlane.xlu0 %1948  ;;  %7738 = vst [vmem:[#allocation66_spill] sm:$0xff] %v6553_v42 }
 0x356   : > { %v6506_v14 = vmax.f32 %v6499_v34, %v1949_v37  ;;  %v6567_v41 = vpop.f32.mrf.mxu1 }
 0x357   : > { %7739 = vst [vmem:[#allocation67_spill] sm:$0xff] %v6567_v41 }
 0x358   : > { %3253 = vst.msk [vmem:[#allocation3 + $0x20] sm:$0xff] %vm925_vm0, %v6506_v14  ;;  %2181 = vperm.xlu0 %4909, %v6506_v14  }
 0x359   : > { %v1952_v33 = vpop.xlane.xlu1 %1951 }
 0x35a   : > { %v6517_v61 = vmax.f32 %v6509_v40, %v1952_v33 }
 0x35c   : > { %3254 = vst.msk [vmem:[#allocation3 + $0x28] sm:$0xff] %vm925_vm0, %v6517_v61  ;;  %2186 = vperm.xlu0 %4909, %v6517_v61  }
 0x35d   : > { %v1955_v21 = vpop.xlane.xlu0 %1954 }
 0x35e   : > { %v6527_v12 = vmax.f32 %v6519_v36, %v1955_v21 }
 0x360   : > { %3255 = vst.msk [vmem:[#allocation3 + $0x30] sm:$0xff] %vm925_vm0, %v6527_v12  ;;  %2191 = vperm.xlu0 %4909, %v6527_v12  }
 0x361   : > { %v1958_v62 = vpop.xlane.xlu1 %1957 }
 0x362   : > { %v6539_v25 = vmax.f32 %v6531_v1, %v1958_v62  ;;  %v6555_v62 = vld [vmem:[#allocation3 + $0x48] sm:$0xff] }
 0x364   : > { %3256 = vst.msk [vmem:[#allocation3 + $0x38] sm:$0xff] %vm925_vm0, %v6539_v25  ;;  %2196 = vperm.xlu0 %4909, %v6539_v25  }
 0x365   : > { %v1961_v33 = vpop.xlane.xlu0 %1960 }
 0x366   : > { %v6551_v21 = vmax.f32 %v6543_v48, %v1961_v33  ;;  %v2025_v33 = vmax.f32 %v6529_v26, %v6541_v8  ;;  %v2028_v8 = vmax.f32 %v6553_v42, %v6567_v41  ;;  %v6581_v26 = vld [vmem:[#allocation3 + $0x58] sm:$0xff] }
 0x368   : > { %3257 = vst.msk [vmem:[#allocation3 + $0x40] sm:$0xff] %vm925_vm0, %v6551_v21  ;;  %2201 = vperm.xlu0 %4909, %v6551_v21  }
 0x369   : > { %v1964_v37 = vpop.xlane.xlu1 %1963 }
 0x36a   : > { %v6563_v13 = vmax.f32 %v6555_v62, %v1964_v37 }
 0x36c   : > { %3258 = vst.msk [vmem:[#allocation3 + $0x48] sm:$0xff] %vm925_vm0, %v6563_v13  ;;  %2206 = vperm.xlu0 %4909, %v6563_v13   ;;  %2026 = vmax.xlane.f32.xlu1 %v2025_v33 }
 0x36d   : > { %v1967_v11 = vpop.xlane.xlu0 %1966 }
 0x36e   : > { %v6577_v37 = vmax.f32 %v6569_v38, %v1967_v11  ;;  %v6591_v11 = vld [vmem:[#allocation3 + $0x60] sm:$0xff] }
 0x370   : > { %3259 = vst.msk [vmem:[#allocation3 + $0x50] sm:$0xff] %vm925_vm0, %v6577_v37  ;;  %2211 = vperm.xlu0 %4909, %v6577_v37   ;;  %2029 = vmax.xlane.f32.xlu1 %v2028_v8 }
 0x371   : > { %v1970_v22 = vpop.xlane.xlu1 %1969 }
 0x372   : > { %v6589_v33 = vmax.f32 %v6581_v26, %v1970_v22 }
 0x374   : > { %3260 = vst.msk [vmem:[#allocation3 + $0x58] sm:$0xff] %vm925_vm0, %v6589_v33  ;;  %2216 = vperm.xlu0 %4909, %v6589_v33  }
 0x375   : > { %v1973_v44 = vpop.xlane.xlu0 %1972 }
 0x376   : > { %v6599_v42 = vmax.f32 %v6591_v11, %v1973_v44 }
 0x378   : > { %3261 = vst.msk [vmem:[#allocation3 + $0x60] sm:$0xff] %vm925_vm0, %v6599_v42  ;;  %2221 = vperm.xlu0 %4909, %v6599_v42  }
 0x379   : > { %v1976_v8 = vpop.xlane.xlu1 %1975 }
 0x37a   : > { %v6609_v41 = vmax.f32 %v6601_v30, %v1976_v8  ;;  %v6631_v30 = vld [vmem:[#allocation3 + $0x80] sm:$0xff] }
 0x37c   : > { %7741 = vst [vmem:[#allocation69_spill] sm:$0xff] %v6609_v41  ;;  %3262 = vst.msk [vmem:[#allocation3 + $0x68] sm:$0xff] %vm925_vm0, %v6609_v41  ;;  %2226 = vperm.xlu0 %4909, %v6609_v41  }
 0x37d   : > { %v1979_v22 = vpop.xlane.xlu0 %1978 }
 0x37e   : > { %v6619_v60 = vmax.f32 %v6611_v27, %v1979_v22  ;;  %v2064_v27 = vsub.f32 %v6455_v2, %v6468_v56 }
 0x380   : > { %7743 = vst [vmem:[#allocation71_spill] sm:$0xff] %v6619_v60  ;;  %3263 = vst.msk [vmem:[#allocation3 + $0x70] sm:$0xff] %vm925_vm0, %v6619_v60 }
 0x381   : > { %v1982_v0 = vpop.xlane.xlu1 %1981  ;;  %2231 = vperm.xlu1 %4908, %v6619_v60   ;;  %v6643_v60 = vld [vmem:[#allocation3 + $0x88] sm:$0xff] }
 0x382   : > { %v6629_v44 = vmax.f32 %v6621_v47, %v1982_v0  ;;  %v2097_v47 = vmul.f32 1.442695, %v2064_v27  ;;  %v2066_v27 = vsub.f32 %v6485_v7, %v6496_v31 }
 0x384   : > { %7745 = vst [vmem:[#allocation73_spill] sm:$0xff] %v6629_v44  ;;  %3264 = vst.msk [vmem:[#allocation3 + $0x78] sm:$0xff] %vm925_vm0, %v6629_v44  ;;  %2236 = vperm.xlu0 %4909, %v6629_v44   ;;  %4910 = vpow2.f32 %v2097_v47 }
 0x385   : > { %v1985_v8 = vpop.xlane.xlu0 %1984 }
 0x386   : > { %v6641_v41 = vmax.f32 %v6631_v30, %v1985_v8  ;;  %v7748_v8 = vsub.f32 %v6444_v32, %v6452_v63  ;;  %v2101_v32 = vmul.f32 1.442695, %v2066_v27  ;;  %v6678_v63 = vld [vmem:[#allocation3 + $0xa0] sm:$0xff] }
 0x388   : > { %7746 = vst [vmem:[#allocation74_spill] sm:$0xff] %v6641_v41  ;;  %3265 = vst.msk [vmem:[#allocation3 + $0x80] sm:$0xff] %vm925_vm0, %v6641_v41  ;;  %2241 = vperm.xlu0 %4909, %v6641_v41   ;;  %v2095_v0 = vmul.f32 1.442695, %v7748_v8  ;;  %v6668_v41 = vld [vmem:[#allocation3 + $0x98] sm:$0xff] }
 0x389   : > { %v1988_v22 = vpop.xlane.xlu1 %1987 }
 0x38a   : > { %v6651_v44 = vmax.f32 %v6643_v60, %v1988_v22  ;;  %4912 = vpow2.f32 %v2095_v0 }
 0x38b   : > { %4914 = vpow2.f32 %v2101_v32 }
 0x38c   : > { %7747 = vst [vmem:[#allocation75_spill] sm:$0xff] %v6651_v44  ;;  %3266 = vst.msk [vmem:[#allocation3 + $0x88] sm:$0xff] %vm925_vm0, %v6651_v44  ;;  %2246 = vperm.xlu0 %4909, %v6651_v44  }
 0x38d   : > { %v1991_v56 = vpop.xlane.xlu0 %1990 }
 0x38e   : > { %v6666_v22 = vmax.f32 %v6653_v24, %v1991_v56  ;;  %v7749_v56 = vsub.f32 %v6471_v10, %v6482_v6  ;;  %v7750_v10 = vsub.f32 %v6499_v34, %v6506_v14 }
 0x390   : > { %3267 = vst.msk [vmem:[#allocation3 + $0x90] sm:$0xff] %vm925_vm0, %v6666_v22  ;;  %2251 = vperm.xlu0 %4909, %v6666_v22   ;;  %v2099_v8 = vmul.f32 1.442695, %v7749_v56  ;;  %v2103_v6 = vmul.f32 1.442695, %v7750_v10  ;;  %v6706_v56 = vld [vmem:[#allocation3 + $0xb0] sm:$0xff] }
 0x391   : > { %v1994_v44 = vpop.xlane.xlu0 %1993 }
 0x392   : > { %v6676_v47 = vmax.f32 %v6668_v41, %v1994_v44  ;;  %v6691_v44 = vld [vmem:[#allocation3 + $0xa8] sm:$0xff]  ;;  %4916 = vpow2.f32 %v2099_v8 }
 0x393   : > { %4918 = vpow2.f32 %v2103_v6  ;;  %v7755_v6 = vsub.f32 %v6509_v40, %v6517_v61 }
 0x394   : > { %3268 = vst.msk [vmem:[#allocation3 + $0x98] sm:$0xff] %vm925_vm0, %v6676_v47  ;;  %2256 = vperm.xlu1 %4908, %v6676_v47  }
 0x395   : > { %v1997_v31 = vpop.xlane.xlu1 %1996 }
 0x396   : > { %v6689_v0 = vmax.f32 %v6678_v63, %v1997_v31  ;;  %v6704_v31 = vpop.eup %4910 }
 0x397   : > { %7752 = vst [vmem:[#allocation77_spill] sm:$0xff] %v6704_v31  ;;  %v6717_v14 = vpop.eup %4912 }
 0x398   : > { %3269 = vst.msk [vmem:[#allocation3 + $0xa0] sm:$0xff] %vm925_vm0, %v6689_v0  ;;  %2261 = vperm.xlu0 %4909, %v6689_v0   ;;  %7753 = vst [vmem:[#allocation78_spill] sm:$0xff] %v6717_v14 }
 0x399   : > { %v2000_v7 = vpop.xlane.xlu1 %1999 }
 0x39a   : > { %v6702_v32 = vmax.f32 %v6691_v44, %v2000_v7  ;;  %v6719_v7 = vld [vmem:[#allocation3 + $0xb8] sm:$0xff] }
 0x39b   : > { %7754 = vst [vmem:[#allocation79_spill] sm:$0xff] %v6719_v7 }
 0x39c   : > { %7751 = vst [vmem:[#allocation76_spill] sm:$0xff] %v6702_v32  ;;  %3270 = vst.msk [vmem:[#allocation3 + $0xa8] sm:$0xff] %vm925_vm0, %v6702_v32  ;;  %2775 = vperm.xlu0 %4909, %v6704_v31   ;;  %2266 = vperm.xlu1 %4908, %v6702_v32   ;;  %v6733_v31 = vpop.eup %4914  ;;  %v6735_v32 = vld [vmem:[#allocation3 + $0xc0] sm:$0xff] }
 0x39d   : > { %v2003_v8 = vpop.xlane.xlu1 %2002  ;;  %7757 = vst [vmem:[#allocation81_spill] sm:$0xff] %v6733_v31  ;;  %7758 = vst [vmem:[#allocation82_spill] sm:$0xff] %v6735_v32 }
 0x39e   : > { %v6715_v34 = vmax.f32 %v6706_v56, %v2003_v8  ;;  %v2105_v8 = vmul.f32 1.442695, %v7755_v6 }
 0x39f   : > { %v6746_v61 = vpop.eup %4916 }
 0x3a0   : > { %3271 = vst.msk [vmem:[#allocation3 + $0xb0] sm:$0xff] %vm925_vm0, %v6715_v34  ;;  %2271 = vperm.xlu0 %4909, %v6715_v34   ;;  %2770 = vperm.xlu1 %4908, %v6717_v14   ;;  %4920 = vpow2.f32 %v2105_v8  ;;  %7760 = vst [vmem:[#allocation84_spill] sm:$0xff] %v6746_v61  ;;  %v7762_v8 = vsub.f32 %v6519_v36, %v6527_v12  ;;  %v6775_v12 = vld [vmem:[#allocation3 + $0xd8] sm:$0xff] }
 0x3a1   : > { %v2006_v27 = vpop.xlane.xlu1 %2005  ;;  %7767 = vst [vmem:[#allocation90_spill] sm:$0xff] %v6775_v12 }
 0x3a2   : > { %v6731_v2 = vmax.f32 %v6719_v7, %v2006_v27  ;;  %v6748_v27 = vld [vmem:[#allocation3 + $0xc8] sm:$0xff]  ;;  %v6764_v7 = vld [vmem:[#allocation3 + $0xd0] sm:$0xff] }
 0x3a3   : > { %7761 = vst [vmem:[#allocation85_spill] sm:$0xff] %v6748_v27  ;;  %7765 = vst [vmem:[#allocation88_spill] sm:$0xff] %v6764_v7 }
 0x3a4   : > { %7756 = vst [vmem:[#allocation80_spill] sm:$0xff] %v6731_v2  ;;  %3272 = vst.msk [vmem:[#allocation3 + $0xb8] sm:$0xff] %vm925_vm0, %v6731_v2  ;;  %2785 = vperm.xlu0 %4909, %v6733_v31   ;;  %2276 = vperm.xlu1 %4908, %v6731_v2   ;;  %v6762_v2 = vpop.eup %4918 }
 0x3a5   : > { %v2009_v14 = vpop.xlane.xlu1 %2008  ;;  %7764 = vst [vmem:[#allocation87_spill] sm:$0xff] %v6762_v2 }
 0x3a6   : > { %v6744_v40 = vmax.f32 %v6735_v32, %v2009_v14  ;;  %v2107_v14 = vmul.f32 1.442695, %v7762_v8 }
 0x3a8   : > { %7759 = vst [vmem:[#allocation83_spill] sm:$0xff] %v6744_v40  ;;  %3273 = vst.msk [vmem:[#allocation3 + $0xc0] sm:$0xff] %vm925_vm0, %v6744_v40  ;;  %2281 = vperm.xlu0 %4909, %v6744_v40   ;;  %2780 = vperm.xlu1 %4908, %v6746_v61   ;;  %4922 = vpow2.f32 %v2107_v14  ;;  %v6787_v14 = vld [vmem:[#allocation3 + $0xe0] sm:$0xff] }
 0x3a9   : > { %v2012_v10 = vpop.xlane.xlu1 %2011  ;;  %7770 = vst [vmem:[#allocation93_spill] sm:$0xff] %v6787_v14 }
 0x3aa   : > { %v6760_v31 = vmax.f32 %v6748_v27, %v2012_v10 }
 0x3ac   : > { %7763 = vst [vmem:[#allocation86_spill] sm:$0xff] %v6760_v31  ;;  %3274 = vst.msk [vmem:[#allocation3 + $0xc8] sm:$0xff] %vm925_vm0, %v6760_v31  ;;  %2790 = vperm.xlu0 %4909, %v6762_v2   ;;  %2286 = vperm.xlu1 %4908, %v6760_v31  }
 0x3ad   : > { %v2015_v61 = vpop.xlane.xlu1 %2014  ;;  %v6785_v31 = vpop.eup %4920 }
 0x3ae   : > { %v6773_v36 = vmax.f32 %v6764_v7, %v2015_v61  ;;  %7769 = vst [vmem:[#allocation92_spill] sm:$0xff] %v6785_v31 }
 0x3b0   : > { %7766 = vst [vmem:[#allocation89_spill] sm:$0xff] %v6773_v36  ;;  %3275 = vst.msk [vmem:[#allocation3 + $0xd0] sm:$0xff] %vm925_vm0, %v6773_v36  ;;  %2291 = vperm.xlu0 %4909, %v6773_v36  }
 0x3b1   : > { %v2018_v8 = vpop.xlane.xlu1 %2017 }
 0x3b2   : > { %v6783_v6 = vmax.f32 %v6775_v12, %v2018_v8  ;;  %v6798_v8 = vld [vmem:[#allocation3 + $0xe8] sm:$0xff] }
 0x3b3   : > { %7772 = vst [vmem:[#allocation95_spill] sm:$0xff] %v6798_v8 }
 0x3b4   : > { %7768 = vst [vmem:[#allocation91_spill] sm:$0xff] %v6783_v6  ;;  %3276 = vst.msk [vmem:[#allocation3 + $0xd8] sm:$0xff] %vm925_vm0, %v6783_v6  ;;  %2795 = vperm.xlu0 %4909, %v6785_v31   ;;  %2296 = vperm.xlu1 %4908, %v6783_v6  }
 0x3b5   : > { %v2021_v10 = vpop.xlane.xlu1 %2020  ;;  %v6808_v31 = vpop.eup %4922 }
 0x3b6   : > { %v6796_v36 = vmax.f32 %v6787_v14, %v2021_v10  ;;  %7774 = vst [vmem:[#allocation97_spill] sm:$0xff] %v6808_v31 }
 0x3b8   : > { %7771 = vst [vmem:[#allocation94_spill] sm:$0xff] %v6796_v36  ;;  %3277 = vst.msk [vmem:[#allocation3 + $0xe0] sm:$0xff] %vm925_vm0, %v6796_v36  ;;  %2301 = vperm.xlu0 %4909, %v6796_v36  }
 0x3b9   : > { %v2024_v61 = vpop.xlane.xlu1 %2023 }
 0x3ba   : > { %v6806_v12 = vmax.f32 %v6798_v8, %v2024_v61 }
 0x3bc   : > { %7773 = vst [vmem:[#allocation96_spill] sm:$0xff] %v6806_v12  ;;  %3278 = vst.msk [vmem:[#allocation3 + $0xe8] sm:$0xff] %vm925_vm0, %v6806_v12  ;;  %2800 = vperm.xlu0 %4909, %v6808_v31   ;;  %2306 = vperm.xlu1 %4908, %v6806_v12  }
 0x3c3   : > { %v2162_v7 = vpop.permute.xlu1 %2161 }
 0x3c4   : > { %v2319_v14 = vsub.f32 %v6107_v4, %v2162_v7  ;;  %v2320_v36 = vsub.f32 %v6109_v46, %v2162_v7 }
 0x3c6   : > { %v2383_v6 = vmul.f32 1.442695, %v2319_v14  ;;  %v2385_v61 = vmul.f32 1.442695, %v2320_v36 }
 0x3c7   : > { %v2167_v27 = vpop.permute.xlu0 %2166 }
 0x3c8   : > { %4924 = vpow2.f32 %v2383_v6  ;;  %v2321_v40 = vsub.f32 %v6113_v3, %v2167_v27  ;;  %v2322_v10 = vsub.f32 %v6115_v50, %v2167_v27 }
 0x3c9   : > { %4926 = vpow2.f32 %v2385_v61 }
 0x3ca   : > { %v2387_v8 = vmul.f32 1.442695, %v2321_v40  ;;  %v2389_v32 = vmul.f32 1.442695, %v2322_v10 }
 0x3cb   : > { %v2172_v2 = vpop.permute.xlu0 %2171 }
 0x3cc   : > { %4928 = vpow2.f32 %v2387_v8  ;;  %v2323_v12 = vsub.f32 %v6119_v52, %v2172_v2  ;;  %v2324_v31 = vsub.f32 %v6121_v20, %v2172_v2 }
 0x3cd   : > { %4930 = vpow2.f32 %v2389_v32 }
 0x3ce   : > { %v2391_v4 = vmul.f32 1.442695, %v2323_v12  ;;  %v2393_v46 = vmul.f32 1.442695, %v2324_v31 }
 0x3cf   : > { %v2177_v7 = vpop.permute.xlu0 %2176 }
 0x3d0   : > { %4932 = vpow2.f32 %v2391_v4  ;;  %v2325_v6 = vsub.f32 %v6125_v54, %v2177_v7  ;;  %v2326_v3 = vsub.f32 %v6127_v19, %v2177_v7 }
 0x3d1   : > { %4934 = vpow2.f32 %v2393_v46 }
 0x3d2   : > { %v2395_v50 = vmul.f32 1.442695, %v2325_v6  ;;  %v2397_v27 = vmul.f32 1.442695, %v2326_v3 }
 0x3d3   : > { %v2182_v40 = vpop.permute.xlu0 %2181 }
 0x3d4   : > { %4936 = vpow2.f32 %v2395_v50  ;;  %v2327_v36 = vsub.f32 %v6131_v43, %v2182_v40  ;;  %v2328_v52 = vsub.f32 %v6133_v58, %v2182_v40 }
 0x3d5   : > { %v4925_v14 = vpop.eup %4924  ;;  %4938 = vpow2.f32 %v2397_v27 }
 0x3d6   : > { %v4927_v20 = vpop.eup %4926  ;;  %v2399_v2 = vmul.f32 1.442695, %v2327_v36  ;;  %v2401_v32 = vmul.f32 1.442695, %v2328_v52 }
 0x3d7   : > { %3024 = vmatprep.mubr.f32.mxu0 %v4927_v20  ;;  %v2187_v31 = vpop.permute.xlu0 %2186  ;;  %v6826_v12 = vadd.f32 %v4927_v20, %v4925_v14 }
 0x3d8   : > { %4940 = vpow2.f32 %v2399_v2  ;;  %v2329_v54 = vsub.f32 %v6137_v39, %v2187_v31  ;;  %v2330_v19 = vsub.f32 %v6139_v57, %v2187_v31  ;;  %3025 = vmatmul.mubr.f32.vlgmr.msra.gmra.mxu0 %v4925_v14 }
 0x3d9   : > { %v4929_v8 = vpop.eup %4928  ;;  %4942 = vpow2.f32 %v2401_v32 }
 0x3da   : > { %v4931_v43 = vpop.eup %4930  ;;  %v2403_v10 = vmul.f32 1.442695, %v2329_v54  ;;  %v2405_v58 = vmul.f32 1.442695, %v2330_v19 }
 0x3db   : > { %3029 = vmatprep.mubr.f32.mxu0 %v4931_v43  ;;  %v2192_v61 = vpop.permute.xlu0 %2191  ;;  %v6830_v4 = vadd.f32 %v4931_v43, %v4929_v8 }
 0x3dc   : > { %4944 = vpow2.f32 %v2403_v10  ;;  %v2331_v46 = vsub.f32 %v6143_v59, %v2192_v61  ;;  %v2332_v7 = vsub.f32 %v6145_v35, %v2192_v61  ;;  %3030 = vmatmul.mubr.f32.gmra.mxu0 %v4929_v8 }
 0x3dd   : > { %v4933_v6 = vpop.eup %4932  ;;  %4946 = vpow2.f32 %v2405_v58 }
 0x3de   : > { %v4935_v39 = vpop.eup %4934  ;;  %v2407_v57 = vmul.f32 1.442695, %v2331_v46  ;;  %v2409_v3 = vmul.f32 1.442695, %v2332_v7 }
 0x3df   : > { %3034 = vmatprep.mubr.f32.mxu0 %v4935_v39  ;;  %v2197_v50 = vpop.permute.xlu0 %2196  ;;  %v6834_v27 = vadd.f32 %v4935_v39, %v4933_v6 }
 0x3e0   : > { %4948 = vpow2.f32 %v2407_v57  ;;  %v2333_v40 = vsub.f32 %v6214_v29, %v2197_v50  ;;  %v2334_v36 = vsub.f32 %v6216_v16, %v2197_v50  ;;  %3035 = vmatmul.mubr.f32.gmra.mxu0 %v4933_v6 }
 0x3e1   : > { %v4937_v52 = vpop.eup %4936  ;;  %4950 = vpow2.f32 %v2409_v3 }
 0x3e2   : > { %v4939_v59 = vpop.eup %4938  ;;  %v2411_v35 = vmul.f32 1.442695, %v2333_v40  ;;  %v2413_v14 = vmul.f32 1.442695, %v2334_v36 }
 0x3e3   : > { %3039 = vmatprep.mubr.f32.mxu0 %v4939_v59  ;;  %v2202_v20 = vpop.permute.xlu0 %2201  ;;  %v6838_v2 = vadd.f32 %v4939_v59, %v4937_v52 }
 0x3e4   : > { %4952 = vpow2.f32 %v2411_v35  ;;  %v2335_v32 = vsub.f32 %v6220_v53, %v2202_v20  ;;  %v2336_v31 = vsub.f32 %v6222_v15, %v2202_v20  ;;  %3040 = vmatmul.mubr.f32.gmra.mxu0 %v4937_v52  ;;  %v7775_v15 = vsub.f32 %v6531_v1, %v6539_v25 }
 0x3e5   : > { %v4941_v54 = vpop.eup %4940  ;;  %4954 = vpow2.f32 %v2413_v14  ;;  %v7776_v1 = vsub.f32 %v6543_v48, %v6551_v21  ;;  %v7777_v52 = vsub.f32 %v6555_v62, %v6563_v13  ;;  %v6863_v62 = vld [vmem:[#allocation3 + $0xf0] sm:$0xff] }
 0x3e6   : > { %v4943_v29 = vpop.eup %4942  ;;  %v2415_v16 = vmul.f32 1.442695, %v2335_v32  ;;  %v2417_v19 = vmul.f32 1.442695, %v2336_v31  ;;  %v2109_v46 = vmul.f32 1.442695, %v7775_v15 }
 0x3e7   : > { %3044 = vmatprep.mubr.f32.mxu0 %v4943_v29  ;;  %v2207_v8 = vpop.permute.xlu0 %2206  ;;  %v6842_v43 = vadd.f32 %v4943_v29, %v4941_v54  ;;  %v2111_v25 = vmul.f32 1.442695, %v7776_v1  ;;  %v2113_v59 = vmul.f32 1.442695, %v7777_v52  ;;  %v6878_v15 = vld [vmem:[#allocation3 + $0xf8] sm:$0xff]  ;;  %v7780_v1 = vsub.f32 %v6591_v11, %v6599_v42  ;;  %v7781_v52 = vld [vmem:[#allocation32_spill] sm:$0xff] }
 0x3e8   : > { %4956 = vpow2.f32 %v2415_v16  ;;  %v2337_v10 = vsub.f32 %v6226_v17, %v2207_v8  ;;  %v2338_v58 = vsub.f32 %v6228_v55, %v2207_v8  ;;  %3045 = vmatmul.mubr.f32.gmra.mxu0 %v4941_v54 }
 0x3e9   : > { %v4945_v61 = vpop.eup %4944  ;;  %4958 = vpow2.f32 %v2417_v19  ;;  %v7778_v19 = vsub.f32 %v6569_v38, %v6577_v37 }
 0x3ea   : > { %v4947_v53 = vpop.eup %4946  ;;  %v2419_v7 = vmul.f32 1.442695, %v2337_v10  ;;  %v2421_v6 = vmul.f32 1.442695, %v2338_v58 }
 0x3eb   : > { %3049 = vmatprep.mubr.f32.mxu0 %v4947_v53  ;;  %v2212_v39 = vpop.permute.xlu0 %2211  ;;  %v6849_v57 = vadd.f32 %v4947_v53, %v4945_v61  ;;  %v2115_v8 = vmul.f32 1.442695, %v7778_v19  ;;  %v7779_v53 = vsub.f32 %v6581_v26, %v6589_v33 }
 0x3ec   : > { %4960 = vpow2.f32 %v2419_v7  ;;  %v2339_v3 = vsub.f32 %v6232_v18, %v2212_v39  ;;  %v2340_v17 = vsub.f32 %v6234_v49, %v2212_v39  ;;  %3050 = vmatmul.mubr.f32.gmra.mxu0 %v4945_v61 }
 0x3ed   : > { %v4949_v55 = vpop.eup %4948  ;;  %4962 = vpow2.f32 %v2421_v6 }
 0x3ee   : > { %v4951_v50 = vpop.eup %4950  ;;  %4964 = vpow2.f32 %v2109_v46  ;;  %v2423_v40 = vmul.f32 1.442695, %v2339_v3  ;;  %v2425_v36 = vmul.f32 1.442695, %v2340_v17 }
 0x3ef   : > { %3054 = vmatprep.mubr.f32.mxu0 %v4951_v50  ;;  %v2217_v35 = vpop.permute.xlu0 %2216  ;;  %v6859_v18 = vadd.f32 %v4951_v50, %v4949_v55 }
 0x3f0   : > { %4966 = vpow2.f32 %v2423_v40  ;;  %v2341_v49 = vsub.f32 %v6238_v9, %v2217_v35  ;;  %v2342_v14 = vsub.f32 %v6240_v28, %v2217_v35  ;;  %3055 = vmatmul.mubr.f32.gmra.mxu0 %v4949_v55  ;;  %v7782_v35 = vld [vmem:[#allocation33_spill] sm:$0xff] }
 0x3f1   : > { %v4953_v20 = vpop.eup %4952  ;;  %4968 = vpow2.f32 %v2425_v36 }
 0x3f2   : > { %v4955_v48 = vpop.eup %4954  ;;  %4970 = vpow2.f32 %v2111_v25  ;;  %v2427_v21 = vmul.f32 1.442695, %v2341_v49  ;;  %v2429_v32 = vmul.f32 1.442695, %v2342_v14  ;;  %v2119_v25 = vmul.f32 1.442695, %v7780_v1 }
 0x3f3   : > { %4972 = vpow2.f32 %v2113_v59  ;;  %3059 = vmatprep.mubr.f32.mxu0 %v4955_v48  ;;  %v2222_v13 = vpop.permute.xlu0 %2221  ;;  %v6865_v31 = vadd.f32 %v4955_v48, %v4953_v20 }
 0x3f4   : > { %4974 = vpow2.f32 %v2427_v21  ;;  %v2343_v54 = vsub.f32 %v6244_v51, %v2222_v13  ;;  %v2344_v9 = vsub.f32 %v6246_v23, %v2222_v13  ;;  %3060 = vmatmul.mubr.f32.gmra.mxu0 %v4953_v20  ;;  %v2117_v51 = vmul.f32 1.442695, %v7779_v53  ;;  %v7784_v21 = vld [vmem:[#allocation34_spill] sm:$0xff] }
 0x3f5   : > { %v4957_v28 = vpop.eup %4956  ;;  %4976 = vpow2.f32 %v2429_v32  ;;  %v2027_v29 = vpop.xlane.xlu1 %2026 }
 0x3f6   : > { %v4959_v16 = vpop.eup %4958  ;;  %v2431_v10 = vmul.f32 1.442695, %v2343_v54  ;;  %v2433_v58 = vmul.f32 1.442695, %v2344_v9  ;;  %v6873_v61 = vmax.f32 %v6863_v62, %v2027_v29  ;;  %v7785_v54 = vld [vmem:[#allocation35_spill] sm:$0xff]  ;;  %v7786_v29 = vld [vmem:[#allocation68_spill] sm:$0xff] }
 0x3f7   : > { %3064 = vmatprep.mubr.f32.mxu0 %v4959_v16  ;;  %v2227_v23 = vpop.permute.xlu0 %2226  ;;  %v6880_v46 = vadd.f32 %v4959_v16, %v4957_v28  ;;  %v7787_v16 = vld [vmem:[#allocation69_spill] sm:$0xff] }
 0x3f8   : > { %4978 = vpow2.f32 %v2431_v10  ;;  %3279 = vst.msk [vmem:[#allocation3 + $0xf0] sm:$0xff] %vm925_vm0, %v6873_v61  ;;  %v2345_v37 = vsub.f32 %v6250_v45, %v2227_v23  ;;  %v2346_v7 = vsub.f32 %v6252_v5, %v2227_v23  ;;  %3065 = vmatmul.mubr.f32.gmra.mxu0 %v4957_v28  ;;  %2311 = vperm.xlu0 %4909, %v6873_v61   ;;  %v7789_v23 = vld [vmem:[#allocation36_spill] sm:$0xff] }
 0x3f9   : > { %v4961_v26 = vpop.eup %4960  ;;  %4980 = vpow2.f32 %v2433_v58  ;;  %v2030_v33 = vpop.xlane.xlu1 %2029  ;;  %v7788_v19 = vsub.f32 %v7786_v29, %v7787_v16 }
 0x3fa   : > { %v4963_v6 = vpop.eup %4962  ;;  %4982 = vpow2.f32 %v2115_v8  ;;  %v2435_v39 = vmul.f32 1.442695, %v2345_v37  ;;  %v2437_v3 = vmul.f32 1.442695, %v2346_v7  ;;  %v6890_v17 = vmax.f32 %v6878_v15, %v2030_v33  ;;  %v7790_v7 = vld [vmem:[#allocation37_spill] sm:$0xff] }
 0x3fb   : > { %v6892_v55 = vpop.eup %4964  ;;  %3069 = vmatprep.mubr.f32.mxu0 %v4963_v6  ;;  %v6894_v50 = vadd.f32 %v4963_v6, %v4961_v26  ;;  %4984 = vpow2.f32 %v2117_v51  ;;  %v2121_v8 = vmul.f32 1.442695, %v7788_v19 }
 0x3fc   : > { %3280 = vst.msk [vmem:[#allocation3 + $0xf8] sm:$0xff] %vm925_vm0, %v6890_v17  ;;  %3070 = vmatmul.mubr.f32.gmra.mxu0 %v4961_v26  ;;  %2805 = vperm.xlu0 %4909, %v6892_v55   ;;  %4986 = vpow2.f32 %v2435_v39  ;;  %v7791_v39 = vld [vmem:[#allocation70_spill] sm:$0xff] }
 0x3fd   : > { %v6901_v5 = vpop.eup %4966  ;;  %2316 = vperm.xlu1 %4908, %v6890_v17   ;;  %v2232_v40 = vpop.permute.xlu1 %2231  ;;  %4988 = vpow2.f32 %v2437_v3  ;;  %v7792_v3 = vld [vmem:[#allocation71_spill] sm:$0xff] }
 0x3fe   : > { %v6907_v36 = vpop.eup %4968  ;;  %v2347_v59 = vsub.f32 %v7781_v52, %v2232_v40  ;;  %v2348_v49 = vsub.f32 %v7782_v35, %v2232_v40  ;;  %4990 = vpow2.f32 %v2119_v25  ;;  %v7793_v1 = vsub.f32 %v7791_v39, %v7792_v3 }
 0x3ff   : > { %v6911_v14 = vpop.eup %4970  ;;  %3074 = vmatprep.mubr.f32.mxu0 %v6907_v36  ;;  %v2237_v20 = vpop.permute.xlu0 %2236 }
 0x400   : > { %v6914_v48 = vpop.eup %4972  ;;  %v2439_v42 = vmul.f32 1.442695, %v2347_v59  ;;  %v2441_v11 = vmul.f32 1.442695, %v2348_v49  ;;  %v2349_v32 = vsub.f32 %v7784_v21, %v2237_v20  ;;  %3075 = vmatmul.mubr.f32.gmra.mxu0 %v6901_v5  ;;  %2810 = vperm.xlu0 %4909, %v6911_v14   ;;  %v2350_v9 = vsub.f32 %v7785_v54, %v2237_v20  ;;  %v7794_v49 = vld [vmem:[#allocation38_spill] sm:$0xff]  ;;  %v7798_v54 = vld [vmem:[#allocation73_spill] sm:$0xff] }
 0x401   : > { %7783 = vst [vmem:[#allocation32_spill] sm:$0xff] %v6914_v48  ;;  %v4975_v13 = vpop.eup %4974  ;;  %v2123_v25 = vmul.f32 1.442695, %v7793_v1 }
 0x402   : > { %v4977_v28 = vpop.eup %4976  ;;  %4992 = vpow2.f32 %v2439_v42  ;;  %v2443_v10 = vmul.f32 1.442695, %v2349_v32  ;;  %v2445_v58 = vmul.f32 1.442695, %v2350_v9  ;;  %v7795_v42 = vld [vmem:[#allocation39_spill] sm:$0xff] }
 0x403   : > { %4994 = vpow2.f32 %v2441_v11  ;;  %3079 = vmatprep.mubr.f32.mxu0 %v4977_v28  ;;  %v2242_v53 = vpop.permute.xlu0 %2241  ;;  %v6923_v51 = vadd.f32 %v4977_v28, %v4975_v13 }
 0x404   : > { %4996 = vpow2.f32 %v2443_v10  ;;  %v2351_v37 = vsub.f32 %v7789_v23, %v2242_v53  ;;  %v2352_v26 = vsub.f32 %v7790_v7, %v2242_v53  ;;  %3080 = vmatmul.mubr.f32.gmra.mxu0 %v4975_v13  ;;  %2815 = vperm.xlu0 %4909, %v6914_v48   ;;  %v7797_v13 = vld [vmem:[#allocation72_spill] sm:$0xff]  ;;  %v7801_v53 = vld [vmem:[#allocation41_spill] sm:$0xff] }
 0x405   : > { %v6928_v33 = vpop.eup %4978  ;;  %4998 = vpow2.f32 %v2445_v58  ;;  %v7799_v9 = vsub.f32 %v7797_v13, %v7798_v54  ;;  %v7800_v10 = vld [vmem:[#allocation40_spill] sm:$0xff] }
 0x406   : > { %v6930_v6 = vpop.eup %4980  ;;  %5000 = vpow2.f32 %v2121_v8  ;;  %v2449_v40 = vmul.f32 1.442695, %v2352_v26  ;;  %v2447_v59 = vmul.f32 1.442695, %v2351_v37 }
 0x407   : > { %v6935_v52 = vpop.eup %4982  ;;  %3084 = vmatprep.mubr.f32.mxu0 %v6930_v6  ;;  %v2247_v35 = vpop.permute.xlu0 %2246  ;;  %v2125_v28 = vmul.f32 1.442695, %v7799_v9 }
 0x408   : > { %v2353_v20 = vsub.f32 %v7794_v49, %v2247_v35  ;;  %v2354_v11 = vsub.f32 %v7795_v42, %v2247_v35  ;;  %3085 = vmatmul.mubr.f32.gmra.mxu0 %v6928_v33  ;;  %2820 = vperm.xlu0 %4909, %v6935_v52   ;;  %v6942_v21 = vpop.eup %4984  ;;  %5002 = vpow2.f32 %v2449_v40  ;;  %v7802_v40 = vld [vmem:[#allocation42_spill] sm:$0xff]  ;;  %v7803_v35 = vld [vmem:[#allocation43_spill] sm:$0xff] }
 0x409   : > { %7796 = vst [vmem:[#allocation33_spill] sm:$0xff] %v6942_v21  ;;  %v4987_v32 = vpop.eup %4986  ;;  %5004 = vpow2.f32 %v2123_v25 }
 0x40a   : > { %v2451_v29 = vmul.f32 1.442695, %v2353_v20  ;;  %v2453_v16 = vmul.f32 1.442695, %v2354_v11  ;;  %v4989_v19 = vpop.eup %4988  ;;  %5006 = vpow2.f32 %v2447_v59 }
 0x40b   : > { %v2252_v8 = vpop.permute.xlu0 %2251  ;;  %3089 = vmatprep.mubr.f32.mxu0 %v4989_v19  ;;  %v6950_v37 = vadd.f32 %v4989_v19, %v4987_v32  ;;  %v6952_v7 = vpop.eup %4990 }
 0x40c   : > { %5008 = vpow2.f32 %v2451_v29  ;;  %v2355_v58 = vsub.f32 %v7800_v10, %v2252_v8  ;;  %v2356_v23 = vsub.f32 %v7801_v53, %v2252_v8  ;;  %2825 = vperm.xlu0 %4909, %v6942_v21   ;;  %3090 = vmatmul.mubr.f32.gmra.mxu0 %v4987_v32  ;;  %v7827_v21 = vld [vmem:[#allocation61_spill] sm:$0xff] }
 0x40d   : > { %5010 = vpow2.f32 %v2453_v16  ;;  %v7806_v16 = vld [vmem:[#allocation45_spill] sm:$0xff] }
 0x40e   : > { %5012 = vpow2.f32 %v2125_v28  ;;  %v2457_v26 = vmul.f32 1.442695, %v2356_v23  ;;  %v2455_v3 = vmul.f32 1.442695, %v2355_v58  ;;  %v7805_v28 = vld [vmem:[#allocation44_spill] sm:$0xff] }
 0x40f   : > { %v6954_v39 = vpop.eup %4992  ;;  %v2257_v1 = vpop.permute.xlu1 %2256 }
 0x410   : > { %v6956_v25 = vpop.eup %4994  ;;  %v2357_v59 = vsub.f32 %v7802_v40, %v2257_v1  ;;  %v2358_v49 = vsub.f32 %v7803_v35, %v2257_v1  ;;  %2830 = vperm.xlu0 %4909, %v6952_v7   ;;  %5014 = vpow2.f32 %v2457_v26  ;;  %v7808_v1 = vld [vmem:[#allocation46_spill] sm:$0xff] }
 0x411   : > { %v4997_v20 = vpop.eup %4996  ;;  %3094 = vmatprep.mubr.f32.mxu0 %v6956_v25  ;;  %5016 = vpow2.f32 %v2455_v3 }
 0x412   : > { %v4999_v42 = vpop.eup %4998  ;;  %v2459_v11 = vmul.f32 1.442695, %v2357_v59  ;;  %v2461_v32 = vmul.f32 1.442695, %v2358_v49  ;;  %3095 = vmatmul.mubr.f32.gmra.mxu0 %v6954_v39  ;;  %v7809_v59 = vld [vmem:[#allocation47_spill] sm:$0xff] }
 0x413   : > { %v6963_v13 = vpop.eup %5000  ;;  %3099 = vmatprep.mubr.f32.mxu0 %v4999_v42  ;;  %v2262_v54 = vpop.permute.xlu0 %2261  ;;  %v6965_v9 = vadd.f32 %v4999_v42, %v4997_v20 }
 0x414   : > { %7804 = vst [vmem:[#allocation34_spill] sm:$0xff] %v6963_v13  ;;  %5018 = vpow2.f32 %v2459_v11  ;;  %v2359_v29 = vsub.f32 %v7805_v28, %v2262_v54  ;;  %v2360_v19 = vsub.f32 %v7806_v16, %v2262_v54  ;;  %2835 = vperm.xlu0 %4909, %v6963_v13   ;;  %v7812_v16 = vld [vmem:[#allocation48_spill] sm:$0xff]  ;;  %v7823_v13 = vld [vmem:[#allocation57_spill] sm:$0xff] }
 0x415   : > { %5020 = vpow2.f32 %v2461_v32  ;;  %v6970_v8 = vpop.eup %5002 }
 0x416   : > { %v2465_v10 = vmul.f32 1.442695, %v2360_v19  ;;  %3100 = vmatmul.mubr.f32.gmra.mxu0 %v4997_v20  ;;  %v6972_v58 = vpop.eup %5004  ;;  %v2463_v53 = vmul.f32 1.442695, %v2359_v29 }
 0x417   : > { %3104 = vmatprep.mubr.f32.mxu0 %v6970_v8  ;;  %v6975_v23 = vpop.permute.xlu0 %2775  ;;  %v2267_v26 = vpop.permute.xlu1 %2266 }
 0x418   : > { %7807 = vst [vmem:[#allocation35_spill] sm:$0xff] %v6975_v23  ;;  %v6977_v3 = vpop.eup %5006  ;;  %v2361_v40 = vsub.f32 %v7808_v1, %v2267_v26  ;;  %v2362_v35 = vsub.f32 %v7809_v59, %v2267_v26  ;;  %2840 = vperm.xlu0 %4909, %v6972_v58   ;;  %5022 = vpow2.f32 %v2465_v10  ;;  %v7813_v26 = vld [vmem:[#allocation49_spill] sm:$0xff] }
 0x419   : > { %v5009_v49 = vpop.eup %5008  ;;  %5024 = vpow2.f32 %v2463_v53 }
 0x41a   : > { %v5011_v42 = vpop.eup %5010  ;;  %v2467_v20 = vmul.f32 1.442695, %v2361_v40  ;;  %v2469_v11 = vmul.f32 1.442695, %v2362_v35  ;;  %3105 = vmatmul.mubr.f32.gmra.mxu0 %v6977_v3 }
 0x41b   : > { %v6983_v32 = vpop.eup %5012  ;;  %3109 = vmatprep.mubr.f32.mxu0 %v5011_v42  ;;  %v2272_v54 = vpop.permute.xlu0 %2271  ;;  %v6987_v29 = vadd.f32 %v5011_v42, %v5009_v49 }
 0x41c   : > { %7810 = vst [vmem:[#allocation68_spill] sm:$0xff] %v6983_v32  ;;  %v6985_v28 = vpop.permute.xlu1 %2770  ;;  %5026 = vpow2.f32 %v2467_v20  ;;  %v2363_v19 = vsub.f32 %v7812_v16, %v2272_v54  ;;  %v2364_v1 = vsub.f32 %v7813_v26, %v2272_v54  ;;  %2845 = vperm.xlu0 %4909, %v6983_v32   ;;  %v7815_v20 = vld [vmem:[#allocation50_spill] sm:$0xff]  ;;  %v7816_v16 = vld [vmem:[#allocation51_spill] sm:$0xff]  ;;  %v7822_v32 = vld [vmem:[#allocation56_spill] sm:$0xff] }
 0x41d   : > { %7811 = vst [vmem:[#allocation69_spill] sm:$0xff] %v6985_v28  ;;  %5028 = vpow2.f32 %v2469_v11  ;;  %v6992_v10 = vpop.eup %5014 }
 0x41e   : > { %v2473_v40 = vmul.f32 1.442695, %v2364_v1  ;;  %3110 = vmatmul.mubr.f32.gmra.mxu0 %v5009_v49  ;;  %v2471_v59 = vmul.f32 1.442695, %v2363_v19  ;;  %v6997_v42 = vpop.eup %5016 }
 0x41f   : > { %3114 = vmatprep.mubr.f32.mxu0 %v6992_v10  ;;  %v6995_v53 = vpop.permute.xlu0 %2785 }
 0x420   : > { %7814 = vst [vmem:[#allocation36_spill] sm:$0xff] %v6995_v53  ;;  %v2277_v35 = vpop.permute.xlu1 %2276  ;;  %5030 = vpow2.f32 %v2473_v40 }
 0x421   : > { %v2365_v45 = vsub.f32 %v7815_v20, %v2277_v35  ;;  %v2366_v38 = vsub.f32 %v7816_v16, %v2277_v35  ;;  %v5019_v54 = vpop.eup %5018  ;;  %2579 = vadd.xlane.f32.xlu1 %v6830_v4  ;;  %5032 = vpow2.f32 %v2471_v59  ;;  %v7818_v20 = vld [vmem:[#allocation52_spill] sm:$0xff]  ;;  %v7819_v35 = vld [vmem:[#allocation53_spill] sm:$0xff] }
 0x422   : > { %v5021_v11 = vpop.eup %5020  ;;  %3115 = vmatmul.mubr.f32.gmra.mxu0 %v6997_v42 }
 0x423   : > { %v2475_v26 = vmul.f32 1.442695, %v2365_v45  ;;  %v2477_v1 = vmul.f32 1.442695, %v2366_v38  ;;  %3119 = vmatprep.mubr.f32.mxu0 %v5021_v11  ;;  %v2282_v49 = vpop.permute.xlu0 %2281  ;;  %v7005_v53 = vadd.f32 %v5021_v11, %v5019_v54 }
 0x424   : > { %v7003_v19 = vpop.permute.xlu1 %2780  ;;  %v2367_v23 = vsub.f32 %v7818_v20, %v2282_v49  ;;  %v2368_v16 = vsub.f32 %v7819_v35, %v2282_v49  ;;  %v7821_v20 = vld [vmem:[#allocation55_spill] sm:$0xff] }
 0x425   : > { %7817 = vst [vmem:[#allocation37_spill] sm:$0xff] %v7003_v19  ;;  %5034 = vpow2.f32 %v2475_v26  ;;  %2588 = vadd.xlane.f32.xlu1 %v6842_v43  ;;  %v7010_v4 = vpop.eup %5022  ;;  %v7820_v26 = vld [vmem:[#allocation54_spill] sm:$0xff] }
 0x426   : > { %5036 = vpow2.f32 %v2477_v1  ;;  %v2481_v38 = vmul.f32 1.442695, %v2368_v16  ;;  %3120 = vmatmul.mubr.f32.gmra.mxu0 %v5019_v54  ;;  %v7015_v59 = vpop.eup %5024  ;;  %v2479_v11 = vmul.f32 1.442695, %v2367_v23 }
 0x427   : > { %3124 = vmatprep.mubr.f32.mxu0 %v7010_v4  ;;  %v7013_v45 = vpop.permute.xlu0 %2790 }
 0x428   : > { %v2287_v40 = vpop.permute.xlu1 %2286  ;;  %5038 = vpow2.f32 %v2481_v38 }
 0x429   : > { %v2369_v19 = vsub.f32 %v7820_v26, %v2287_v40  ;;  %v2370_v28 = vsub.f32 %v7821_v20, %v2287_v40  ;;  %v5027_v49 = vpop.eup %5026  ;;  %2594 = vadd.xlane.f32.xlu1 %v6859_v18  ;;  %5040 = vpow2.f32 %v2479_v11  ;;  %v2605_v11 = vadd.f32 %v6907_v36, %v6901_v5 }
 0x42a   : > { %v5029_v43 = vpop.eup %5028  ;;  %3125 = vmatmul.mubr.f32.gmra.mxu0 %v7015_v59  ;;  %v2611_v5 = vadd.f32 %v6930_v6, %v6928_v33  ;;  %v7828_v6 = vld [vmem:[#allocation62_spill] sm:$0xff] }
 0x42b   : > { %v2485_v1 = vmul.f32 1.442695, %v2370_v28  ;;  %3129 = vmatprep.mubr.f32.mxu0 %v5029_v43  ;;  %v2292_v54 = vpop.permute.xlu0 %2291  ;;  %v7021_v35 = vadd.f32 %v5029_v43, %v5027_v49  ;;  %v2483_v16 = vmul.f32 1.442695, %v2369_v19  ;;  %v7825_v43 = vld [vmem:[#allocation59_spill] sm:$0xff] }
 0x42c   : > { %v2371_v23 = vsub.f32 %v7822_v32, %v2292_v54  ;;  %v2372_v26 = vsub.f32 %v7823_v13, %v2292_v54  ;;  %v7824_v13 = vld [vmem:[#allocation58_spill] sm:$0xff] }
 0x42d   : > { %5042 = vpow2.f32 %v2485_v1  ;;  %2600 = vadd.xlane.f32.xlu1 %v6880_v46  ;;  %v7026_v38 = vpop.eup %5030 }
 0x42e   : > { %v2489_v18 = vmul.f32 1.442695, %v2372_v26  ;;  %3130 = vmatmul.mubr.f32.gmra.mxu0 %v5027_v49  ;;  %v7033_v19 = vpop.eup %5032  ;;  %5044 = vpow2.f32 %v2483_v16  ;;  %v2487_v32 = vmul.f32 1.442695, %v2371_v23  ;;  %v7826_v23 = vld [vmem:[#allocation60_spill] sm:$0xff] }
 0x42f   : > { %3134 = vmatprep.mubr.f32.mxu0 %v7026_v38  ;;  %v7029_v28 = vpop.permute.xlu0 %2795  ;;  %v2297_v40 = vpop.permute.xlu1 %2296 }
 0x430   : > { %v2373_v20 = vsub.f32 %v7824_v13, %v2297_v40  ;;  %v2374_v46 = vsub.f32 %v7825_v43, %v2297_v40  ;;  %5046 = vpow2.f32 %v2489_v18 }
 0x431   : > { %2606 = vadd.xlane.f32.xlu1 %v2605_v11  ;;  %5048 = vpow2.f32 %v2487_v32  ;;  %v7829_v32 = vld [vmem:[#allocation63_spill] sm:$0xff] }
 0x432   : > { %v5035_v1 = vpop.eup %5034  ;;  %v2493_v54 = vmul.f32 1.442695, %v2374_v46  ;;  %3135 = vmatmul.mubr.f32.gmra.mxu0 %v7033_v19  ;;  %v2491_v16 = vmul.f32 1.442695, %v2373_v20  ;;  %v2617_v46 = vadd.f32 %v6956_v25, %v6954_v39 }
 0x433   : > { %v5037_v49 = vpop.eup %5036  ;;  %v2302_v26 = vpop.permute.xlu0 %2301 }
 0x434   : > { %3139 = vmatprep.mubr.f32.mxu0 %v5037_v49  ;;  %v7040_v36 = vadd.f32 %v5037_v49, %v5035_v1  ;;  %v2375_v13 = vsub.f32 %v7826_v23, %v2302_v26  ;;  %v2376_v40 = vsub.f32 %v7827_v21, %v2302_v26  ;;  %5050 = vpow2.f32 %v2493_v54 }
 0x435   : > { %2612 = vadd.xlane.f32.xlu1 %v2611_v5  ;;  %v5039_v18 = vpop.eup %5038  ;;  %5052 = vpow2.f32 %v2491_v16  ;;  %v2629_v5 = vadd.f32 %v6997_v42, %v6992_v10 }
 0x436   : > { %v2497_v11 = vmul.f32 1.442695, %v2376_v40  ;;  %3140 = vmatmul.mubr.f32.gmra.mxu0 %v5035_v1  ;;  %v2495_v33 = vmul.f32 1.442695, %v2375_v13  ;;  %v5041_v48 = vpop.eup %5040  ;;  %v2623_v1 = vadd.f32 %v6977_v3, %v6970_v8  ;;  %v2635_v8 = vadd.f32 %v7015_v59, %v7010_v4  ;;  %v7830_v59 = vld [vmem:[#allocation64_spill] sm:$0xff] }
 0x437   : > { %3144 = vmatprep.mubr.f32.mxu0 %v5039_v18  ;;  %v2307_v43 = vpop.permute.xlu1 %2306 }
 0x438   : > { %v2377_v49 = vsub.f32 %v7828_v6, %v2307_v43  ;;  %v2378_v20 = vsub.f32 %v7829_v32, %v2307_v43  ;;  %5054 = vpow2.f32 %v2497_v11 }
 0x439   : > { %2618 = vadd.xlane.f32.xlu1 %v2617_v46  ;;  %5056 = vpow2.f32 %v2495_v33 }
 0x43a   : > { %v5043_v21 = vpop.eup %5042  ;;  %v2501_v54 = vmul.f32 1.442695, %v2378_v20  ;;  %3145 = vmatmul.mubr.f32.gmra.mxu0 %v5041_v48  ;;  %v2499_v39 = vmul.f32 1.442695, %v2377_v49 }
 0x43b   : > { %3149 = vmatprep.mubr.f32.mxu0 %v5043_v21  ;;  %2576 = vadd.xlane.f32.xlu0 %v6826_v12  ;;  %v5045_v25 = vpop.eup %5044 }
 0x43c   : > { %5058 = vpow2.f32 %v2501_v54 }
 0x43d   : > { %2624 = vadd.xlane.f32.xlu1 %v2623_v1  ;;  %v5047_v26 = vpop.eup %5046  ;;  %5060 = vpow2.f32 %v2499_v39  ;;  %v7834_v1 = vld [vmem:[#allocation74_spill] sm:$0xff] }
 0x43e   : > { %3150 = vmatmul.mubr.f32.gmra.mxu0 %v5045_v25  ;;  %v5049_v16 = vpop.eup %5048  ;;  %v7835_v39 = vsub.f32 %v6631_v30, %v7834_v1  ;;  %v7839_v30 = vsub.f32 %v6668_v41, %v6676_v47  ;;  %v7841_v47 = vld [vmem:[#allocation76_spill] sm:$0xff] }
 0x43f   : > { %3154 = vmatprep.mubr.f32.mxu0 %v5047_v26  ;;  %2582 = vadd.xlane.f32.xlu0 %v6834_v27  ;;  %v2641_v27 = vadd.f32 %v7033_v19, %v7026_v38  ;;  %v2653_v4 = vadd.f32 %v5049_v16, %v5047_v26  ;;  %v7847_v1 = vld [vmem:[#allocation80_spill] sm:$0xff] }
 0x441   : > { %2630 = vadd.xlane.f32.xlu1 %v2629_v5  ;;  %v5051_v12 = vpop.eup %5050  ;;  %v7836_v5 = vld [vmem:[#allocation75_spill] sm:$0xff] }
 0x442   : > { %3155 = vmatmul.mubr.f32.gmra.mxu0 %v5049_v16  ;;  %v5053_v3 = vpop.eup %5052  ;;  %v7837_v16 = vsub.f32 %v6643_v60, %v7836_v5 }
 0x443   : > { %3159 = vmatprep.mubr.f32.mxu0 %v5051_v12  ;;  %2585 = vadd.xlane.f32.xlu0 %v6838_v2  ;;  %v2647_v2 = vadd.f32 %v5041_v48, %v5039_v18  ;;  %v2656_v48 = vadd.f32 %v5053_v3, %v5051_v12  ;;  %v7833_v18 = vld [vmem:[#allocation67_spill] sm:$0xff] }
 0x444   : > { %v2129_v12 = vmul.f32 1.442695, %v7837_v16 }
 0x445   : > { %2636 = vadd.xlane.f32.xlu1 %v2635_v8  ;;  %v5055_v23 = vpop.eup %5054 }
 0x446   : > { %3160 = vmatmul.mubr.f32.gmra.mxu0 %v5053_v3  ;;  %v5057_v10 = vpop.eup %5056  ;;  %v7838_v3 = vsub.f32 %v6653_v24, %v6666_v22  ;;  %v7840_v24 = vsub.f32 %v6678_v63, %v6689_v0  ;;  %v2512_v63 = vld [vmem:[#allocation4 + $0x8] sm:$0xff] }
 0x447   : > { %3164 = vmatprep.mubr.f32.mxu0 %v5055_v23  ;;  %2591 = vadd.xlane.f32.xlu0 %v6849_v57  ;;  %v2659_v57 = vadd.f32 %v5057_v10, %v5055_v23 }
 0x448   : > { %v2131_v23 = vmul.f32 1.442695, %v7838_v3  ;;  %v2135_v22 = vmul.f32 1.442695, %v7840_v24 }
 0x449   : > { %2642 = vadd.xlane.f32.xlu1 %v2641_v27  ;;  %v5059_v42 = vpop.eup %5058 }
 0x44a   : > { %3165 = vmatmul.mubr.f32.gmra.mxu0 %v5057_v10  ;;  %v5061_v13 = vpop.eup %5060 }
 0x44b   : > { %3169 = vmatprep.mubr.f32.mxu0 %v5059_v42  ;;  %2597 = vadd.xlane.f32.xlu0 %v6865_v31  ;;  %v2650_v31 = vadd.f32 %v5045_v25, %v5043_v21  ;;  %v2127_v25 = vmul.f32 1.442695, %v7835_v39 }
 0x44d   : > { %2648 = vadd.xlane.f32.xlu1 %v2647_v2  ;;  %v2133_v2 = vmul.f32 1.442695, %v7839_v30  ;;  %v3584_v30 = vld [vmem:[#allocation17 + $0x60] sm:$0xff] }
 0x44e   : > { %3170 = vmatmul.mubr.f32.gmra.mxu0 %v5061_v13 }
 0x44f   : > { %2603 = vadd.xlane.f32.xlu0 %v6894_v50  ;;  %v7069_v50 = vpop.permute.xlu0 %2800 }
 0x450   : > { %v2934_v3 = vmul.f32 0.0, %v7069_v50  ;;  %v2519_v50 = vld [vmem:[#allocation4 + $0x40] sm:$0xff] }
 0x451   : > { %2654 = vadd.xlane.f32.xlu1 %v2653_v4 }
 0x453   : > { %2609 = vadd.xlane.f32.xlu0 %v6923_v51 }
 0x455   : > { %2660 = vadd.xlane.f32.xlu1 %v2659_v57 }
 0x457   : > { %2615 = vadd.xlane.f32.xlu0 %v6950_v37  ;;  %v7831_v37 = vld [vmem:[#allocation65_spill] sm:$0xff] }
 0x45b   : > { %2621 = vadd.xlane.f32.xlu0 %v6965_v9  ;;  %v2662_v9 = vadd.f32 %v5061_v13, %v5059_v42 }
 0x45f   : > { %2627 = vadd.xlane.f32.xlu0 %v6987_v29 }
 0x463   : > { %2633 = vadd.xlane.f32.xlu0 %v7005_v53 }
 0x467   : > { %2639 = vadd.xlane.f32.xlu0 %v7021_v35  ;;  %v7832_v35 = vld [vmem:[#allocation66_spill] sm:$0xff] }
 0x46b   : > { %2645 = vadd.xlane.f32.xlu0 %v7040_v36 }
 0x46f   : > { %2651 = vadd.xlane.f32.xlu0 %v2650_v31  ;;  %v3587_v31 = vld [vmem:[#allocation17 + $0x78] sm:$0xff] }
 0x470   : > { %4708 = vmatprep.subr.mxu1 %v3587_v31 }
 0x471   : > { %4709 = vmatpush3.msra.mxu1 %v3587_v31 }
 0x473   : > { %v2312_v51 = vpop.permute.xlu0 %2311  ;;  %2657 = vadd.xlane.f32.xlu0 %v2656_v48  ;;  %v3586_v48 = vld [vmem:[#allocation17 + $0x70] sm:$0xff] }
 0x474   : > { %v2379_v38 = vsub.f32 %v7830_v59, %v2312_v51  ;;  %v2380_v19 = vsub.f32 %v7831_v37, %v2312_v51  ;;  %4710 = vmatprep.subr.mxu1 %v3586_v48  ;;  %v7842_v59 = vsub.f32 %v6691_v44, %v7841_v47  ;;  %v7844_v44 = vsub.f32 %v6706_v56, %v6715_v34  ;;  %v7845_v56 = vld [vmem:[#allocation87_spill] sm:$0xff] }
 0x475   : > { %4711 = vmatpush3.msra.mxu1 %v3586_v48 }
 0x476   : > { %v2503_v40 = vmul.f32 1.442695, %v2379_v38  ;;  %v2505_v29 = vmul.f32 1.442695, %v2380_v19  ;;  %v2137_v38 = vmul.f32 1.442695, %v7842_v59 }
 0x477   : > { %2663 = vadd.xlane.f32.xlu0 %v2662_v9  ;;  %v7075_v54 = vpop.permute.xlu0 %2805  ;;  %v2932_v19 = vmul.f32 0.0, %v7013_v45 }
 0x478   : > { %5062 = vpow2.f32 %v2503_v40  ;;  %v2317_v53 = vpop.permute.xlu1 %2316 }
 0x479   : > { %5064 = vpow2.f32 %v2505_v29  ;;  %v2381_v36 = vsub.f32 %v7832_v35, %v2317_v53  ;;  %v2382_v11 = vsub.f32 %v7833_v18, %v2317_v53  ;;  %v3585_v29 = vld [vmem:[#allocation17 + $0x68] sm:$0xff]  ;;  %v2139_v18 = vmul.f32 1.442695, %v7844_v44  ;;  %v7854_v44 = vld [vmem:[#allocation86_spill] sm:$0xff] }
 0x47a   : > { %v7843_v35 = vld [vmem:[#allocation77_spill] sm:$0xff]  ;;  %4712 = vmatprep.subr.mxu1 %v3585_v29 }
 0x47b   : > { %v2507_v43 = vmul.f32 1.442695, %v2381_v36  ;;  %v2509_v46 = vmul.f32 1.442695, %v2382_v11  ;;  %v7080_v26 = vpop.permute.xlu0 %2810  ;;  %v2544_v36 = vmul.f32 %v7843_v35, %v2512_v63  ;;  %4713 = vmatpush3.msra.mxu1 %v3585_v29  ;;  %v2551_v35 = vmul.f32 %v6911_v14, %v2519_v50  ;;  %v2525_v50 = vld [vmem:[#allocation4 + $0x70] sm:$0xff] }
 0x47c   : > { %4714 = vmatprep.subr.mxu1 %v3584_v30 }
 0x47d   : > { %5066 = vpow2.f32 %v2507_v43  ;;  %4715 = vmatpush3.msra.mxu1 %v3584_v30 }
 0x47e   : > { %5068 = vpow2.f32 %v2509_v46  ;;  %v2515_v46 = vld [vmem:[#allocation4 + $0x20] sm:$0xff] }
 0x47f   : > { %5070 = vpow2.f32 %v2127_v25  ;;  %v7090_v10 = vpop.permute.xlu0 %2815  ;;  %v2547_v34 = vmul.f32 %v7845_v56, %v2515_v46 }
 0x480   : > { %5072 = vpow2.f32 %v2129_v12 }
 0x481   : > { %5074 = vpow2.f32 %v2131_v23 }
 0x482   : > { %5076 = vpow2.f32 %v2133_v2 }
 0x483   : > { %v7099_v4 = vpop.permute.xlu0 %2820  ;;  %5078 = vpow2.f32 %v2135_v22  ;;  %v7850_v22 = vld [vmem:[#allocation82_spill] sm:$0xff] }
 0x484   : > { %5080 = vpow2.f32 %v2137_v38 }
 0x485   : > { %v5063_v33 = vpop.eup %5062  ;;  %5082 = vpow2.f32 %v2139_v18 }
 0x486   : > { %v5065_v6 = vpop.eup %5064 }
 0x487   : > { %3174 = vmatprep.mubr.f32.mxu0 %v5065_v6  ;;  %v2665_v49 = vadd.f32 %v5065_v6, %v5063_v33  ;;  %v7115_v9 = vpop.permute.xlu0 %2825 }
 0x488   : > { %3175 = vmatmul.mubr.f32.gmra.mxu0 %v5063_v33  ;;  %v2933_v33 = vmul.f32 0.0, %v7029_v28  ;;  %v2517_v28 = vld [vmem:[#allocation4 + $0x30] sm:$0xff] }
 0x489   : > { %2666 = vadd.xlane.f32.xlu1 %v2665_v49 }
 0x48a   : > { %v5067_v32 = vpop.eup %5066 }
 0x48b   : > { %v5069_v20 = vpop.eup %5068 }
 0x48c   : > { %3179 = vmatprep.mubr.f32.mxu0 %v5069_v20  ;;  %v2668_v21 = vadd.f32 %v5069_v20, %v5067_v32  ;;  %v7104_v51 = vpop.eup %5070 }
 0x48d   : > { %3180 = vmatmul.mubr.f32.gmra.mxu0 %v5067_v32  ;;  %v7112_v0 = vpop.eup %5072  ;;  %v7128_v32 = vpop.permute.xlu0 %2830 }
 0x48e   : > { %2669 = vadd.xlane.f32.xlu0 %v2668_v21  ;;  %v7124_v45 = vpop.eup %5074  ;;  %v7846_v21 = vld [vmem:[#allocation79_spill] sm:$0xff] }
 0x48f   : > { %v7848_v39 = vsub.f32 %v7846_v21, %v7847_v1  ;;  %v7137_v12 = vpop.eup %5076 }
 0x490   : > { %v7148_v38 = vpop.eup %5078 }
 0x491   : > { %v2141_v25 = vmul.f32 1.442695, %v7848_v39  ;;  %v7151_v63 = vpop.permute.xlu0 %2835  ;;  %v7856_v39 = vld [vmem:[#allocation88_spill] sm:$0xff] }
 0x493   : > { %5084 = vpow2.f32 %v2141_v25  ;;  %v7857_v25 = vld [vmem:[#allocation89_spill] sm:$0xff] }
 0x495   : > { %v7165_v21 = vpop.permute.xlu0 %2840 }
 0x498   : > { %v7085_v8 = vpop.f32.mrf.mxu0 }
 0x49a   : > { %v3028_v27 = vpop.f32.mrf.mxu0 }
 0x49c   : > { %v7092_v42 = vpop.f32.mrf.mxu0 }
 0x49e   : > { %v3033_v13 = vpop.f32.mrf.mxu0 }
 0x49f   : > { %v7849_v13 = vld [vmem:[#allocation97_spill] sm:$0xff] }
 0x4a0   : > { %v7097_v60 = vpop.f32.mrf.mxu0  ;;  %v2549_v24 = vmul.f32 %v7849_v13, %v2517_v28 }
 0x4a2   : > { %v3038_v57 = vpop.f32.mrf.mxu0 }
 0x4a3   : > { %v7851_v57 = vld [vmem:[#allocation83_spill] sm:$0xff] }
 0x4a4   : > { %2850 = vperm.xlu0 %4909, %v7104_v51   ;;  %v7107_v41 = vpop.f32.mrf.mxu0  ;;  %v7852_v31 = vsub.f32 %v7850_v22, %v7851_v57  ;;  %v7859_v22 = vld [vmem:[#allocation90_spill] sm:$0xff]  ;;  %v7860_v57 = vld [vmem:[#allocation91_spill] sm:$0xff] }
 0x4a6   : > { %v3043_v37 = vpop.f32.mrf.mxu0  ;;  %v2143_v48 = vmul.f32 1.442695, %v7852_v31  ;;  %v7861_v31 = vsub.f32 %v7859_v22, %v7860_v57  ;;  %v2529_v57 = vld [vmem:[#allocation4 + $0x90] sm:$0xff] }
 0x4a7   : > { %v2935_v37 = vmul.f32 0.0, %v7075_v54  ;;  %v2521_v54 = vld [vmem:[#allocation4 + $0x50] sm:$0xff] }
 0x4a8   : > { %2855 = vperm.xlu0 %4909, %v7112_v0   ;;  %v3046_v40 = vpop.f32.mrf.mxu0  ;;  %5086 = vpow2.f32 %v2143_v48  ;;  %v2553_v1 = vmul.f32 %v6935_v52, %v2521_v54  ;;  %v2149_v48 = vmul.f32 1.442695, %v7861_v31 }
 0x4a9   : > { %v7118_v53 = vadd.f32 %v3046_v40, %v2932_v19 }
 0x4aa   : > { %v3048_v11 = vpop.f32.mrf.mxu0  ;;  %v2580_v43 = vpop.xlane.xlu1 %2579 }
 0x4ab   : > { %v2672_v6 = vadd.f32 %v2580_v43, %v2544_v36  ;;  %v7853_v36 = vld [vmem:[#allocation85_spill] sm:$0xff] }
 0x4ac   : > { %2860 = vperm.xlu0 %4909, %v7124_v45   ;;  %v3051_v49 = vpop.f32.mrf.mxu0  ;;  %v7855_v18 = vsub.f32 %v7853_v36, %v7854_v44  ;;  %v2511_v36 = vld [vmem:[#allocation4] sm:$0xff] }
 0x4ad   : > { %2705 = vst.msk [vmem:[#allocation4 + $0x8] sm:$0xff] %vm925_vm0, %v2672_v6  ;;  %v7131_v20 = vadd.f32 %v3051_v49, %v2933_v33  ;;  %v7161_v33 = vpop.eup %5080  ;;  %v2936_v6 = vmul.f32 0.0, %v7080_v26 }
 0x4ae   : > { %v3053_v5 = vpop.f32.mrf.mxu0  ;;  %v2589_v16 = vpop.xlane.xlu1 %2588  ;;  %v2145_v11 = vmul.f32 1.442695, %v7855_v18  ;;  %v2557_v18 = vmul.f32 %v6972_v58, %v2525_v50 }
 0x4af   : > { %v2675_v23 = vadd.f32 %v2589_v16, %v2547_v34  ;;  %v3583_v34 = vld [vmem:[#allocation17 + $0x58] sm:$0xff]  ;;  %v7858_v5 = vsub.f32 %v7856_v39, %v7857_v25  ;;  %v7865_v39 = vld [vmem:[#allocation78_spill] sm:$0xff] }
 0x4b0   : > { %2865 = vperm.xlu0 %4909, %v7137_v12   ;;  %v3056_v27 = vpop.f32.mrf.mxu0  ;;  %4716 = vmatprep.subr.mxu1 %v3583_v34  ;;  %5088 = vpow2.f32 %v2145_v11  ;;  %v7862_v11 = vld [vmem:[#allocation93_spill] sm:$0xff]  ;;  %v2543_v25 = vmul.f32 %v7865_v39, %v2511_v36 }
 0x4b1   : > { %2708 = vst.msk [vmem:[#allocation4 + $0x20] sm:$0xff] %vm925_vm0, %v2675_v23  ;;  %v7142_v2 = vadd.f32 %v3056_v27, %v2934_v3  ;;  %v2147_v16 = vmul.f32 1.442695, %v7858_v5  ;;  %v2523_v3 = vld [vmem:[#allocation4 + $0x60] sm:$0xff]  ;;  %4717 = vmatpush3.msra.mxu1 %v3583_v34  ;;  %v7174_v23 = vpop.eup %5082  ;;  %v2937_v27 = vmul.f32 0.0, %v7090_v10  ;;  %v2938_v10 = vmul.f32 0.0, %v7099_v4 }
 0x4b2   : > { %v3058_v47 = vpop.f32.mrf.mxu0  ;;  %v2595_v59 = vpop.xlane.xlu1 %2594  ;;  %v2939_v34 = vmul.f32 0.0, %v7115_v9  ;;  %v2516_v39 = vld [vmem:[#allocation4 + $0x28] sm:$0xff] }
 0x4b3   : > { %v2677_v19 = vadd.f32 %v2595_v59, %v2549_v24  ;;  %v2555_v24 = vmul.f32 %v6952_v7, %v2523_v3  ;;  %5090 = vpow2.f32 %v2147_v16  ;;  %v3582_v7 = vld [vmem:[#allocation17 + $0x50] sm:$0xff] }
 0x4b4   : > { %2870 = vperm.xlu0 %4909, %v7148_v38   ;;  %v3061_v40 = vpop.f32.mrf.mxu0  ;;  %4718 = vmatprep.subr.mxu1 %v3582_v7  ;;  %5092 = vpow2.f32 %v2149_v48  ;;  %v2513_v16 = vld [vmem:[#allocation4 + $0x10] sm:$0xff]  ;;  %v2940_v48 = vmul.f32 0.0, %v7128_v32  ;;  %v7870_v32 = vsub.f32 %v6863_v62, %v6873_v61 }
 0x4b5   : > { %2710 = vst.msk [vmem:[#allocation4 + $0x30] sm:$0xff] %vm925_vm0, %v2677_v19  ;;  %v7155_v29 = vadd.f32 %v3061_v40, %v2935_v37  ;;  %v7185_v37 = vpop.eup %5084  ;;  %v7188_v40 = vpop.permute.xlu0 %2845  ;;  %4719 = vmatpush3.msra.mxu1 %v3582_v7 }
 0x4b6   : > { %v3063_v43 = vpop.f32.mrf.mxu0  ;;  %v2601_v46 = vpop.xlane.xlu1 %2600 }
 0x4b7   : > { %v2679_v49 = vadd.f32 %v2601_v46, %v2551_v35  ;;  %v7863_v43 = vld [vmem:[#allocation94_spill] sm:$0xff] }
 0x4b8   : > { %2875 = vperm.xlu0 %4909, %v7161_v33   ;;  %v3066_v56 = vpop.f32.mrf.mxu0  ;;  %v7864_v46 = vsub.f32 %v7862_v11, %v7863_v43  ;;  %v2155_v11 = vmul.f32 1.442695, %v7870_v32  ;;  %v2520_v32 = vld [vmem:[#allocation4 + $0x48] sm:$0xff] }
 0x4b9   : > { %2712 = vst.msk [vmem:[#allocation4 + $0x40] sm:$0xff] %vm925_vm0, %v2679_v49  ;;  %v7168_v14 = vadd.f32 %v3066_v56, %v2936_v6  ;;  %v2527_v49 = vld [vmem:[#allocation4 + $0x80] sm:$0xff]  ;;  %v7198_v56 = vpop.eup %5086 }
 0x4ba   : > { %v3068_v26 = vpop.f32.mrf.mxu0  ;;  %v2607_v28 = vpop.xlane.xlu1 %2606  ;;  %v2151_v4 = vmul.f32 1.442695, %v7864_v46  ;;  %v2559_v3 = vmul.f32 %v7104_v51, %v2527_v49  ;;  %v7871_v49 = vld [vmem:[#allocation81_spill] sm:$0xff] }
 0x4bb   : > { %v2681_v30 = vadd.f32 %v2607_v28, %v2553_v1 }
 0x4bc   : > { %2880 = vperm.xlu0 %4909, %v7174_v23   ;;  %v3071_v13 = vpop.f32.mrf.mxu0  ;;  %5094 = vpow2.f32 %v2151_v4  ;;  %v2531_v4 = vld [vmem:[#allocation4 + $0xa0] sm:$0xff] }
 0x4bd   : > { %2714 = vst.msk [vmem:[#allocation4 + $0x50] sm:$0xff] %vm925_vm0, %v2681_v30  ;;  %v7179_v52 = vadd.f32 %v3071_v13, %v2937_v27  ;;  %v7866_v27 = vld [vmem:[#allocation95_spill] sm:$0xff]  ;;  %v7867_v30 = vld [vmem:[#allocation96_spill] sm:$0xff]  ;;  %v7210_v31 = vpop.eup %5088 }
 0x4be   : > { %v3073_v47 = vpop.f32.mrf.mxu0  ;;  %v2613_v59 = vpop.xlane.xlu1 %2612  ;;  %v7868_v13 = vsub.f32 %v7866_v27, %v7867_v30  ;;  %v3580_v27 = vld [vmem:[#allocation17 + $0x40] sm:$0xff] }
 0x4bf   : > { %v2683_v19 = vadd.f32 %v2613_v59, %v2555_v24  ;;  %v7869_v59 = vld [vmem:[#allocation84_spill] sm:$0xff] }
 0x4c0   : > { %2885 = vperm.xlu0 %4909, %v7185_v37   ;;  %v3076_v35 = vpop.f32.mrf.mxu0  ;;  %v2153_v9 = vmul.f32 1.442695, %v7868_v13  ;;  %v2545_v50 = vmul.f32 %v7869_v59, %v2513_v16 }
 0x4c1   : > { %2716 = vst.msk [vmem:[#allocation4 + $0x60] sm:$0xff] %vm925_vm0, %v2683_v19  ;;  %v7192_v44 = vadd.f32 %v3076_v35, %v2938_v10  ;;  %v2514_v19 = vld [vmem:[#allocation4 + $0x18] sm:$0xff]  ;;  %v3581_v35 = vld [vmem:[#allocation17 + $0x48] sm:$0xff] }
 0x4c2   : > { %v3078_v54 = vpop.f32.mrf.mxu0  ;;  %v2619_v6 = vpop.xlane.xlu1 %2618  ;;  %4720 = vmatprep.subr.mxu1 %v3581_v35  ;;  %5096 = vpow2.f32 %v2153_v9 }
 0x4c3   : > { %v2685_v1 = vadd.f32 %v2619_v6, %v2557_v18  ;;  %v2561_v18 = vmul.f32 %v7124_v45, %v2529_v57  ;;  %4721 = vmatpush3.msra.mxu1 %v3581_v35  ;;  %v7223_v54 = vpop.eup %5090  ;;  %5098 = vpow2.f32 %v2155_v11  ;;  %v3579_v57 = vld [vmem:[#allocation17 + $0x38] sm:$0xff] }
 0x4c4   : > { %2890 = vperm.xlu0 %4909, %v7198_v56   ;;  %v3081_v58 = vpop.f32.mrf.mxu0  ;;  %v2577_v5 = vpop.xlane.xlu0 %2576  ;;  %4722 = vmatprep.subr.mxu1 %v3580_v27 }
 0x4c5   : > { %2718 = vst.msk [vmem:[#allocation4 + $0x70] sm:$0xff] %vm925_vm0, %v2685_v1  ;;  %v7204_v26 = vadd.f32 %v3081_v58, %v2939_v34  ;;  %v2671_v28 = vadd.f32 %v2577_v5, %v2543_v25  ;;  %v2546_v34 = vmul.f32 %v7871_v49, %v2514_v19  ;;  %v2941_v1 = vmul.f32 0.0, %v7151_v63  ;;  %v7236_v30 = vpop.eup %5092  ;;  %4723 = vmatpush3.msra.mxu1 %v3580_v27  ;;  %v2535_v19 = vld [vmem:[#allocation4 + $0xc0] sm:$0xff] }
 0x4c6   : > { %v3083_v24 = vpop.f32.mrf.mxu0  ;;  %v2625_v22 = vpop.xlane.xlu1 %2624  ;;  %v2563_v25 = vmul.f32 %v7148_v38, %v2531_v4  ;;  %v7872_v58 = vsub.f32 %v6878_v15, %v6890_v17  ;;  %v2518_v38 = vld [vmem:[#allocation4 + $0x38] sm:$0xff]  ;;  %v3317_v17 = vld [vmem:[#allocation4 + $0x8] sm:$0xff]  ;;  %4724 = vmatprep.subr.mxu1 %v3579_v57  ;;  %v3576_v4 = vld [vmem:[#allocation17 + $0x20] sm:$0xff] }
 0x4c7   : > { %2704 = vst.msk [vmem:[#allocation4] sm:$0xff] %vm925_vm0, %v2671_v28  ;;  %v2687_v47 = vadd.f32 %v2625_v22, %v2559_v3  ;;  %v2533_v3 = vld [vmem:[#allocation4 + $0xb0] sm:$0xff]  ;;  %v7873_v24 = vld [vmem:[#allocation92_spill] sm:$0xff]  ;;  %4725 = vmatpush3.msra.mxu1 %v3579_v57 }
 0x4c8   : > { %2895 = vperm.xlu0 %4909, %v7210_v31   ;;  %v3086_v51 = vpop.f32.mrf.mxu0  ;;  %v2583_v10 = vpop.xlane.xlu0 %2582  ;;  %v2157_v5 = vmul.f32 1.442695, %v7872_v58  ;;  %v2548_v22 = vmul.f32 %v7873_v24, %v2516_v39 }
 0x4c9   : > { %2720 = vst.msk [vmem:[#allocation4 + $0x80] sm:$0xff] %vm925_vm0, %v2687_v47  ;;  %v7217_v36 = vadd.f32 %v3086_v51, %v2940_v48  ;;  %v2673_v7 = vadd.f32 %v2583_v10, %v2545_v50  ;;  %v3578_v48 = vld [vmem:[#allocation17 + $0x30] sm:$0xff]  ;;  %v2942_v47 = vmul.f32 0.0, %v7165_v21  ;;  %v2565_v50 = vmul.f32 %v7174_v23, %v2533_v3  ;;  %v7244_v35 = vpop.eup %5094  ;;  %v3575_v3 = vld [vmem:[#allocation17 + $0x18] sm:$0xff] }
 0x4ca   : > { %v3088_v43 = vpop.f32.mrf.mxu0  ;;  %v2631_v46 = vpop.xlane.xlu1 %2630  ;;  %v2550_v21 = vmul.f32 %v6892_v55, %v2518_v38  ;;  %4726 = vmatprep.subr.mxu1 %v3578_v48 }
 0x4cb   : > { %2706 = vst.msk [vmem:[#allocation4 + $0x10] sm:$0xff] %vm925_vm0, %v2673_v7  ;;  %v2689_v6 = vadd.f32 %v2631_v46, %v2561_v18  ;;  %4727 = vmatpush3.msra.mxu1 %v3578_v48  ;;  %v3577_v46 = vld [vmem:[#allocation17 + $0x28] sm:$0xff] }
 0x4cc   : > { %2900 = vperm.xlu0 %4909, %v7223_v54   ;;  %v2586_v45 = vpop.xlane.xlu0 %2585  ;;  %v3091_v62 = vpop.f32.mrf.mxu0  ;;  %4728 = vmatprep.subr.mxu1 %v3577_v46 }
 0x4cd   : > { %2722 = vst.msk [vmem:[#allocation4 + $0x90] sm:$0xff] %vm925_vm0, %v2689_v6  ;;  %v2674_v61 = vadd.f32 %v2586_v45, %v2546_v34  ;;  %v7234_v16 = vadd.f32 %v3091_v62, %v2941_v1  ;;  %v2943_v6 = vmul.f32 0.0, %v7188_v40  ;;  %v2567_v34 = vmul.f32 %v7198_v56, %v2535_v19  ;;  %v2537_v45 = vld [vmem:[#allocation4 + $0xd0] sm:$0xff]  ;;  %4729 = vmatpush3.msra.mxu1 %v3577_v46 }
 0x4ce   : > { %v2637_v28 = vpop.xlane.xlu1 %2636  ;;  %v3316_v63 = vld [vmem:[#allocation4] sm:$0xff]  ;;  %v3093_v13 = vpop.f32.mrf.mxu0  ;;  %4730 = vmatprep.subr.mxu1 %v3576_v4  ;;  %v2569_v27 = vmul.f32 %v7223_v54, %v2537_v45 }
 0x4cf   : > { %2707 = vst.msk [vmem:[#allocation4 + $0x18] sm:$0xff] %vm925_vm0, %v2674_v61  ;;  %v2691_v9 = vadd.f32 %v2637_v28, %v2563_v25  ;;  %5100 = vrcp.f32 %v3316_v63  ;;  %v7254_v39 = vpop.eup %5096  ;;  %v7874_v25 = vld [vmem:[#allocation32_spill] sm:$0xff]  ;;  %v2522_v28 = vld [vmem:[#allocation4 + $0x58] sm:$0xff]  ;;  %4731 = vmatpush3.msra.mxu1 %v3576_v4  ;;  %v3574_v13 = vld [vmem:[#allocation17 + $0x10] sm:$0xff] }
 0x4d0   : > { %2905 = vperm.xlu0 %4909, %v7236_v30   ;;  %v2592_v15 = vpop.xlane.xlu0 %2591  ;;  %5102 = vpow2.f32 %v2157_v5  ;;  %v2552_v40 = vmul.f32 %v7874_v25, %v2520_v32  ;;  %4732 = vmatprep.subr.mxu1 %v3575_v3  ;;  %v7265_v38 = vpop.eup %5098  ;;  %v7877_v45 = vld [vmem:[#allocation68_spill] sm:$0xff] }
 0x4d1   : > { %2724 = vst.msk [vmem:[#allocation4 + $0xa0] sm:$0xff] %vm925_vm0, %v2691_v9  ;;  %v2676_v59 = vadd.f32 %v2592_v15, %v2548_v22  ;;  %5104 = vrcp.f32 %v3317_v17  ;;  %v2539_v22 = vld [vmem:[#allocation4 + $0xe0] sm:$0xff]  ;;  %4733 = vmatpush3.msra.mxu1 %v3575_v3  ;;  %v7875_v17 = vld [vmem:[#allocation33_spill] sm:$0xff] }
 0x4d2   : > { %v3096_v51 = vpop.f32.mrf.mxu0  ;;  %v2643_v10 = vpop.xlane.xlu1 %2642  ;;  %v3318_v11 = vld [vmem:[#allocation4 + $0x10] sm:$0xff]  ;;  %v2554_v57 = vmul.f32 %v7875_v17, %v2522_v28  ;;  %4734 = vmatprep.subr.mxu1 %v3574_v13  ;;  %v2571_v19 = vmul.f32 %v7244_v35, %v2539_v22 }
 0x4d3   : > { %2709 = vst.msk [vmem:[#allocation4 + $0x28] sm:$0xff] %vm925_vm0, %v2676_v59  ;;  %v7247_v7 = vadd.f32 %v3096_v51, %v2942_v47  ;;  %v2693_v18 = vadd.f32 %v2643_v10, %v2565_v50  ;;  %5106 = vrcp.f32 %v3318_v11  ;;  %v3320_v47 = vld [vmem:[#allocation4 + $0x20] sm:$0xff]  ;;  %v2524_v50 = vld [vmem:[#allocation4 + $0x68] sm:$0xff]  ;;  %4735 = vmatpush3.msra.mxu1 %v3574_v13 }
 0x4d4   : > { %2910 = vperm.xlu0 %4909, %v7244_v35   ;;  %v3098_v23 = vpop.f32.mrf.mxu0  ;;  %v2598_v43 = vpop.xlane.xlu0 %2597  ;;  %v3573_v51 = vld [vmem:[#allocation17 + $0x8] sm:$0xff] }
 0x4d5   : > { %2726 = vst.msk [vmem:[#allocation4 + $0xb0] sm:$0xff] %vm925_vm0, %v2693_v18  ;;  %v2678_v49 = vadd.f32 %v2598_v43, %v2550_v21  ;;  %4736 = vmatprep.subr.mxu1 %v3573_v51  ;;  %v3572_v18 = vld [vmem:[#allocation17] sm:$0xff]  ;;  %v7876_v43 = vld [vmem:[#allocation34_spill] sm:$0xff] }
 0x4d6   : > { %v3101_v55 = vpop.f32.mrf.mxu0  ;;  %v2649_v1 = vpop.xlane.xlu1 %2648  ;;  %v3319_v58 = vld [vmem:[#allocation4 + $0x18] sm:$0xff]  ;;  %4737 = vmatpush3.msra.mxu1 %v3573_v51  ;;  %v2556_v46 = vmul.f32 %v7876_v43, %v2524_v50  ;;  %v2532_v51 = vld [vmem:[#allocation4 + $0xa8] sm:$0xff] }
 0x4d7   : > { %2711 = vst.msk [vmem:[#allocation4 + $0x38] sm:$0xff] %vm925_vm0, %v2678_v49  ;;  %v7257_v62 = vadd.f32 %v3101_v55, %v2943_v6  ;;  %v2695_v61 = vadd.f32 %v2649_v1, %v2567_v34  ;;  %5108 = vrcp.f32 %v3319_v58  ;;  %4738 = vmatprep.subr.mxu1 %v3572_v18  ;;  %v2526_v34 = vld [vmem:[#allocation4 + $0x78] sm:$0xff] }
 0x4d8   : > { %2915 = vperm.xlu0 %4909, %v7254_v39   ;;  %v3103_v56 = vpop.f32.mrf.mxu0  ;;  %v2604_v5 = vpop.xlane.xlu0 %2603  ;;  %5110 = vrcp.f32 %v3320_v47  ;;  %4739 = vmatpush3.msra.mxu1 %v3572_v18 }
 0x4d9   : > { %2728 = vst.msk [vmem:[#allocation4 + $0xc0] sm:$0xff] %vm925_vm0, %v2695_v61  ;;  %v2680_v63 = vadd.f32 %v2604_v5, %v2552_v40  ;;  %v2558_v61 = vmul.f32 %v7877_v45, %v2526_v34  ;;  %v3322_v40 = vld [vmem:[#allocation4 + $0x30] sm:$0xff]  ;;  %v2528_v5 = vld [vmem:[#allocation4 + $0x88] sm:$0xff] }
 0x4da   : > { %v7263_v9 = vpop.f32.mrf.mxu0  ;;  %v2655_v24 = vpop.xlane.xlu1 %2654  ;;  %v3321_v6 = vld [vmem:[#allocation4 + $0x28] sm:$0xff] }
 0x4db   : > { %2713 = vst.msk [vmem:[#allocation4 + $0x48] sm:$0xff] %vm925_vm0, %v2680_v63  ;;  %v2697_v15 = vadd.f32 %v2655_v24, %v2569_v27  ;;  %5112 = vrcp.f32 %v3321_v6  ;;  %v2560_v63 = vmul.f32 %v7112_v0, %v2528_v5  ;;  %v2536_v45 = vld [vmem:[#allocation4 + $0xc8] sm:$0xff] }
 0x4dc   : > { %v5101_v48 = vpop.eup %5100  ;;  %2920 = vperm.xlu0 %4909, %v7265_v38   ;;  %v3108_v54 = vpop.f32.mrf.mxu0  ;;  %5114 = vrcp.f32 %v3322_v40 }
 0x4dd   : > { %v2610_v59 = vpop.xlane.xlu0 %2609  ;;  %2730 = vst.msk [vmem:[#allocation4 + $0xd0] sm:$0xff] %vm925_vm0, %v2697_v15  ;;  %3382 = vperm.xlu1 %4908, %v5101_v48   ;;  %v7274_v11 = vpop.eup %5102  ;;  %v2530_v15 = vld [vmem:[#allocation4 + $0x98] sm:$0xff]  ;;  %v3324_v54 = vld [vmem:[#allocation4 + $0x40] sm:$0xff] }
 0x4de   : > { %v2682_v10 = vadd.f32 %v2610_v59, %v2554_v57  ;;  %v7272_v21 = vpop.f32.mrf.mxu0  ;;  %v2661_v32 = vpop.xlane.xlu1 %2660  ;;  %v3323_v13 = vld [vmem:[#allocation4 + $0x38] sm:$0xff]  ;;  %v2562_v48 = vmul.f32 %v7137_v12, %v2530_v15 }
 0x4df   : > { %v2699_v23 = vadd.f32 %v2661_v32, %v2571_v19  ;;  %v5105_v4 = vpop.eup %5104  ;;  %5116 = vrcp.f32 %v3323_v13  ;;  %v2564_v19 = vmul.f32 %v7161_v33, %v2532_v51 }
 0x4e0   : > { %2715 = vst.msk [vmem:[#allocation4 + $0x58] sm:$0xff] %vm925_vm0, %v2682_v10  ;;  %2925 = vperm.xlu0 %4909, %v7274_v11   ;;  %v3113_v35 = vpop.f32.mrf.mxu0  ;;  %v5107_v25 = vpop.eup %5106  ;;  %5118 = vrcp.f32 %v3324_v54 }
 0x4e1   : > { %v2616_v49 = vpop.xlane.xlu0 %2615  ;;  %2732 = vst.msk [vmem:[#allocation4 + $0xe0] sm:$0xff] %vm925_vm0, %v2699_v23  ;;  %3387 = vperm.xlu1 %4908, %v5105_v4  }
 0x4e2   : > { %v2684_v55 = vadd.f32 %v2616_v49, %v2556_v46  ;;  %v7280_v1 = vpop.f32.mrf.mxu0  ;;  %v3325_v32 = vld [vmem:[#allocation4 + $0x48] sm:$0xff]  ;;  %v2534_v46 = vld [vmem:[#allocation4 + $0xb8] sm:$0xff]  ;;  %v3326_v49 = vld [vmem:[#allocation4 + $0x50] sm:$0xff] }
 0x4e3   : > { %5120 = vrcp.f32 %v3325_v32  ;;  %v2566_v6 = vmul.f32 %v7185_v37, %v2534_v46 }
 0x4e4   : > { %2717 = vst.msk [vmem:[#allocation4 + $0x68] sm:$0xff] %vm925_vm0, %v2684_v55  ;;  %v3118_v58 = vpop.f32.mrf.mxu0  ;;  %v5109_v27 = vpop.eup %5108  ;;  %5122 = vrcp.f32 %v3326_v49 }
 0x4e5   : > { %v2622_v56 = vpop.xlane.xlu0 %2621  ;;  %3392 = vperm.xlu1 %4908, %v5107_v25   ;;  %v5111_v47 = vpop.eup %5110  ;;  %v2568_v25 = vmul.f32 %v7210_v31, %v2536_v45 }
 0x4e6   : > { %v2686_v28 = vadd.f32 %v2622_v56, %v2558_v61  ;;  %v7284_v3 = vpop.f32.mrf.mxu0 }
 0x4e7   : > { %v3327_v58 = vld [vmem:[#allocation4 + $0x58] sm:$0xff] }
 0x4e8   : > { %2719 = vst.msk [vmem:[#allocation4 + $0x78] sm:$0xff] %vm925_vm0, %v2686_v28  ;;  %v3123_v24 = vpop.f32.mrf.mxu0  ;;  %v5113_v18 = vpop.eup %5112  ;;  %v2538_v28 = vld [vmem:[#allocation4 + $0xd8] sm:$0xff]  ;;  %5124 = vrcp.f32 %v3327_v58 }
 0x4e9   : > { %v2628_v22 = vpop.xlane.xlu0 %2627  ;;  %3397 = vperm.xlu1 %4908, %v5109_v27   ;;  %v5115_v35 = vpop.eup %5114  ;;  %v2570_v27 = vmul.f32 %v7236_v30, %v2538_v28  ;;  %v3328_v24 = vld [vmem:[#allocation4 + $0x60] sm:$0xff] }
 0x4ea   : > { %v2688_v17 = vadd.f32 %v2628_v22, %v2560_v63  ;;  %v7288_v57 = vpop.f32.mrf.mxu0  ;;  %5126 = vrcp.f32 %v3328_v24 }
 0x4ec   : > { %2721 = vst.msk [vmem:[#allocation4 + $0x88] sm:$0xff] %vm925_vm0, %v2688_v17  ;;  %v3128_v59 = vpop.f32.mrf.mxu0  ;;  %v5117_v40 = vpop.eup %5116  ;;  %v2540_v17 = vld [vmem:[#allocation4 + $0xe8] sm:$0xff] }
 0x4ed   : > { %v2634_v50 = vpop.xlane.xlu0 %2633  ;;  %3402 = vperm.xlu1 %4908, %v5111_v47   ;;  %v5119_v13 = vpop.eup %5118  ;;  %v2572_v47 = vmul.f32 %v7254_v39, %v2540_v17  ;;  %v3329_v59 = vld [vmem:[#allocation4 + $0x68] sm:$0xff]  ;;  %v3336_v17 = vld [vmem:[#allocation4 + $0xa0] sm:$0xff] }
 0x4ee   : > { %v2690_v0 = vadd.f32 %v2634_v50, %v2562_v48  ;;  %v7292_v10 = vpop.f32.mrf.mxu0  ;;  %5128 = vrcp.f32 %v3329_v59  ;;  %v3338_v59 = vld [vmem:[#allocation4 + $0xb0] sm:$0xff] }
 0x4ef   : > { %v3331_v39 = vld [vmem:[#allocation4 + $0x78] sm:$0xff] }
 0x4f0   : > { %2723 = vst.msk [vmem:[#allocation4 + $0x98] sm:$0xff] %vm925_vm0, %v2690_v0  ;;  %v3133_v23 = vpop.f32.mrf.mxu0  ;;  %v5121_v54 = vpop.eup %5120 }
 0x4f1   : > { %v2640_v43 = vpop.xlane.xlu0 %2639  ;;  %3407 = vperm.xlu1 %4908, %v5113_v18   ;;  %v3330_v18 = vld [vmem:[#allocation4 + $0x70] sm:$0xff] }
 0x4f2   : > { %v2692_v12 = vadd.f32 %v2640_v43, %v2564_v19  ;;  %v7296_v4 = vpop.f32.mrf.mxu0  ;;  %v5123_v19 = vpop.eup %5122  ;;  %5130 = vrcp.f32 %v3330_v18  ;;  %v3340_v18 = vld [vmem:[#allocation4 + $0xc0] sm:$0xff] }
 0x4f3   : > { %5132 = vrcp.f32 %v3331_v39 }
 0x4f4   : > { %2725 = vst.msk [vmem:[#allocation4 + $0xa8] sm:$0xff] %vm925_vm0, %v2692_v12  ;;  %v3138_v34 = vpop.f32.mrf.mxu0 }
 0x4f5   : > { %v2646_v55 = vpop.xlane.xlu0 %2645  ;;  %3412 = vperm.xlu1 %4908, %v5115_v35   ;;  %v5125_v43 = vpop.eup %5124  ;;  %v3332_v35 = vld [vmem:[#allocation4 + $0x80] sm:$0xff] }
 0x4f6   : > { %v2694_v33 = vadd.f32 %v2646_v55, %v2566_v6  ;;  %v7300_v61 = vpop.f32.mrf.mxu0  ;;  %v2541_v55 = vld [vmem:[#allocation4 + $0xf0] sm:$0xff]  ;;  %5134 = vrcp.f32 %v3332_v35 }
 0x4f7   : > { %v5127_v6 = vpop.eup %5126 }
 0x4f8   : > { %2727 = vst.msk [vmem:[#allocation4 + $0xb8] sm:$0xff] %vm925_vm0, %v2694_v33  ;;  %v3143_v56 = vpop.f32.mrf.mxu0  ;;  %v3333_v33 = vld [vmem:[#allocation4 + $0x88] sm:$0xff] }
 0x4f9   : > { %v2652_v5 = vpop.xlane.xlu0 %2651  ;;  %3417 = vperm.xlu1 %4908, %v5117_v40   ;;  %v2573_v40 = vmul.f32 %v7265_v38, %v2541_v55  ;;  %5136 = vrcp.f32 %v3333_v33  ;;  %v3344_v55 = vld [vmem:[#allocation4 + $0xe0] sm:$0xff] }
 0x4fa   : > { %v2696_v37 = vadd.f32 %v2652_v5, %v2568_v25  ;;  %v7304_v63 = vpop.f32.mrf.mxu0  ;;  %v2542_v5 = vld [vmem:[#allocation4 + $0xf8] sm:$0xff] }
 0x4fb   : > { %v5129_v45 = vpop.eup %5128 }
 0x4fc   : > { %2729 = vst.msk [vmem:[#allocation4 + $0xc8] sm:$0xff] %vm925_vm0, %v2696_v37  ;;  %v3148_v22 = vpop.f32.mrf.mxu0  ;;  %v3334_v37 = vld [vmem:[#allocation4 + $0x90] sm:$0xff] }
 0x4fd   : > { %v2658_v15 = vpop.xlane.xlu0 %2657  ;;  %3422 = vperm.xlu1 %4908, %v5119_v13   ;;  %5138 = vrcp.f32 %v3334_v37  ;;  %v3335_v22 = vld [vmem:[#allocation4 + $0x98] sm:$0xff] }
 0x4fe   : > { %v2698_v31 = vadd.f32 %v2658_v15, %v2570_v27  ;;  %v7308_v48 = vpop.f32.mrf.mxu0  ;;  %v2574_v27 = vmul.f32 %v7274_v11, %v2542_v5  ;;  %5140 = vrcp.f32 %v3335_v22  ;;  %v7878_v22 = vld [vmem:[#allocation69_spill] sm:$0xff] }
 0x4ff   : > { %v5131_v28 = vpop.eup %5130 }
 0x500   : > { %2731 = vst.msk [vmem:[#allocation4 + $0xd8] sm:$0xff] %vm925_vm0, %v2698_v31  ;;  %v3153_v50 = vpop.f32.mrf.mxu0  ;;  %v5133_v24 = vpop.eup %5132 }
 0x501   : > { %v2664_v51 = vpop.xlane.xlu0 %2663  ;;  %3427 = vperm.xlu1 %4908, %v5121_v54   ;;  %v3337_v54 = vld [vmem:[#allocation4 + $0xa8] sm:$0xff] }
 0x502   : > { %v2700_v0 = vadd.f32 %v2664_v51, %v2572_v47  ;;  %v7312_v30 = vpop.f32.mrf.mxu0  ;;  %v3339_v51 = vld [vmem:[#allocation4 + $0xb8] sm:$0xff] }
 0x503   : > { %v5135_v38 = vpop.eup %5134 }
 0x504   : > { %2733 = vst.msk [vmem:[#allocation4 + $0xe8] sm:$0xff] %vm925_vm0, %v2700_v0  ;;  %v3158_v32 = vpop.f32.mrf.mxu0 }
 0x505   : > { %3432 = vperm.xlu1 %4908, %v5123_v19  }
 0x506   : > { %v7315_v23 = vpop.f32.mrf.mxu0  ;;  %v5137_v47 = vpop.eup %5136 }
 0x507   : > { %v3343_v35 = vld [vmem:[#allocation4 + $0xd8] sm:$0xff] }
 0x508   : > { %v3163_v46 = vpop.f32.mrf.mxu0 }
 0x509   : > { %3437 = vperm.xlu1 %4908, %v5125_v43   ;;  %v3341_v43 = vld [vmem:[#allocation4 + $0xc8] sm:$0xff]  ;;  %v3342_v46 = vld [vmem:[#allocation4 + $0xd0] sm:$0xff] }
 0x50a   : > { %v7317_v12 = vpop.f32.mrf.mxu0  ;;  %v5139_v11 = vpop.eup %5138 }
 0x50b   : > { %v5141_v50 = vpop.eup %5140  ;;  %v3345_v33 = vld [vmem:[#allocation4 + $0xe8] sm:$0xff] }
 0x50c   : > { %v3168_v49 = vpop.f32.mrf.mxu0 }
 0x50d   : > { %3442 = vperm.xlu1 %4908, %v5127_v6  }
 0x50e   : > { %v7319_v34 = vpop.f32.mrf.mxu0 }
 0x510   : > { %v3173_v25 = vpop.f32.mrf.mxu0 }
 0x511   : > { %3447 = vperm.xlu1 %4908, %v5129_v45  }
 0x512   : > { %v2667_v58 = vpop.xlane.xlu1 %2666 }
 0x513   : > { %v2701_v56 = vadd.f32 %v2667_v58, %v2573_v40 }
 0x515   : > { %2734 = vst.msk [vmem:[#allocation4 + $0xf0] sm:$0xff] %vm925_vm0, %v2701_v56  ;;  %3452 = vperm.xlu1 %4908, %v5131_v28  }
 0x517   : > { %v2670_v13 = vpop.xlane.xlu0 %2669 }
 0x518   : > { %v2702_v15 = vadd.f32 %v2670_v13, %v2574_v27 }
 0x519   : > { %3457 = vperm.xlu1 %4908, %v5133_v24  }
 0x51a   : > { %2735 = vst.msk [vmem:[#allocation4 + $0xf8] sm:$0xff] %vm925_vm0, %v2702_v15  ;;  %v2928_v15 = vmul.f32 0.0, %v7878_v22 }
 0x51c   : > { %v3346_v31 = vld [vmem:[#allocation4 + $0xf0] sm:$0xff] }
 0x51d   : > { %5142 = vrcp.f32 %v3346_v31  ;;  %3462 = vperm.xlu1 %4908, %v5135_v38   ;;  %v3185_v38 = vadd.f32 %v7085_v8, %v2928_v15  ;;  %v7879_v31 = vld [vmem:[#allocation35_spill] sm:$0xff] }
 0x51e   : > { %5144 = vrcp.f32 %v3336_v17 }
 0x51f   : > { %5146 = vrcp.f32 %v3337_v54 }
 0x520   : > { %5148 = vrcp.f32 %v3338_v59 }
 0x521   : > { %3467 = vperm.xlu1 %4908, %v5137_v47   ;;  %5150 = vrcp.f32 %v3339_v51  ;;  %v3347_v40 = vld [vmem:[#allocation4 + $0xf8] sm:$0xff]  ;;  %v2929_v47 = vmul.f32 0.0, %v7879_v31 }
 0x522   : > { %5152 = vrcp.f32 %v3340_v18 }
 0x523   : > { %5154 = vrcp.f32 %v3341_v43 }
 0x524   : > { %5156 = vrcp.f32 %v3342_v46 }
 0x525   : > { %3472 = vperm.xlu1 %4908, %v5139_v11   ;;  %5158 = vrcp.f32 %v3343_v35  ;;  %v3186_v11 = vadd.f32 %v7092_v42, %v2929_v47 }
 0x526   : > { %5160 = vrcp.f32 %v3344_v55  ;;  %v2851_v55 = vpop.permute.xlu0 %2850 }
 0x527   : > { %5162 = vrcp.f32 %v3345_v33 }
 0x528   : > { %5164 = vrcp.f32 %v3347_v40 }
 0x529   : > { %3477 = vperm.xlu1 %4908, %v5141_v50   ;;  %v7880_v50 = vld [vmem:[#allocation37_spill] sm:$0xff] }
 0x52a   : > { %v5143_v0 = vpop.eup %5142  ;;  %v2930_v51 = vmul.f32 0.0, %v7880_v50 }
 0x52b   : > { %3532 = vperm.xlu0 %4909, %v5143_v0   ;;  %v5145_v19 = vpop.eup %5144 }
 0x52c   : > { %v5147_v32 = vpop.eup %5146 }
 0x52d   : > { %3482 = vperm.xlu1 %4908, %v5145_v19   ;;  %v5149_v39 = vpop.eup %5148  ;;  %v3187_v19 = vadd.f32 %v7097_v60, %v2930_v51 }
 0x52e   : > { %v5151_v6 = vpop.eup %5150 }
 0x52f   : > { %v5153_v49 = vpop.eup %5152 }
 0x530   : > { %v5155_v45 = vpop.eup %5154 }
 0x531   : > { %3487 = vperm.xlu1 %4908, %v5147_v32   ;;  %v5157_v25 = vpop.eup %5156  ;;  %v7881_v32 = vld [vmem:[#allocation36_spill] sm:$0xff] }
 0x532   : > { %v5159_v58 = vpop.eup %5158  ;;  %v2931_v43 = vmul.f32 0.0, %v7881_v32 }
 0x533   : > { %v5161_v28 = vpop.eup %5160 }
 0x534   : > { %v5163_v13 = vpop.eup %5162  ;;  %v3188_v8 = vadd.f32 %v7107_v41, %v2931_v43 }
 0x535   : > { %3492 = vperm.xlu1 %4908, %v5149_v39   ;;  %v5165_v24 = vpop.eup %5164 }
 0x539   : > { %3497 = vperm.xlu1 %4908, %v5151_v6  }
 0x53d   : > { %3502 = vperm.xlu1 %4908, %v5153_v49  }
 0x541   : > { %3507 = vperm.xlu1 %4908, %v5155_v45  }
 0x545   : > { %3512 = vperm.xlu1 %4908, %v5157_v25   ;;  %v2856_v25 = vpop.permute.xlu0 %2855 }
 0x548   : > { %v7325_v56 = vpop.f32.mrf.mxu0 }
 0x549   : > { %3517 = vperm.xlu1 %4908, %v5159_v58  }
 0x54a   : > { %v3178_v5 = vpop.f32.mrf.mxu0 }
 0x54b   : > { %v2861_v5 = vpop.permute.xlu0 %2860 }
 0x54d   : > { %v7327_v37 = vpop.f32.mrf.mxu0  ;;  %3522 = vperm.xlu1 %4908, %v5161_v28  }
 0x54f   : > { %v3183_v27 = vpop.f32.mrf.mxu0 }
 0x551   : > { %3527 = vperm.xlu1 %4908, %v5163_v13   ;;  %v2866_v13 = vpop.permute.xlu0 %2865 }
 0x555   : > { %3537 = vperm.xlu1 %4908, %v5165_v24   ;;  %v2871_v22 = vpop.permute.xlu0 %2870 }
 0x558   : > { %v3383_v17 = vpop.permute.xlu1 %3382 }
 0x559   : > { %v3540_v54 = vmul.f32 %v3383_v17, %v3185_v38  ;;  %v2876_v17 = vpop.permute.xlu0 %2875 }
 0x55b   : > { %4740 = vmatprep.mubr.f32.mxu1 %v3540_v54 }
 0x55c   : > { %v3388_v59 = vpop.permute.xlu1 %3387 }
 0x55d   : > { %v3541_v0 = vmul.f32 %v3388_v59, %v3186_v11  ;;  %v2881_v47 = vpop.permute.xlu0 %2880 }
 0x55f   : > { %4741 = vmatmul.mubr.f32.vlgmr.msra.gmra.mxu1 %v3541_v0 }
 0x560   : > { %v3393_v18 = vpop.permute.xlu1 %3392 }
 0x561   : > { %v3542_v39 = vmul.f32 %v3393_v18, %v3187_v19  ;;  %v2886_v50 = vpop.permute.xlu0 %2885  ;;  %v2946_v19 = vmul.f32 0.0, %v2861_v5 }
 0x563   : > { %4743 = vmatprep.mubr.f32.mxu1 %v3542_v39  ;;  %v3203_v39 = vadd.f32 %v7280_v1, %v2946_v19 }
 0x564   : > { %v3398_v46 = vpop.permute.xlu1 %3397 }
 0x565   : > { %v3543_v6 = vmul.f32 %v3398_v46, %v3188_v8  ;;  %v2891_v32 = vpop.permute.xlu0 %2890  ;;  %v2948_v46 = vmul.f32 0.0, %v2871_v22 }
 0x567   : > { %4744 = vmatmul.mubr.f32.gmra.mxu1 %v3543_v6 }
 0x568   : > { %v3403_v35 = vpop.permute.xlu1 %3402 }
 0x569   : > { %v3544_v42 = vmul.f32 %v3403_v35, %v7118_v53  ;;  %v2896_v6 = vpop.permute.xlu0 %2895 }
 0x56b   : > { %4746 = vmatprep.mubr.f32.mxu1 %v3544_v42 }
 0x56c   : > { %v3408_v49 = vpop.permute.xlu1 %3407 }
 0x56d   : > { %v3545_v45 = vmul.f32 %v3408_v49, %v7131_v20  ;;  %v2949_v49 = vmul.f32 0.0, %v2876_v17 }
 0x56f   : > { %4747 = vmatmul.mubr.f32.gmra.mxu1 %v3545_v45  ;;  %v2901_v45 = vpop.permute.xlu0 %2900  ;;  %v3206_v1 = vadd.f32 %v7292_v10, %v2949_v49 }
 0x570   : > { %v3413_v60 = vpop.permute.xlu1 %3412 }
 0x571   : > { %v3546_v33 = vmul.f32 %v3413_v60, %v7142_v2 }
 0x573   : > { %4749 = vmatprep.mubr.f32.mxu1 %v3546_v33  ;;  %v2950_v33 = vmul.f32 0.0, %v2881_v47 }
 0x574   : > { %v3418_v40 = vpop.permute.xlu1 %3417 }
 0x575   : > { %v3547_v41 = vmul.f32 %v3418_v40, %v7155_v29 }
 0x577   : > { %4750 = vmatmul.mubr.f32.gmra.mxu1 %v3547_v41  ;;  %v2951_v41 = vmul.f32 0.0, %v2886_v50 }
 0x578   : > { %v3423_v58 = vpop.permute.xlu1 %3422 }
 0x579   : > { %v3548_v28 = vmul.f32 %v3423_v58, %v7168_v14  ;;  %v2906_v58 = vpop.permute.xlu0 %2905 }
 0x57b   : > { %4752 = vmatprep.mubr.f32.mxu1 %v3548_v28 }
 0x57c   : > { %v3428_v53 = vpop.permute.xlu1 %3427 }
 0x57d   : > { %v3549_v27 = vmul.f32 %v3428_v53, %v7179_v52  ;;  %v2952_v53 = vmul.f32 0.0, %v2891_v32 }
 0x57f   : > { %4753 = vmatmul.mubr.f32.gmra.mxu1 %v3549_v27  ;;  %v3209_v10 = vadd.f32 %v7304_v63, %v2952_v53 }
 0x580   : > { %v3433_v20 = vpop.permute.xlu1 %3432 }
 0x581   : > { %v3550_v24 = vmul.f32 %v3433_v20, %v7192_v44  ;;  %v2944_v44 = vmul.f32 0.0, %v2851_v55 }
 0x583   : > { %4755 = vmatprep.mubr.f32.mxu1 %v3550_v24  ;;  %v2953_v24 = vmul.f32 0.0, %v2896_v6 }
 0x584   : > { %v3438_v2 = vpop.permute.xlu1 %3437 }
 0x585   : > { %v3551_v15 = vmul.f32 %v3438_v2, %v7204_v26  ;;  %v2945_v26 = vmul.f32 0.0, %v2856_v25 }
 0x587   : > { %4756 = vmatmul.mubr.f32.gmra.mxu1 %v3551_v15  ;;  %v2954_v15 = vmul.f32 0.0, %v2901_v45 }
 0x588   : > { %v3443_v29 = vpop.permute.xlu1 %3442 }
 0x589   : > { %v3552_v38 = vmul.f32 %v3443_v29, %v7217_v36  ;;  %v3201_v36 = vadd.f32 %v7263_v9, %v2944_v44 }
 0x58b   : > { %4758 = vmatprep.mubr.f32.mxu1 %v3552_v38 }
 0x58c   : > { %v3448_v14 = vpop.permute.xlu1 %3447 }
 0x58d   : > { %v3553_v31 = vmul.f32 %v3448_v14, %v7234_v16  ;;  %v3202_v16 = vadd.f32 %v7272_v21, %v2945_v26  ;;  %v3205_v21 = vadd.f32 %v7288_v57, %v2948_v46  ;;  %v3208_v57 = vadd.f32 %v7300_v61, %v2951_v41 }
 0x58e   : > { %v2955_v14 = vmul.f32 0.0, %v2906_v58  ;;  %v3211_v61 = vadd.f32 %v7312_v30, %v2954_v15 }
 0x58f   : > { %4759 = vmatmul.mubr.f32.gmra.mxu1 %v3553_v31 }
 0x590   : > { %v3453_v52 = vpop.permute.xlu1 %3452  ;;  %v3212_v63 = vadd.f32 %v7315_v23, %v2955_v14 }
 0x591   : > { %v3554_v54 = vmul.f32 %v3453_v52, %v7247_v7  ;;  %v2947_v7 = vmul.f32 0.0, %v2866_v13  ;;  %v2911_v13 = vpop.permute.xlu0 %2910 }
 0x593   : > { %4761 = vmatprep.mubr.f32.mxu1 %v3554_v54  ;;  %v3204_v9 = vadd.f32 %v7284_v3, %v2947_v7  ;;  %v3207_v3 = vadd.f32 %v7296_v4, %v2950_v33  ;;  %v3210_v4 = vadd.f32 %v7308_v48, %v2953_v24  ;;  %v2956_v54 = vmul.f32 0.0, %v2911_v13 }
 0x594   : > { %v3458_v11 = vpop.permute.xlu1 %3457 }
 0x595   : > { %v3555_v59 = vmul.f32 %v3458_v11, %v7257_v62  ;;  %v2916_v29 = vpop.permute.xlu0 %2915  ;;  %v3213_v48 = vadd.f32 %v7317_v12, %v2956_v54 }
 0x597   : > { %4762 = vmatmul.mubr.f32.gmra.mxu1 %v3555_v59  ;;  %v2957_v59 = vmul.f32 0.0, %v2916_v29 }
 0x598   : > { %v3463_v51 = vpop.permute.xlu1 %3462 }
 0x599   : > { %v3556_v0 = vmul.f32 %v3463_v51, %v3201_v36  ;;  %v2921_v52 = vpop.permute.xlu0 %2920  ;;  %v3214_v30 = vadd.f32 %v7319_v34, %v2957_v59 }
 0x59a   : > { %v2958_v50 = vmul.f32 0.0, %v2921_v52 }
 0x59b   : > { %4764 = vmatprep.mubr.f32.mxu1 %v3556_v0 }
 0x59c   : > { %v3468_v18 = vpop.permute.xlu1 %3467 }
 0x59d   : > { %v3557_v43 = vmul.f32 %v3468_v18, %v3202_v16  ;;  %v2926_v26 = vpop.permute.xlu0 %2925  ;;  %v3215_v16 = vadd.f32 %v7325_v56, %v2958_v50 }
 0x59e   : > { %v2959_v0 = vmul.f32 0.0, %v2926_v26 }
 0x59f   : > { %4765 = vmatmul.mubr.f32.gmra.mxu1 %v3557_v43 }
 0x5a0   : > { %v3473_v8 = vpop.permute.xlu1 %3472  ;;  %v3216_v43 = vadd.f32 %v7327_v37, %v2959_v0  ;;  %v3820_v37 = vld [vmem:[%s5734_s14] sm:$0xff] }
 0x5a1   : > { %v3558_v62 = vmul.f32 %v3473_v8, %v3203_v39  ;;  %v7368_v39 = vld [vmem:[%s7534_s10] ss:$0 sm:$0xff]  ;;  %v3821_v8 = vld [vmem:[%s5734_s14 + $0x8] sm:$0xff] }
 0x5a3   : > { %4767 = vmatprep.mubr.f32.mxu1 %v3558_v62 }
 0x5a4   : > { %v3478_v35 = vpop.permute.xlu1 %3477 }
 0x5a5   : > { %v3559_v42 = vmul.f32 %v3478_v35, %v3204_v9 }
 0x5a6   : > { %v3533_v19 = vpop.permute.xlu0 %3532 }
 0x5a7   : > { %4768 = vmatmul.mubr.f32.gmra.mxu1 %v3559_v42  ;;  %v3570_v32 = vmul.f32 %v3533_v19, %v3215_v16  ;;  %v3830_v16 = vld [vmem:[%s5734_s14 + $0x50] sm:$0xff] }
 0x5a8   : > { %v3483_v55 = vpop.permute.xlu1 %3482 }
 0x5a9   : > { %v3560_v60 = vmul.f32 %v3483_v55, %v3205_v21  ;;  %v3823_v55 = vld [vmem:[%s5734_s14 + $0x18] sm:$0xff] }
 0x5ab   : > { %4770 = vmatprep.mubr.f32.mxu1 %v3560_v60 }
 0x5ac   : > { %v3488_v25 = vpop.permute.xlu1 %3487 }
 0x5ad   : > { %v3561_v40 = vmul.f32 %v3488_v25, %v3206_v1  ;;  %v3822_v1 = vld [vmem:[%s5734_s14 + $0x10] sm:$0xff] }
 0x5af   : > { %4771 = vmatmul.mubr.f32.gmra.mxu1 %v3561_v40 }
 0x5b0   : > { %v3493_v5 = vpop.permute.xlu1 %3492 }
 0x5b1   : > { %v3562_v28 = vmul.f32 %v3493_v5, %v3207_v3  ;;  %v3825_v5 = vld [vmem:[%s5734_s14 + $0x28] sm:$0xff] }
 0x5b3   : > { %4773 = vmatprep.mubr.f32.mxu1 %v3562_v28 }
 0x5b4   : > { %v3498_v27 = vpop.permute.xlu1 %3497 }
 0x5b5   : > { %v3563_v20 = vmul.f32 %v3498_v27, %v3208_v57  ;;  %v3824_v27 = vld [vmem:[%s5734_s14 + $0x20] sm:$0xff] }
 0x5b7   : > { %4774 = vmatmul.mubr.f32.gmra.mxu1 %v3563_v20 }
 0x5b8   : > { %v3503_v2 = vpop.permute.xlu1 %3502 }
 0x5b9   : > { %v3564_v22 = vmul.f32 %v3503_v2, %v3209_v10 }
 0x5bb   : > { %4776 = vmatprep.mubr.f32.mxu1 %v3564_v22  ;;  %v3827_v22 = vld [vmem:[%s5734_s14 + $0x38] sm:$0xff] }
 0x5bc   : > { %v3508_v38 = vpop.permute.xlu1 %3507 }
 0x5bd   : > { %v3565_v17 = vmul.f32 %v3508_v38, %v3210_v4  ;;  %v3826_v38 = vld [vmem:[%s5734_s14 + $0x30] sm:$0xff] }
 0x5bf   : > { %4777 = vmatmul.mubr.f32.gmra.mxu1 %v3565_v17 }
 0x5c0   : > { %v3513_v31 = vpop.permute.xlu1 %3512 }
 0x5c1   : > { %v3566_v47 = vmul.f32 %v3513_v31, %v3211_v61 }
 0x5c3   : > { %4779 = vmatprep.mubr.f32.mxu1 %v3566_v47  ;;  %v3829_v47 = vld [vmem:[%s5734_s14 + $0x48] sm:$0xff] }
 0x5c4   : > { %v3518_v44 = vpop.permute.xlu1 %3517 }
 0x5c5   : > { %v3567_v11 = vmul.f32 %v3518_v44, %v3212_v63 }
 0x5c7   : > { %4780 = vmatmul.mubr.f32.gmra.mxu1 %v3567_v11  ;;  %v3828_v11 = vld [vmem:[%s5734_s14 + $0x40] sm:$0xff] }
 0x5c8   : > { %v3523_v36 = vpop.permute.xlu1 %3522 }
 0x5c9   : > { %v3568_v51 = vmul.f32 %v3523_v36, %v3213_v48 }
 0x5cb   : > { %4782 = vmatprep.mubr.f32.mxu1 %v3568_v51  ;;  %v3831_v51 = vld [vmem:[%s5734_s14 + $0x58] sm:$0xff] }
 0x5cc   : > { %v3528_v18 = vpop.permute.xlu1 %3527 }
 0x5cd   : > { %v3569_v23 = vmul.f32 %v3528_v18, %v3214_v30 }
 0x5cf   : > { %4783 = vmatmul.mubr.f32.gmra.mxu1 %v3569_v23 }
 0x5d0   : > { %4785 = vmatprep.mubr.f32.mxu1 %v3570_v32  ;;  %v3538_v12 = vpop.permute.xlu1 %3537 }
 0x5d1   : > { %v3571_v7 = vmul.f32 %v3538_v12, %v3216_v43 }
 0x5d3   : > { %4786 = vmatmul.mubr.f32.gmra.mxu1 %v3571_v7  ;;  %v3833_v7 = vld [vmem:[%s5734_s14 + $0x68] sm:$0xff] }
 0x61f   : > { %v4742_v34 = vpop.f32.mrf.mxu1 }
 0x620   : > { %v3667_v56 = vadd.f32 %v4742_v34, %v7368_v39 }
 0x621   : > { %v3661_v62 = vpop.f32.mrf.mxu1 }
 0x622   : > { %v3853_v46 = vmax.f32 %v3667_v56, 0.0  ;;  %v3662_v6 = vadd.f32 %v7368_v39, %v3661_v62  ;;  %v3832_v62 = vld [vmem:[%s5734_s14 + $0x60] sm:$0xff] }
 0x624   : > { %v3885_v9 = vadd.f32 %v3853_v46, %v3821_v8  ;;  %v3852_v35 = vmax.f32 %v3662_v6, 0.0 }
 0x626   : > { %3917 = vst [vmem:[%s7375_s29 + $0x8] sm:$0xff] %v3885_v9  ;;  %v3884_v42 = vadd.f32 %v3852_v35, %v3820_v37 }
 0x627   : > { %v4745_v49 = vpop.f32.mrf.mxu1 }
 0x628   : > { %3916 = vst [vmem:[%s7375_s29] sm:$0xff] %v3884_v42  ;;  %v3677_v21 = vadd.f32 %v4745_v49, %v7368_v39  ;;  %v3835_v42 = vld [vmem:[%s5734_s14 + $0x78] sm:$0xff] }
 0x629   : > { %v3671_v45 = vpop.f32.mrf.mxu1 }
 0x62a   : > { %v3855_v60 = vmax.f32 %v3677_v21, 0.0  ;;  %v3672_v33 = vadd.f32 %v7368_v39, %v3671_v45  ;;  %v3834_v45 = vld [vmem:[%s5734_s14 + $0x70] sm:$0xff] }
 0x62c   : > { %v3887_v25 = vadd.f32 %v3855_v60, %v3823_v55  ;;  %v3854_v40 = vmax.f32 %v3672_v33, 0.0 }
 0x62e   : > { %3919 = vst [vmem:[%s7375_s29 + $0x18] sm:$0xff] %v3887_v25  ;;  %v3886_v41 = vadd.f32 %v3854_v40, %v3822_v1 }
 0x62f   : > { %v4748_v58 = vpop.f32.mrf.mxu1 }
 0x630   : > { %3918 = vst [vmem:[%s7375_s29 + $0x10] sm:$0xff] %v3886_v41  ;;  %v3687_v3 = vadd.f32 %v4748_v58, %v7368_v39  ;;  %v3837_v41 = vld [vmem:[%s5734_s14 + $0x88] sm:$0xff] }
 0x631   : > { %v3681_v28 = vpop.f32.mrf.mxu1 }
 0x632   : > { %v3857_v53 = vmax.f32 %v3687_v3, 0.0  ;;  %v3682_v57 = vadd.f32 %v7368_v39, %v3681_v28  ;;  %v3836_v28 = vld [vmem:[%s5734_s14 + $0x80] sm:$0xff] }
 0x634   : > { %v3889_v13 = vadd.f32 %v3857_v53, %v3825_v5  ;;  %v3856_v20 = vmax.f32 %v3682_v57, 0.0 }
 0x636   : > { %3921 = vst [vmem:[%s7375_s29 + $0x28] sm:$0xff] %v3889_v13  ;;  %v3888_v24 = vadd.f32 %v3856_v20, %v3824_v27 }
 0x637   : > { %v4751_v10 = vpop.f32.mrf.mxu1 }
 0x638   : > { %3920 = vst [vmem:[%s7375_s29 + $0x20] sm:$0xff] %v3888_v24  ;;  %v3697_v2 = vadd.f32 %v4751_v10, %v7368_v39  ;;  %v3839_v24 = vld [vmem:[%s5734_s14 + $0x98] sm:$0xff] }
 0x639   : > { %v3691_v15 = vpop.f32.mrf.mxu1 }
 0x63a   : > { %v3859_v29 = vmax.f32 %v3697_v2, 0.0  ;;  %v3692_v4 = vadd.f32 %v7368_v39, %v3691_v15  ;;  %v3838_v15 = vld [vmem:[%s5734_s14 + $0x90] sm:$0xff] }
 0x63c   : > { %v3891_v17 = vadd.f32 %v3859_v29, %v3827_v22  ;;  %v3858_v14 = vmax.f32 %v3692_v4, 0.0 }
 0x63e   : > { %3923 = vst [vmem:[%s7375_s29 + $0x38] sm:$0xff] %v3891_v17  ;;  %v3890_v61 = vadd.f32 %v3858_v14, %v3826_v38 }
 0x63f   : > { %v4754_v31 = vpop.f32.mrf.mxu1 }
 0x640   : > { %3922 = vst [vmem:[%s7375_s29 + $0x30] sm:$0xff] %v3890_v61  ;;  %v3707_v52 = vadd.f32 %v4754_v31, %v7368_v39  ;;  %v3841_v61 = vld [vmem:[%s5734_s14 + $0xa8] sm:$0xff] }
 0x641   : > { %v3701_v54 = vpop.f32.mrf.mxu1 }
 0x642   : > { %v3861_v63 = vmax.f32 %v3707_v52, 0.0  ;;  %v3702_v44 = vadd.f32 %v7368_v39, %v3701_v54  ;;  %v3840_v54 = vld [vmem:[%s5734_s14 + $0xa0] sm:$0xff] }
 0x644   : > { %v3893_v59 = vadd.f32 %v3861_v63, %v3829_v47  ;;  %v3860_v26 = vmax.f32 %v3702_v44, 0.0 }
 0x646   : > { %3925 = vst [vmem:[%s7375_s29 + $0x48] sm:$0xff] %v3893_v59  ;;  %v3892_v48 = vadd.f32 %v3860_v26, %v3828_v11 }
 0x647   : > { %v4757_v50 = vpop.f32.mrf.mxu1 }
 0x648   : > { %3924 = vst [vmem:[%s7375_s29 + $0x40] sm:$0xff] %v3892_v48  ;;  %v3717_v36 = vadd.f32 %v4757_v50, %v7368_v39  ;;  %v3843_v48 = vld [vmem:[%s5734_s14 + $0xb8] sm:$0xff] }
 0x649   : > { %v3711_v0 = vpop.f32.mrf.mxu1 }
 0x64a   : > { %v3863_v19 = vmax.f32 %v3717_v36, 0.0  ;;  %v3712_v30 = vadd.f32 %v7368_v39, %v3711_v0  ;;  %v3842_v0 = vld [vmem:[%s5734_s14 + $0xb0] sm:$0xff] }
 0x64c   : > { %v3895_v18 = vadd.f32 %v3863_v19, %v3831_v51  ;;  %v3862_v23 = vmax.f32 %v3712_v30, 0.0 }
 0x64e   : > { %3927 = vst [vmem:[%s7375_s29 + $0x58] sm:$0xff] %v3895_v18  ;;  %v3894_v32 = vadd.f32 %v3862_v23, %v3830_v16 }
 0x64f   : > { %v4760_v43 = vpop.f32.mrf.mxu1 }
 0x650   : > { %3926 = vst [vmem:[%s7375_s29 + $0x50] sm:$0xff] %v3894_v32  ;;  %v3727_v12 = vadd.f32 %v4760_v43, %v7368_v39  ;;  %v3845_v32 = vld [vmem:[%s5734_s14 + $0xc8] sm:$0xff] }
 0x651   : > { %v3721_v34 = vpop.f32.mrf.mxu1 }
 0x652   : > { %v3865_v56 = vmax.f32 %v3727_v12, 0.0  ;;  %v3722_v8 = vadd.f32 %v7368_v39, %v3721_v34  ;;  %v3844_v34 = vld [vmem:[%s5734_s14 + $0xc0] sm:$0xff] }
 0x654   : > { %v3897_v46 = vadd.f32 %v3865_v56, %v3833_v7  ;;  %v3864_v6 = vmax.f32 %v3722_v8, 0.0 }
 0x656   : > { %3929 = vst [vmem:[%s7375_s29 + $0x68] sm:$0xff] %v3897_v46  ;;  %v3896_v37 = vadd.f32 %v3864_v6, %v3832_v62 }
 0x657   : > { %v4763_v9 = vpop.f32.mrf.mxu1 }
 0x658   : > { %3928 = vst [vmem:[%s7375_s29 + $0x60] sm:$0xff] %v3896_v37  ;;  %v3737_v35 = vadd.f32 %v4763_v9, %v7368_v39  ;;  %v3847_v37 = vld [vmem:[%s5734_s14 + $0xd8] sm:$0xff] }
 0x659   : > { %v3731_v49 = vpop.f32.mrf.mxu1 }
 0x65a   : > { %v3867_v21 = vmax.f32 %v3737_v35, 0.0  ;;  %v3732_v55 = vadd.f32 %v7368_v39, %v3731_v49  ;;  %v3846_v49 = vld [vmem:[%s5734_s14 + $0xd0] sm:$0xff] }
 0x65c   : > { %v3899_v60 = vadd.f32 %v3867_v21, %v3835_v42  ;;  %v3866_v33 = vmax.f32 %v3732_v55, 0.0 }
 0x65e   : > { %3931 = vst [vmem:[%s7375_s29 + $0x78] sm:$0xff] %v3899_v60  ;;  %v3898_v1 = vadd.f32 %v3866_v33, %v3834_v45 }
 0x65f   : > { %v4766_v25 = vpop.f32.mrf.mxu1 }
 0x660   : > { %3930 = vst [vmem:[%s7375_s29 + $0x70] sm:$0xff] %v3898_v1  ;;  %v3747_v40 = vadd.f32 %v4766_v25, %v7368_v39  ;;  %v3849_v1 = vld [vmem:[%s5734_s14 + $0xe8] sm:$0xff] }
 0x661   : > { %v3741_v58 = vpop.f32.mrf.mxu1 }
 0x662   : > { %v3869_v3 = vmax.f32 %v3747_v40, 0.0  ;;  %v3742_v5 = vadd.f32 %v7368_v39, %v3741_v58  ;;  %v3848_v58 = vld [vmem:[%s5734_s14 + $0xe0] sm:$0xff] }
 0x664   : > { %v3901_v53 = vadd.f32 %v3869_v3, %v3837_v41  ;;  %v3868_v57 = vmax.f32 %v3742_v5, 0.0 }
 0x666   : > { %3933 = vst [vmem:[%s7375_s29 + $0x88] sm:$0xff] %v3901_v53  ;;  %v3900_v27 = vadd.f32 %v3868_v57, %v3836_v28  ;;  %v3851_v57 = vld [vmem:[%s5734_s14 + $0xf8] sm:$0xff] }
 0x667   : > { %v4769_v13 = vpop.f32.mrf.mxu1 }
 0x668   : > { %3932 = vst [vmem:[%s7375_s29 + $0x80] sm:$0xff] %v3900_v27  ;;  %v3757_v20 = vadd.f32 %v4769_v13, %v7368_v39 }
 0x669   : > { %v3751_v10 = vpop.f32.mrf.mxu1 }
 0x66a   : > { %v3871_v2 = vmax.f32 %v3757_v20, 0.0  ;;  %v3752_v22 = vadd.f32 %v7368_v39, %v3751_v10  ;;  %v3850_v10 = vld [vmem:[%s5734_s14 + $0xf0] sm:$0xff]  ;;  %s5460_s14 = smov [#allocation18]  }
 0x66b   : > { %s5358_s23 = sshll.u32 %s5460_s14, 4  ;;  %s5359_s23 = int_to_ptr.vmem [resolvable:$false] %s5358_s23 }
 0x66c   : > { %v3903_v29 = vadd.f32 %v3871_v2, %v3839_v24  ;;  %v3870_v4 = vmax.f32 %v3752_v22, 0.0  ;;  %s5360_s25 = scalar_lea.vmem %s5359_s23, 8192  ;;  %p5361_p6 = scmp.lt.s32.totalorder %s7474_s20, %s5359_s23 }
 0x66d   : > { %p5362_p9 = scmp.lt.s32.totalorder %s5360_s25, %s5354_s3 }
 0x66e   : > { %3935 = vst [vmem:[%s7375_s29 + $0x98] sm:$0xff] %v3903_v29  ;;  %v3902_v38 = vadd.f32 %v3870_v4, %v3838_v15 }
 0x66f   : > { %v4772_v17 = vpop.f32.mrf.mxu1  ;;  %p5363_p13 = por %p5362_p9, %p5361_p6 }
 0x670   : > { %3934 = vst [vmem:[%s7375_s29 + $0x90] sm:$0xff] %v3902_v38  ;;  %v3767_v14 = vadd.f32 %v4772_v17, %v7368_v39 }
 0x671   : > { %v3761_v31 = vpop.f32.mrf.mxu1  ;;  %p5364_p0 = pnand %p5363_p13, %p5357_p3 }
 0x672   : > { %v3873_v52 = vmax.f32 %v3767_v14, 0.0  ;;  %v3762_v47 = vadd.f32 %v7368_v39, %v3761_v31 }
 0x674   : > { %v3905_v63 = vadd.f32 %v3873_v52, %v3841_v61  ;;  %v3872_v44 = vmax.f32 %v3762_v47, 0.0 }
 0x676   : > { %3937 = vst [vmem:[%s7375_s29 + $0xa8] sm:$0xff] %v3905_v63  ;;  %v3904_v11 = vadd.f32 %v3872_v44, %v3840_v54 }
 0x677   : > { %v4775_v59 = vpop.f32.mrf.mxu1 }
 0x678   : > { %3936 = vst [vmem:[%s7375_s29 + $0xa0] sm:$0xff] %v3904_v11  ;;  %v3777_v26 = vadd.f32 %v4775_v59, %v7368_v39 }
 0x679   : > { %v3771_v50 = vpop.f32.mrf.mxu1 }
 0x67a   : > { %v3875_v36 = vmax.f32 %v3777_v26, 0.0  ;;  %v3772_v51 = vadd.f32 %v7368_v39, %v3771_v50 }
 0x67c   : > { %v3907_v19 = vadd.f32 %v3875_v36, %v3843_v48  ;;  %v3874_v30 = vmax.f32 %v3772_v51, 0.0 }
 0x67e   : > { %3939 = vst [vmem:[%s7375_s29 + $0xb8] sm:$0xff] %v3907_v19  ;;  %v3906_v16 = vadd.f32 %v3874_v30, %v3842_v0 }
 0x67f   : > { %v4778_v18 = vpop.f32.mrf.mxu1 }
 0x680   : > { %3938 = vst [vmem:[%s7375_s29 + $0xb0] sm:$0xff] %v3906_v16  ;;  %v3787_v23 = vadd.f32 %v4778_v18, %v7368_v39 }
 0x681   : > { %v3781_v43 = vpop.f32.mrf.mxu1 }
 0x682   : > { %v3877_v12 = vmax.f32 %v3787_v23, 0.0  ;;  %v3782_v7 = vadd.f32 %v7368_v39, %v3781_v43 }
 0x684   : > { %v3909_v56 = vadd.f32 %v3877_v12, %v3845_v32  ;;  %v3876_v8 = vmax.f32 %v3782_v7, 0.0 }
 0x686   : > { %3941 = vst [vmem:[%s7375_s29 + $0xc8] sm:$0xff] %v3909_v56  ;;  %v3908_v62 = vadd.f32 %v3876_v8, %v3844_v34 }
 0x687   : > { %v4781_v46 = vpop.f32.mrf.mxu1 }
 0x688   : > { %3940 = vst [vmem:[%s7375_s29 + $0xc0] sm:$0xff] %v3908_v62  ;;  %v3797_v6 = vadd.f32 %v4781_v46, %v7368_v39 }
 0x689   : > { %v3791_v9 = vpop.f32.mrf.mxu1 }
 0x68a   : > { %v3879_v35 = vmax.f32 %v3797_v6, 0.0  ;;  %v3792_v42 = vadd.f32 %v7368_v39, %v3791_v9 }
 0x68c   : > { %v3911_v21 = vadd.f32 %v3879_v35, %v3847_v37  ;;  %v3878_v55 = vmax.f32 %v3792_v42, 0.0 }
 0x68e   : > { %3943 = vst [vmem:[%s7375_s29 + $0xd8] sm:$0xff] %v3911_v21  ;;  %v3910_v45 = vadd.f32 %v3878_v55, %v3846_v49 }
 0x68f   : > { %v4784_v60 = vpop.f32.mrf.mxu1 }
 0x690   : > { %3942 = vst [vmem:[%s7375_s29 + $0xd0] sm:$0xff] %v3910_v45  ;;  %v3807_v33 = vadd.f32 %v4784_v60, %v7368_v39 }
 0x691   : > { %v3801_v25 = vpop.f32.mrf.mxu1 }
 0x692   : > { %v3881_v40 = vmax.f32 %v3807_v33, 0.0  ;;  %v3802_v41 = vadd.f32 %v7368_v39, %v3801_v25 }
 0x693   : > { %v4787_v3 = vpop.f32.mrf.mxu1 }
 0x694   : > { %v3913_v5 = vadd.f32 %v3881_v40, %v3849_v1  ;;  %v3880_v28 = vmax.f32 %v3802_v41, 0.0  ;;  %v3817_v53 = vadd.f32 %v4787_v3, %v7368_v39 }
 0x695   : > { %v3811_v27 = vpop.f32.mrf.mxu1 }
 0x696   : > { %3945 = vst [vmem:[%s7375_s29 + $0xe8] sm:$0xff] %v3913_v5  ;;  %v3912_v13 = vadd.f32 %v3880_v28, %v3848_v58  ;;  %v3883_v20 = vmax.f32 %v3817_v53, 0.0  ;;  %v3812_v24 = vadd.f32 %v7368_v39, %v3811_v27 }
 0x698   : > { %3944 = vst [vmem:[%s7375_s29 + $0xe0] sm:$0xff] %v3912_v13  ;;  %v3915_v2 = vadd.f32 %v3883_v20, %v3851_v57  ;;  %v3882_v22 = vmax.f32 %v3812_v24, 0.0 }
 0x69a   : > { %3947 = vst [vmem:[%s7375_s29 + $0xf8] sm:$0xff] %v3915_v2  ;;  %v3914_v15 = vadd.f32 %v3882_v22, %v3850_v10 }
 0x69c   : > { %3946 = vst [vmem:[%s7375_s29 + $0xf0] sm:$0xff] %v3914_v15 }
 0x69d   : > { %5367 = shalt.err (!%p5364_p0)
}
 0x69e   : > { %s5368_s7 = scalar_lea.hbm %s7472_s11, 4096  ;;  %s5372_s12 = scalar_lea.hbm %s7885_s24, 8192 }
 0x69f   : > { %p5369_p11 = scmp.ne.s32.totalorder %s7472_s11, %s5368_s7  ;;  %p5373_p8 = scmp.lt.s32.totalorder %s7472_s11, %s7885_s24 }
 0x6a0   : > { %p5374_p12 = scmp.lt.s32.totalorder %s5372_s12, %s5368_s7 }
 0x6a1   : > { %p5370_p10 = pnand %p5369_p11, %p5620_p7 }
 0x6a2   : > { %p5375_p5 = por %p5374_p12, %p5373_p8 }
 0x6a3   : > { %p5371_p1 = pneg %p5370_p10 }
 0x6a5   : > { %p5376_p4 = pnand %p5375_p5, %p5371_p1 }
 0x6a7   : > { %5379 = shalt.err (!%p5376_p4)
}
 0x6a8   : > { %s5461_s29 = smov 128   ;;  %s5462_s30 = smov 8  }
 0x6a9   : > { %4810 = dma.vmem_to_hbm [thread:$0]  (%p5620_p7), %s7474_s20, 4096, %s7472_s11, %s3949_s27, %s5461_s29, %s5461_s29, %s5462_s30  }
 0x6aa PF: > { %s7886_s16 = sld [smem:[#allocation24_spill]] }
 0x6ab   : > { %s7887_s13 = sld [smem:[#allocation28_spill]] }
 0x6ac   : > { %s7888_s15 = sld [smem:[#allocation27_spill]] }
 0x6b0   : > { %s3979_s21 = sand.u32 1, %s7886_s16  }
 0x6b1   : > { %p7889_p2 = scmp.ne.s32.totalorder %s7887_s13, 0  ;;  %s3980_s3 = scalar_lea.sflag [#allocation8], %s3979_s21 }
 0x6b2   : > { %p7890_p3 = scmp.ge.s32.totalorder %s7888_s15, 2 }
 0x6b4   : > { %p4836_p6 = pnand %p7890_p3, %p7889_p2 }
 0x6b6   : > { %p4837_p9 = pneg %p4836_p6 }
 0x6b8   : > { %5421 = dma.done.wait (%p4837_p9), %s3980_s3, 4096  }
 0x6b9   : > { %5423 = vsyncadd (%p4837_p9), %s3980_s3, 4294963200  ;;  %s32_s22 = sadd.s32 1, %s7888_s15   ;;  %s7891_s14 = sld [smem:[#allocation31_spill]] }
 0x6ba   : > { %p29_p13 = scmp.ge.s32.totalorder %s32_s22, 4   ;;  %s7892_s20 = sld [smem:[#allocation26_spill]] }
 0x6bb   : > { %s7893_s21 = sld [smem:[#allocation29_spill]]  ;;  %s7894_s17 = smov %s5430_s18 }
 0x6bc   : > { %s7895_s18 = smov %s5434_s19  ;;  %31 = sbr.rel (!%p29_p13) target bundleno = 16 (0x10), region = 157 }
 0x6bf   : > { %s7896_s19 = smov %s7891_s14 }
 0x6c1   :  { %3985 = vsyncpa [#allocation7], 1 }
 0x6c2   :  { %3987 = vsyncpa [#allocation7 + $0x1], 1 }
 0x6c3   :  { %3988 = vsyncpa [#allocation10], 1 }
 0x6c4   :  { %3990 = vsyncpa [#allocation10 + $0x1], 1 }
 0x6c5   :  { %3991 = vsyncpa [#allocation13], 1 }
 0x6c6   :  { %3992 = vsyncpa [#allocation16], 1 }
 0x6c7   :  { %3993 = vsyncpa [#allocation8], 1 }
 0x6c8   :  { %3995 = vsyncpa [#allocation8 + $0x1], 1 }

</bundles_post_ra>
